<compile_context>
chip_gen: v7x
topology: tpu7x:2x2x1
jax: 0.10.0
libtpu: 0.0.40
codegen_flags: <defaults>
</compile_context>

<pallas_src>
import functools

import jax
import jax.numpy as jnp
from jax.experimental import pallas as pl
from jax.experimental.pallas import tpu as pltpu

EPS = 1e-5
NEG_SLOPE = 0.1


def _round_up(x, m):
    return ((x + m - 1) // m) * m


def _choose_tm(M, tm):
    """Row-tile choice: big tiles for large M, >=2 grid steps when possible
    (v7x megacore), single full-extent block for tiny M."""
    if M >= 2 * tm:
        return tm
    if M <= 16:
        return M                       # block == full dim (always legal)
    half = -(-M // 2)                  # ceil(M / 2) -> two parallel steps
    half = _round_up(half, 8)          # sublane aligned
    return min(half, tm)


def _leaky(y):
    return jnp.where(y >= 0, y, NEG_SLOPE * y)


# ----------------------------------------------------------------------------
# Kernel 1: fused  out = act( X @ (W * scale) + shift )   (scale pre-folded)
# ----------------------------------------------------------------------------
def _fused_mm_kernel(x_ref, w_ref, shift_ref, o_ref, *, apply_act):
    acc = jnp.dot(x_ref[...], w_ref[...], preferred_element_type=jnp.float32)
    y = acc + shift_ref[...]
    if apply_act:
        y = _leaky(y)
    o_ref[...] = y.astype(o_ref.dtype)


def fused_matmul(x, w, scale, shift, *, apply_act=True,
                 out_dtype=jnp.bfloat16, tm=512):
    """x: (M, K), w: (K, N), scale/shift: (N,) -> (M, N) in out_dtype."""
    M, K = x.shape
    K2, N = w.shape
    assert K == K2

    # Fold the BN/bias scale into the (constant) weight columns at trace time.
    wf = w.astype(jnp.float32) * scale.astype(jnp.float32)[None, :]
    shift2 = shift.reshape(1, N).astype(jnp.float32)

    # Lane-dense output: pad Cout up to a multiple of 128 with zero columns.
    Np = _round_up(N, 128)
    if Np != N:
        wf = jnp.pad(wf, ((0, 0), (0, Np - N)))
        shift2 = jnp.pad(shift2, ((0, 0), (0, Np - N)))

    # Pad tiny contraction dims (conv1: K=9) to a packing-friendly multiple
    # of 16 with zero rows/columns (no effect on the result).
    Kp = _round_up(K, 16)
    xb = x.astype(jnp.bfloat16)
    if Kp != K:
        xb = jnp.pad(xb, ((0, 0), (0, Kp - K)))
        wf = jnp.pad(wf, ((0, Kp - K), (0, 0)))
    wb = wf.astype(jnp.bfloat16)

    tm_eff = _choose_tm(M, tm)
    grid = (pl.cdiv(M, tm_eff),)       # ragged last block: padded reads,
                                       # masked writes -- no explicit M pad.
    out = pl.pallas_call(
        functools.partial(_fused_mm_kernel, apply_act=apply_act),
        out_shape=jax.ShapeDtypeStruct((M, Np), out_dtype),
        grid=grid,
        in_specs=[
            pl.BlockSpec((tm_eff, Kp), lambda i: (i, 0)),
            pl.BlockSpec((Kp, Np), lambda i: (0, 0)),
            pl.BlockSpec((1, Np), lambda i: (0, 0)),
        ],
        out_specs=pl.BlockSpec((tm_eff, Np), lambda i: (i, 0)),
        compiler_params=pltpu.CompilerParams(
            dimension_semantics=("parallel",)),
    )(xb, wb, shift2)

    return out[:, :N] if Np != N else out


# ----------------------------------------------------------------------------
# Kernel 2: fused network tail
#   conv4-matmul + BN4 + LeakyReLU + MaxPool2x2 + fc1 + BN_fc + LeakyReLU + fc2
# All intermediates stay in VMEM; a single launch for the whole tiny tail.
# ----------------------------------------------------------------------------
def _tail_kernel(p4_ref, w4_ref, s4_ref, w5_ref, s5_ref, w6_ref, s6_ref,
                 o_ref, *, batch):
    # conv4 as matmul (scale folded into w4), f32 accumulate.
    h = jnp.dot(p4_ref[...], w4_ref[...], preferred_element_type=jnp.float32)
    h = _leaky(h + s4_ref[...])                       # (4*batch, 256)

    # MaxPool2d(2) over the 2x2 spatial of conv4's output == max over the 4
    # consecutive rows of each sample; spatial becomes 1x1 so this is also the
    # flatten to (batch, 256).
    parts = []
    for n in range(batch):
        parts.append(jnp.max(h[4 * n:4 * n + 4, :], axis=0, keepdims=True))
    g = jnp.concatenate(parts, axis=0)                # (batch, 256) f32

    # fc1 + BN_fc (folded) + LeakyReLU.  Dropout is identity in eval mode.
    g = jnp.dot(g.astype(w5_ref.dtype), w5_ref[...],
                preferred_element_type=jnp.float32)
    g = _leaky(g + s5_ref[...])                       # (batch, 128)

    # fc2 (bias only, no activation).
    out = jnp.dot(g.astype(w6_ref.dtype), w6_ref[...],
                  preferred_element_type=jnp.float32)
    o_ref[...] = (out + s6_ref[...]).astype(o_ref.dtype)


def tail_forward(x_pool3, params):
    """x_pool3: (B, 2, 2, 128) bf16 -> logits (B, num_classes) f32."""
    num_classes = params["fc2"][0].shape[0]

    # conv4 weights folded with BN4.
    w4, b4 = params["conv4"]                              # (256,128,3,3)
    scale4, shift4 = fold_bn(b4, *params["bn4"])
    w4m = jnp.transpose(w4, (2, 3, 1, 0)).reshape(-1, 256)
    w4f = (w4m * scale4[None, :]).astype(jnp.bfloat16)    # (1152, 256)
    s4 = shift4.reshape(1, -1).astype(jnp.float32)

    # fc1 folded with BN_fc.
    w5, b5 = params["fc1"]                                # (128, 256)
    scale5, shift5 = fold_bn(b5, *params["bn_fc"])
    w5f = (w5.T * scale5[None, :]).astype(jnp.bfloat16)   # (256, 128)
    s5 = shift5.reshape(1, -1).astype(jnp.float32)

    # fc2: bias only; pad output lanes to 128 (lane-dense store).
    w6, b6 = params["fc2"]                                # (nc, 128)
    NCp = _round_up(num_classes, 128)
    w6f = jnp.pad(w6.T.astype(jnp.float32),
                  ((0, 0), (0, NCp - num_classes))).astype(jnp.bfloat16)
    s6 = jnp.pad(b6.reshape(1, -1).astype(jnp.float32),
                 ((0, 0), (0, NCp - num_classes)))

    patches, (B, Ho, Wo) = im2col(x_pool3, k=3, pad=1)    # (B*4, 1152)
    assert Ho == 2 and Wo == 2, "tail kernel assumes 2x2 spatial before pool4"
    p4 = patches.astype(jnp.bfloat16)

    out = pl.pallas_call(
        functools.partial(_tail_kernel, batch=B),
        out_shape=jax.ShapeDtypeStruct((B, NCp), jnp.float32),
        grid=(1,),
        in_specs=[
            pl.BlockSpec(p4.shape, lambda i: (0, 0)),
            pl.BlockSpec(w4f.shape, lambda i: (0, 0)),
            pl.BlockSpec(s4.shape, lambda i: (0, 0)),
            pl.BlockSpec(w5f.shape, lambda i: (0, 0)),
            pl.BlockSpec(s5.shape, lambda i: (0, 0)),
            pl.BlockSpec(w6f.shape, lambda i: (0, 0)),
            pl.BlockSpec(s6.shape, lambda i: (0, 0)),
        ],
        out_specs=pl.BlockSpec((B, NCp), lambda i: (0, 0)),
        compiler_params=pltpu.CompilerParams(
            dimension_semantics=("arbitrary",)),
    )(p4, w4f, s4, w5f, s5, w6f, s6)
    return out[:, :num_classes]


# ----------------------------------------------------------------------------
# Plain-JAX glue: im2col (no activation transpose), maxpool, BN folding
# ----------------------------------------------------------------------------
def im2col(x_nhwc, k, pad):
    """(N,H,W,C) -> (N*Ho*Wo, k*k*C); column order is (dy, dx, cin), matched
    by permuting the (tiny, constant) conv weight instead of the activations."""
    N, H, W, C = x_nhwc.shape
    xp = jnp.pad(x_nhwc, ((0, 0), (pad, pad), (pad, pad), (0, 0)))
    Ho = H + 2 * pad - k + 1
    Wo = W + 2 * pad - k + 1
    cols = [xp[:, dy:dy + Ho, dx:dx + Wo, :]
            for dy in range(k) for dx in range(k)]
    p = jnp.concatenate(cols, axis=-1)                    # (N,Ho,Wo,k*k*C)
    return p.reshape(N * Ho * Wo, k * k * C), (N, Ho, Wo)


def maxpool2x2(x_nhwc):
    N, H, W, C = x_nhwc.shape
    return x_nhwc.reshape(N, H // 2, 2, W // 2, 2, C).max(axis=(2, 4))


def fold_bn(bias, gamma, beta, rmean, rvar):
    """Fold conv/linear bias + eval-mode BatchNorm into (scale, shift)."""
    scale = gamma / jnp.sqrt(rvar + EPS)
    shift = beta + (bias - rmean) * scale
    return scale, shift


# ----------------------------------------------------------------------------
# Deterministic parameter construction (shapes per OptimizedCNN.__init__)
# ----------------------------------------------------------------------------
def make_params(num_classes, key):
    params = {}

    def conv(key, cout, cin, k):
        kw, kb = jax.random.split(key)
        fan_in = cin * k * k
        w = jax.random.normal(kw, (cout, cin, k, k), jnp.float32) / jnp.sqrt(fan_in)
        b = 0.01 * jax.random.normal(kb, (cout,), jnp.float32)
        return w, b

    def bn(key, c):
        k1, k2, k3, k4 = jax.random.split(key, 4)
        gamma = 1.0 + 0.1 * jax.random.normal(k1, (c,), jnp.float32)
        beta = 0.1 * jax.random.normal(k2, (c,), jnp.float32)
        rmean = 0.05 * jax.random.normal(k3, (c,), jnp.float32)
        rvar = jax.random.uniform(k4, (c,), jnp.float32, 0.5, 1.5)
        return gamma, beta, rmean, rvar

    def linear(key, cout, cin):
        kw, kb = jax.random.split(key)
        w = jax.random.normal(kw, (cout, cin), jnp.float32) / jnp.sqrt(cin)
        b = 0.01 * jax.random.normal(kb, (cout,), jnp.float32)
        return w, b

    keys = jax.random.split(key, 11)
    params["conv1"] = conv(keys[0], 32, 1, 3)
    params["bn1"] = bn(keys[1], 32)
    params["conv2"] = conv(keys[2], 64, 32, 3)
    params["bn2"] = bn(keys[3], 64)
    params["conv3"] = conv(keys[4], 128, 64, 6)
    params["bn3"] = bn(keys[5], 128)
    params["conv4"] = conv(keys[6], 256, 128, 3)
    params["bn4"] = bn(keys[7], 256)
    params["fc1"] = linear(keys[8], 128, 256)
    params["bn_fc"] = bn(keys[9], 128)
    params["fc2"] = linear(keys[10], num_classes, 128)
    return params


# ----------------------------------------------------------------------------
# Forward pass
# ----------------------------------------------------------------------------
def conv_bn_relu_pool(x_nhwc, conv_p, bn_p, k, pad):
    w, b = conv_p
    cout = w.shape[0]
    patches, (N, Ho, Wo) = im2col(x_nhwc, k, pad)          # (M, k*k*Cin)
    # (Cout,Cin,kh,kw) -> (kh,kw,Cin,Cout): matches im2col (dy,dx,cin) order.
    w_mat = jnp.transpose(w, (2, 3, 1, 0)).reshape(-1, cout)
    scale, shift = fold_bn(b, *bn_p)
    y = fused_matmul(patches, w_mat, scale, shift,
                     apply_act=True, out_dtype=jnp.bfloat16)
    y = y.reshape(N, Ho, Wo, cout)
    return maxpool2x2(y)


def optimized_cnn_forward(x_nchw, params):
    # NCHW -> NHWC, bf16 for all inter-layer traffic (f32 accumulation inside).
    x = jnp.transpose(x_nchw, (0, 2, 3, 1)).astype(jnp.bfloat16)
    x = conv_bn_relu_pool(x, params["conv1"], params["bn1"], k=3, pad=1)
    x = conv_bn_relu_pool(x, params["conv2"], params["bn2"], k=3, pad=1)
    x = conv_bn_relu_pool(x, params["conv3"], params["bn3"], k=6, pad=1)
    # Fused tail: conv4 + BN4 + LeakyReLU + pool + fc1 + BN_fc + LeakyReLU + fc2
    return tail_forward(x, params)


if __name__ == "__main__":
    num_classes = 10
    key = jax.random.PRNGKey(0)
    k_params, k_input = jax.random.split(key)

    params = make_params(num_classes, k_params)
    # 28x28 single-channel input (required so the flatten yields exactly 256).
    x = jax.random.normal(k_input, (2, 1, 28, 28), jnp.float32)

    logits = jax.jit(optimized_cnn_forward)(x, params)
    jax.block_until_ready(logits)
    assert logits.shape == (2, num_classes)
    print("KERNEL_OK")
</pallas_src>

<mosaic_0001>
module attributes {stable_mosaic.version = 11 : i64} {
  func.func @_fused_mm_kernel(%arg0: i32, %arg1: memref<512x16xbf16, #tpu.memory_space<vmem>>, %arg2: memref<16x128xbf16, #tpu.memory_space<vmem>>, %arg3: memref<1x128xf32, #tpu.memory_space<vmem>>, %arg4: memref<512x128xbf16, #tpu.memory_space<vmem>>) attributes {dimension_semantics = [#tpu.dimension_semantics<parallel>], iteration_bounds = array<i64: 4>, scalar_prefetch = 0 : i64, scratch_operands = 0 : i64, tpu.core_type = #tpu.core_type<tc>, window_params = [{transform_indices = @transform_0, window_bounds = array<i64: 512, 16>}, {pipeline_mode = #tpu.pipeline_mode<synchronous>, transform_indices = @transform_1, window_bounds = array<i64: 16, 128>}, {pipeline_mode = #tpu.pipeline_mode<synchronous>, transform_indices = @transform_2, window_bounds = array<i64: 1, 128>}, {transform_indices = @transform_3, window_bounds = array<i64: 512, 128>}]} {
    %c0 = arith.constant 0 : index
    %c0_0 = arith.constant 0 : index
    %0 = vector.load %arg1[%c0, %c0_0] : memref<512x16xbf16, #tpu.memory_space<vmem>>, vector<512x16xbf16>
    %c0_1 = arith.constant 0 : index
    %c0_2 = arith.constant 0 : index
    %1 = vector.load %arg2[%c0_1, %c0_2] : memref<16x128xbf16, #tpu.memory_space<vmem>>, vector<16x128xbf16>
    %cst = arith.constant dense<0.000000e+00> : vector<512x128xf32>
    %2 = tpu.matmul %0, %1, %cst {dimension_numbers = #tpu.dot_dimension_numbers<[1], [0], [0], [1], [0, 0, 1, 1], [], []>} : vector<512x16xbf16>, vector<16x128xbf16>, vector<512x128xf32> -> vector<512x128xf32>
    %c0_3 = arith.constant 0 : index
    %c0_4 = arith.constant 0 : index
    %3 = vector.load %arg3[%c0_3, %c0_4] : memref<1x128xf32, #tpu.memory_space<vmem>>, vector<1x128xf32>
    %4 = vector.broadcast %3 : vector<1x128xf32> to vector<512x128xf32>
    %5 = arith.addf %2, %4 : vector<512x128xf32>
    %cst_5 = arith.constant 0.000000e+00 : f32
    %6 = vector.broadcast %cst_5 : f32 to vector<512x128xf32>
    %7 = arith.cmpf oge, %5, %6 : vector<512x128xf32>
    %cst_6 = arith.constant 1.000000e-01 : f32
    %8 = vector.broadcast %cst_6 : f32 to vector<512x128xf32>
    %9 = arith.mulf %8, %5 : vector<512x128xf32>
    %10 = arith.select %7, %5, %9 : vector<512x128xi1>, vector<512x128xf32>
    %11 = arith.truncf %10 : vector<512x128xf32> to vector<512x128xbf16>
    %c0_7 = arith.constant 0 : index
    %c0_8 = arith.constant 0 : index
    %12 = vector.load %arg4[%c0_7, %c0_8] : memref<512x128xbf16, #tpu.memory_space<vmem>>, vector<512x128xbf16>
    tpu.vector_store %arg4[%c0_7, %c0_8], %11 {strides = array<i32>} : memref<512x128xbf16, #tpu.memory_space<vmem>>, vector<512x128xbf16>,
    return
  }
  func.func @transform_0(%arg0: i32) -> (i32, i32) {
    %c0_i32 = arith.constant 0 : i32
    %c0_i32_0 = arith.constant 0 : i32
    return %arg0, %c0_i32 : i32, i32
  }
  func.func @transform_1(%arg0: i32) -> (i32, i32) {
    %c0_i32 = arith.constant 0 : i32
    %c0_i32_0 = arith.constant 0 : i32
    %c0_i32_1 = arith.constant 0 : i32
    return %c0_i32, %c0_i32_0 : i32, i32
  }
  func.func @transform_2(%arg0: i32) -> (i32, i32) {
    %c0_i32 = arith.constant 0 : i32
    %c0_i32_0 = arith.constant 0 : i32
    %c0_i32_1 = arith.constant 0 : i32
    return %c0_i32, %c0_i32_0 : i32, i32
  }
  func.func @transform_3(%arg0: i32) -> (i32, i32) {
    %c0_i32 = arith.constant 0 : i32
    %c0_i32_0 = arith.constant 0 : i32
    return %arg0, %c0_i32 : i32, i32
  }
}

module attributes {stable_mosaic.version = 11 : i64} {
  func.func @_fused_mm_kernel(%arg0: i32, %arg1: memref<200x288xbf16, #tpu.memory_space<vmem>>, %arg2: memref<288x128xbf16, #tpu.memory_space<vmem>>, %arg3: memref<1x128xf32, #tpu.memory_space<vmem>>, %arg4: memref<200x128xbf16, #tpu.memory_space<vmem>>) attributes {dimension_semantics = [#tpu.dimension_semantics<parallel>], iteration_bounds = array<i64: 2>, scalar_prefetch = 0 : i64, scratch_operands = 0 : i64, tpu.core_type = #tpu.core_type<tc>, window_params = [{transform_indices = @transform_0, window_bounds = array<i64: 200, 288>}, {pipeline_mode = #tpu.pipeline_mode<synchronous>, transform_indices = @transform_1, window_bounds = array<i64: 288, 128>}, {pipeline_mode = #tpu.pipeline_mode<synchronous>, transform_indices = @transform_2, window_bounds = array<i64: 1, 128>}, {transform_indices = @transform_3, window_bounds = array<i64: 200, 128>}]} {
    %c0 = arith.constant 0 : index
    %c0_0 = arith.constant 0 : index
    %0 = vector.load %arg1[%c0, %c0_0] : memref<200x288xbf16, #tpu.memory_space<vmem>>, vector<200x288xbf16>
    %c0_1 = arith.constant 0 : index
    %c0_2 = arith.constant 0 : index
    %1 = vector.load %arg2[%c0_1, %c0_2] : memref<288x128xbf16, #tpu.memory_space<vmem>>, vector<288x128xbf16>
    %cst = arith.constant dense<0.000000e+00> : vector<200x128xf32>
    %2 = tpu.matmul %0, %1, %cst {dimension_numbers = #tpu.dot_dimension_numbers<[1], [0], [0], [1], [0, 0, 1, 1], [], []>} : vector<200x288xbf16>, vector<288x128xbf16>, vector<200x128xf32> -> vector<200x128xf32>
    %c0_3 = arith.constant 0 : index
    %c0_4 = arith.constant 0 : index
    %3 = vector.load %arg3[%c0_3, %c0_4] : memref<1x128xf32, #tpu.memory_space<vmem>>, vector<1x128xf32>
    %4 = vector.broadcast %3 : vector<1x128xf32> to vector<200x128xf32>
    %5 = arith.addf %2, %4 : vector<200x128xf32>
    %cst_5 = arith.constant 0.000000e+00 : f32
    %6 = vector.broadcast %cst_5 : f32 to vector<200x128xf32>
    %7 = arith.cmpf oge, %5, %6 : vector<200x128xf32>
    %cst_6 = arith.constant 1.000000e-01 : f32
    %8 = vector.broadcast %cst_6 : f32 to vector<200x128xf32>
    %9 = arith.mulf %8, %5 : vector<200x128xf32>
    %10 = arith.select %7, %5, %9 : vector<200x128xi1>, vector<200x128xf32>
    %11 = arith.truncf %10 : vector<200x128xf32> to vector<200x128xbf16>
    %c0_7 = arith.constant 0 : index
    %c0_8 = arith.constant 0 : index
    %12 = vector.load %arg4[%c0_7, %c0_8] : memref<200x128xbf16, #tpu.memory_space<vmem>>, vector<200x128xbf16>
    tpu.vector_store %arg4[%c0_7, %c0_8], %11 {strides = array<i32>} : memref<200x128xbf16, #tpu.memory_space<vmem>>, vector<200x128xbf16>,
    return
  }
  func.func @transform_0(%arg0: i32) -> (i32, i32) {
    %c0_i32 = arith.constant 0 : i32
    %c0_i32_0 = arith.constant 0 : i32
    return %arg0, %c0_i32 : i32, i32
  }
  func.func @transform_1(%arg0: i32) -> (i32, i32) {
    %c0_i32 = arith.constant 0 : i32
    %c0_i32_0 = arith.constant 0 : i32
    %c0_i32_1 = arith.constant 0 : i32
    return %c0_i32, %c0_i32_0 : i32, i32
  }
  func.func @transform_2(%arg0: i32) -> (i32, i32) {
    %c0_i32 = arith.constant 0 : i32
    %c0_i32_0 = arith.constant 0 : i32
    %c0_i32_1 = arith.constant 0 : i32
    return %c0_i32, %c0_i32_0 : i32, i32
  }
  func.func @transform_3(%arg0: i32) -> (i32, i32) {
    %c0_i32 = arith.constant 0 : i32
    %c0_i32_0 = arith.constant 0 : i32
    return %arg0, %c0_i32 : i32, i32
  }
}

module attributes {stable_mosaic.version = 11 : i64} {
  func.func @_fused_mm_kernel(%arg0: i32, %arg1: memref<16x2304xbf16, #tpu.memory_space<vmem>>, %arg2: memref<2304x128xbf16, #tpu.memory_space<vmem>>, %arg3: memref<1x128xf32, #tpu.memory_space<vmem>>, %arg4: memref<16x128xbf16, #tpu.memory_space<vmem>>) attributes {dimension_semantics = [#tpu.dimension_semantics<parallel>], iteration_bounds = array<i64: 2>, scalar_prefetch = 0 : i64, scratch_operands = 0 : i64, tpu.core_type = #tpu.core_type<tc>, window_params = [{transform_indices = @transform_0, window_bounds = array<i64: 16, 2304>}, {pipeline_mode = #tpu.pipeline_mode<synchronous>, transform_indices = @transform_1, window_bounds = array<i64: 2304, 128>}, {pipeline_mode = #tpu.pipeline_mode<synchronous>, transform_indices = @transform_2, window_bounds = array<i64: 1, 128>}, {transform_indices = @transform_3, window_bounds = array<i64: 16, 128>}]} {
    %c0 = arith.constant 0 : index
    %c0_0 = arith.constant 0 : index
    %0 = vector.load %arg1[%c0, %c0_0] : memref<16x2304xbf16, #tpu.memory_space<vmem>>, vector<16x2304xbf16>
    %c0_1 = arith.constant 0 : index
    %c0_2 = arith.constant 0 : index
    %1 = vector.load %arg2[%c0_1, %c0_2] : memref<2304x128xbf16, #tpu.memory_space<vmem>>, vector<2304x128xbf16>
    %cst = arith.constant dense<0.000000e+00> : vector<16x128xf32>
    %2 = tpu.matmul %0, %1, %cst {dimension_numbers = #tpu.dot_dimension_numbers<[1], [0], [0], [1], [0, 0, 1, 1], [], []>} : vector<16x2304xbf16>, vector<2304x128xbf16>, vector<16x128xf32> -> vector<16x128xf32>
    %c0_3 = arith.constant 0 : index
    %c0_4 = arith.constant 0 : index
    %3 = vector.load %arg3[%c0_3, %c0_4] : memref<1x128xf32, #tpu.memory_space<vmem>>, vector<1x128xf32>
    %4 = vector.broadcast %3 : vector<1x128xf32> to vector<16x128xf32>
    %5 = arith.addf %2, %4 : vector<16x128xf32>
    %cst_5 = arith.constant 0.000000e+00 : f32
    %6 = vector.broadcast %cst_5 : f32 to vector<16x128xf32>
    %7 = arith.cmpf oge, %5, %6 : vector<16x128xf32>
    %cst_6 = arith.constant 1.000000e-01 : f32
    %8 = vector.broadcast %cst_6 : f32 to vector<16x128xf32>
    %9 = arith.mulf %8, %5 : vector<16x128xf32>
    %10 = arith.select %7, %5, %9 : vector<16x128xi1>, vector<16x128xf32>
    %11 = arith.truncf %10 : vector<16x128xf32> to vector<16x128xbf16>
    %c0_7 = arith.constant 0 : index
    %c0_8 = arith.constant 0 : index
    %12 = vector.load %arg4[%c0_7, %c0_8] : memref<16x128xbf16, #tpu.memory_space<vmem>>, vector<16x128xbf16>
    tpu.vector_store %arg4[%c0_7, %c0_8], %11 {strides = array<i32>} : memref<16x128xbf16, #tpu.memory_space<vmem>>, vector<16x128xbf16>,
    return
  }
  func.func @transform_0(%arg0: i32) -> (i32, i32) {
    %c0_i32 = arith.constant 0 : i32
    %c0_i32_0 = arith.constant 0 : i32
    return %arg0, %c0_i32 : i32, i32
  }
  func.func @transform_1(%arg0: i32) -> (i32, i32) {
    %c0_i32 = arith.constant 0 : i32
    %c0_i32_0 = arith.constant 0 : i32
    %c0_i32_1 = arith.constant 0 : i32
    return %c0_i32, %c0_i32_0 : i32, i32
  }
  func.func @transform_2(%arg0: i32) -> (i32, i32) {
    %c0_i32 = arith.constant 0 : i32
    %c0_i32_0 = arith.constant 0 : i32
    %c0_i32_1 = arith.constant 0 : i32
    return %c0_i32, %c0_i32_0 : i32, i32
  }
  func.func @transform_3(%arg0: i32) -> (i32, i32) {
    %c0_i32 = arith.constant 0 : i32
    %c0_i32_0 = arith.constant 0 : i32
    return %arg0, %c0_i32 : i32, i32
  }
}

module attributes {stable_mosaic.version = 11 : i64} {
  func.func @_tail_kernel(%arg0: i32, %arg1: memref<8x1152xbf16, #tpu.memory_space<vmem>>, %arg2: memref<1152x256xbf16, #tpu.memory_space<vmem>>, %arg3: memref<1x256xf32, #tpu.memory_space<vmem>>, %arg4: memref<256x128xbf16, #tpu.memory_space<vmem>>, %arg5: memref<1x128xf32, #tpu.memory_space<vmem>>, %arg6: memref<128x128xbf16, #tpu.memory_space<vmem>>, %arg7: memref<1x128xf32, #tpu.memory_space<vmem>>, %arg8: memref<2x128xf32, #tpu.memory_space<vmem>>) attributes {dimension_semantics = [#tpu.dimension_semantics<arbitrary>], iteration_bounds = array<i64: 1>, scalar_prefetch = 0 : i64, scratch_operands = 0 : i64, tpu.core_type = #tpu.core_type<tc>, window_params = [{pipeline_mode = #tpu.pipeline_mode<synchronous>, transform_indices = @transform_0, window_bounds = array<i64: 8, 1152>}, {pipeline_mode = #tpu.pipeline_mode<synchronous>, transform_indices = @transform_1, window_bounds = array<i64: 1152, 256>}, {pipeline_mode = #tpu.pipeline_mode<synchronous>, transform_indices = @transform_2, window_bounds = array<i64: 1, 256>}, {pipeline_mode = #tpu.pipeline_mode<synchronous>, transform_indices = @transform_3, window_bounds = array<i64: 256, 128>}, {pipeline_mode = #tpu.pipeline_mode<synchronous>, transform_indices = @transform_4, window_bounds = array<i64: 1, 128>}, {pipeline_mode = #tpu.pipeline_mode<synchronous>, transform_indices = @transform_5, window_bounds = array<i64: 128, 128>}, {pipeline_mode = #tpu.pipeline_mode<synchronous>, transform_indices = @transform_6, window_bounds = array<i64: 1, 128>}, {pipeline_mode = #tpu.pipeline_mode<synchronous>, transform_indices = @transform_7, window_bounds = array<i64: 2, 128>}]} {
    %c0 = arith.constant 0 : index
    %c0_0 = arith.constant 0 : index
    %0 = vector.load %arg1[%c0, %c0_0] : memref<8x1152xbf16, #tpu.memory_space<vmem>>, vector<8x1152xbf16>
    %c0_1 = arith.constant 0 : index
    %c0_2 = arith.constant 0 : index
    %1 = vector.load %arg2[%c0_1, %c0_2] : memref<1152x256xbf16, #tpu.memory_space<vmem>>, vector<1152x256xbf16>
    %cst = arith.constant dense<0.000000e+00> : vector<8x256xf32>
    %2 = tpu.matmul %0, %1, %cst {dimension_numbers = #tpu.dot_dimension_numbers<[1], [0], [0], [1], [0, 0, 1, 1], [], []>} : vector<8x1152xbf16>, vector<1152x256xbf16>, vector<8x256xf32> -> vector<8x256xf32>
    %c0_3 = arith.constant 0 : index
    %c0_4 = arith.constant 0 : index
    %3 = vector.load %arg3[%c0_3, %c0_4] : memref<1x256xf32, #tpu.memory_space<vmem>>, vector<1x256xf32>
    %4 = vector.broadcast %3 : vector<1x256xf32> to vector<8x256xf32>
    %5 = arith.addf %2, %4 : vector<8x256xf32>
    %cst_5 = arith.constant 0.000000e+00 : f32
    %6 = vector.broadcast %cst_5 : f32 to vector<8x256xf32>
    %7 = arith.cmpf oge, %5, %6 : vector<8x256xf32>
    %cst_6 = arith.constant 1.000000e-01 : f32
    %8 = vector.broadcast %cst_6 : f32 to vector<8x256xf32>
    %9 = arith.mulf %8, %5 : vector<8x256xf32>
    %10 = arith.select %7, %5, %9 : vector<8x256xi1>, vector<8x256xf32>
    %11 = vector.extract_strided_slice %10 {offsets = [0, 0], sizes = [4, 256], strides = [1, 1]} : vector<8x256xf32> to vector<4x256xf32>
    %cst_7 = arith.constant dense<0xFF800000> : vector<256xf32>
    %12 = vector.multi_reduction <maximumf>, %11, %cst_7 [0] : vector<4x256xf32> to vector<256xf32>
    %13 = vector.shape_cast %12 : vector<256xf32> to vector<1x256xf32>
    %14 = vector.extract_strided_slice %10 {offsets = [4, 0], sizes = [4, 256], strides = [1, 1]} : vector<8x256xf32> to vector<4x256xf32>
    %cst_8 = arith.constant dense<0xFF800000> : vector<256xf32>
    %15 = vector.multi_reduction <maximumf>, %14, %cst_8 [0] : vector<4x256xf32> to vector<256xf32>
    %16 = vector.shape_cast %15 : vector<256xf32> to vector<1x256xf32>
    %17 = tpu.concatenate %13, %16 in 0 : vector<1x256xf32>, vector<1x256xf32> -> vector<2x256xf32>
    %18 = arith.truncf %17 : vector<2x256xf32> to vector<2x256xbf16>
    %c0_9 = arith.constant 0 : index
    %c0_10 = arith.constant 0 : index
    %19 = vector.load %arg4[%c0_9, %c0_10] : memref<256x128xbf16, #tpu.memory_space<vmem>>, vector<256x128xbf16>
    %cst_11 = arith.constant dense<0.000000e+00> : vector<2x128xf32>
    %20 = tpu.matmul %18, %19, %cst_11 {dimension_numbers = #tpu.dot_dimension_numbers<[1], [0], [0], [1], [0, 0, 1, 1], [], []>} : vector<2x256xbf16>, vector<256x128xbf16>, vector<2x128xf32> -> vector<2x128xf32>
    %c0_12 = arith.constant 0 : index
    %c0_13 = arith.constant 0 : index
    %21 = vector.load %arg5[%c0_12, %c0_13] : memref<1x128xf32, #tpu.memory_space<vmem>>, vector<1x128xf32>
    %22 = vector.broadcast %21 : vector<1x128xf32> to vector<2x128xf32>
    %23 = arith.addf %20, %22 : vector<2x128xf32>
    %cst_14 = arith.constant 0.000000e+00 : f32
    %24 = vector.broadcast %cst_14 : f32 to vector<2x128xf32>
    %25 = arith.cmpf oge, %23, %24 : vector<2x128xf32>
    %cst_15 = arith.constant 1.000000e-01 : f32
    %26 = vector.broadcast %cst_15 : f32 to vector<2x128xf32>
    %27 = arith.mulf %26, %23 : vector<2x128xf32>
    %28 = arith.select %25, %23, %27 : vector<2x128xi1>, vector<2x128xf32>
    %29 = arith.truncf %28 : vector<2x128xf32> to vector<2x128xbf16>
    %c0_16 = arith.constant 0 : index
    %c0_17 = arith.constant 0 : index
    %30 = vector.load %arg6[%c0_16, %c0_17] : memref<128x128xbf16, #tpu.memory_space<vmem>>, vector<128x128xbf16>
    %cst_18 = arith.constant dense<0.000000e+00> : vector<2x128xf32>
    %31 = tpu.matmul %29, %30, %cst_18 {dimension_numbers = #tpu.dot_dimension_numbers<[1], [0], [0], [1], [0, 0, 1, 1], [], []>} : vector<2x128xbf16>, vector<128x128xbf16>, vector<2x128xf32> -> vector<2x128xf32>
    %c0_19 = arith.constant 0 : index
    %c0_20 = arith.constant 0 : index
    %32 = vector.load %arg7[%c0_19, %c0_20] : memref<1x128xf32, #tpu.memory_space<vmem>>, vector<1x128xf32>
    %33 = vector.broadcast %32 : vector<1x128xf32> to vector<2x128xf32>
    %34 = arith.addf %31, %33 : vector<2x128xf32>
    %c0_21 = arith.constant 0 : index
    %c0_22 = arith.constant 0 : index
    %35 = vector.load %arg8[%c0_21, %c0_22] : memref<2x128xf32, #tpu.memory_space<vmem>>, vector<2x128xf32>
    tpu.vector_store %arg8[%c0_21, %c0_22], %34 {strides = array<i32>} : memref<2x128xf32, #tpu.memory_space<vmem>>, vector<2x128xf32>,
    return
  }
  func.func @transform_0(%arg0: i32) -> (i32, i32) {
    %c0_i32 = arith.constant 0 : i32
    %c0_i32_0 = arith.constant 0 : i32
    %c0_i32_1 = arith.constant 0 : i32
    return %c0_i32, %c0_i32_0 : i32, i32
  }
  func.func @transform_1(%arg0: i32) -> (i32, i32) {
    %c0_i32 = arith.constant 0 : i32
    %c0_i32_0 = arith.constant 0 : i32
    %c0_i32_1 = arith.constant 0 : i32
    return %c0_i32, %c0_i32_0 : i32, i32
  }
  func.func @transform_2(%arg0: i32) -> (i32, i32) {
    %c0_i32 = arith.constant 0 : i32
    %c0_i32_0 = arith.constant 0 : i32
    %c0_i32_1 = arith.constant 0 : i32
    return %c0_i32, %c0_i32_0 : i32, i32
  }
  func.func @transform_3(%arg0: i32) -> (i32, i32) {
    %c0_i32 = arith.constant 0 : i32
    %c0_i32_0 = arith.constant 0 : i32
    %c0_i32_1 = arith.constant 0 : i32
    return %c0_i32, %c0_i32_0 : i32, i32
  }
  func.func @transform_4(%arg0: i32) -> (i32, i32) {
    %c0_i32 = arith.constant 0 : i32
    %c0_i32_0 = arith.constant 0 : i32
    %c0_i32_1 = arith.constant 0 : i32
    return %c0_i32, %c0_i32_0 : i32, i32
  }
  func.func @transform_5(%arg0: i32) -> (i32, i32) {
    %c0_i32 = arith.constant 0 : i32
    %c0_i32_0 = arith.constant 0 : i32
    %c0_i32_1 = arith.constant 0 : i32
    return %c0_i32, %c0_i32_0 : i32, i32
  }
  func.func @transform_6(%arg0: i32) -> (i32, i32) {
    %c0_i32 = arith.constant 0 : i32
    %c0_i32_0 = arith.constant 0 : i32
    %c0_i32_1 = arith.constant 0 : i32
    return %c0_i32, %c0_i32_0 : i32, i32
  }
  func.func @transform_7(%arg0: i32) -> (i32, i32) {
    %c0_i32 = arith.constant 0 : i32
    %c0_i32_0 = arith.constant 0 : i32
    %c0_i32_1 = arith.constant 0 : i32
    return %c0_i32, %c0_i32_0 : i32, i32
  }
}

</mosaic_0001>

<bundles_post_ra>
// kernel: optimized_cnn_forward.4
= control target key start
LH: loop header
LB: loop body
LE: loop exit
PB: predicated region body
PF: predicated region fallthrough
CT: control target
= control target key end

     0   :  { %s2538_s12 = smov 0   ;;  %s2540_s13 = smov 0   ;;  %s2950_s0 = inlined_call_operand.vmem [shape: bf16[1568,16], index: 0, kind: input, shape index: {}]   ;;  %s2951_s1 = inlined_call_operand.vmem [shape: bf16[16,128], index: 1, kind: input, shape index: {}]   ;;  %s2952_s2 = inlined_call_operand.vmem [shape: f32[1,128], index: 2, kind: input, shape index: {}]   ;;  %s2953_s3 = inlined_call_operand.vmem [shape: bf16[1568,128], index: 3, kind: output, shape index: {}]  }
   0x1   :  { %s2542_s14 = smov 0  }
   0x2 LB: > { %s2551_s15 = sadd.s32 4294967295, %s2484_s14   ;;  %s2553_s16 = sadd.s32 1, %s2484_s14   ;;  %s2484_s14 = sphi %s2542_s14, %s2960_s14   ;;  %s2480_s13 = sphi %s2540_s13, %s2959_s13   ;;  %s2476_s12 = sphi %s2538_s12, %s2958_s12  }
   0x3   : > { %s85_s17 = ssub.s32 %s2484_s14, %s2553_s16  ;;  %s88_s18 = sadd.s32 1, %s2480_s13 }
   0x4   : > { %p86_p0 = scmp.eq.s32.totalorder %s85_s17, 0  ;;  %p98_p1 = scmp.ne.s32.totalorder %s2480_s13, %s2476_s12 }
   0x5   : > { %p99_p2 = scmp.eq.s32.totalorder %s2551_s15, 3  ;;  %p1799_p3 = scmp.ge.s32.totalorder %s2484_s14, 1 }
   0x6   : > { %s2561_s19 = scalar_select %p86_p0, %s2480_s13, %s88_s18  }
   0x7   : > { %p2563_p4 = por %p99_p2, %p98_p1  ;;  %p146_p5 = scmp.lt.s32.totalorder %s2484_s14, 5 }
   0x9   : > { %p147_p6 = pnand %p1799_p3, %p146_p5 }
   0xa   : > { %v2397_v0 = vld [vmem:[%s2951_s1] sm:$0xff] (!%p147_p6)   ;;  %s2571_s23 = sshll.u32 (!%p147_p6), %s2551_s15, 6  ;;  %vm432_vm0 = vcmask (!%p147_p6), 130048   ;;  %s170_s4 = sand.u32 (!%p147_p6), 1, %s2476_s12  }
   0xb   : > { %150 = sbr.rel (%p147_p6) target bundleno = 404 (0x194), region = 32  ;;  %p178_p7 = scmp.lt.s32.totalorder (!%p147_p6), %s2571_s23, 195  ;;  %2241 = vmatprep.subr.bf16.mxu0 (!%p147_p6), %v2397_v0  ;;  %2307 = vmatprep.subr.bf16.mxu1 (!%p147_p6), %v2397_v0  ;;  %v2647_v33 = vld [vmem:[%s2952_s2] ss:$0 sm:$0xff] (!%p147_p6) }
   0xc   : > { %2242 = vmatpush3.bf16.msra.mxu0 (!%p147_p6), %v2397_v0  ;;  %2308 = vmatpush3.bf16.msra.mxu1 (!%p147_p6), %v2397_v0  ;;  %s1800_s5 = sshll.u32 (!%p147_p6), %s170_s4, 8 }
   0xd   : > { %s2660_s6 = scalar_lea.vmem (!%p147_p6), [#allocation2], %s1800_s5  }
  0x12   : > { %s179_s24 = scalar_select %p178_p7, %s2571_s23, 195 }
  0x13   : > { %s1338_s7 = ssub.s32 (%p2563_p4), 196, %s2571_s23  ;;  %s2014_s8 = sshll.u32 (%p2563_p4), %s2551_s15, 8 }
  0x14   : > { %s1802_s25 = sshll.u32 %s179_s24, 2  ;;  %p1339_p8 = scmp.lt.s32.totalorder (%p2563_p4), %s1338_s7, 64 }
  0x15   : > { %s2578_s28 = scalar_lea.vmem %s2950_s0, %s1802_s25  ;;  %s2758_s11 = scalar_lea.vmem (%p2563_p4), %s2953_s3, %s2014_s8  }
  0x16   : > { %v2398_v1 = vld [vmem:[%s2578_s28] sm:$0xff]   ;;  %v2400_v3 = vld [vmem:[%s2578_s28 + $0x8] sm:$0xff]   ;;  %v2402_v5 = vld [vmem:[%s2578_s28 + $0x10] sm:$0xff]  }
  0x17   : > { %v2399_v2 = vld [vmem:[%s2578_s28 + $0x80] sm:$0xff]   ;;  %2243 = vmatprep.mubr.msk.bf16.mxu0 %vm432_vm0, %v2398_v1  ;;  %v2401_v4 = vld [vmem:[%s2578_s28 + $0x88] sm:$0xff]   ;;  %v2403_v6 = vld [vmem:[%s2578_s28 + $0x90] sm:$0xff]  }
  0x18   : > { %2275 = vmatprep.mubr.msk.bf16.mxu1 %vm432_vm0, %v2399_v2  ;;  %2244 = vmatmul.mubr.msk.bf16.vlgmr.msra.gmra.mrb[0].mxu0 %vm432_vm0, %v2400_v3  ;;  %v2404_v7 = vld [vmem:[%s2578_s28 + $0x18] sm:$0xff]   ;;  %v2406_v9 = vld [vmem:[%s2578_s28 + $0x20] sm:$0xff]   ;;  %v2408_v11 = vld [vmem:[%s2578_s28 + $0x28] sm:$0xff]  }
  0x19   : > { %2276 = vmatmul.mubr.msk.bf16.vlgmr.msra.gmra.mrb[0].mxu1 %vm432_vm0, %v2401_v4  ;;  %2247 = vmatprep.mubr.msk.bf16.mxu0 %vm432_vm0, %v2402_v5  ;;  %v2405_v8 = vld [vmem:[%s2578_s28 + $0x98] sm:$0xff]   ;;  %v2407_v10 = vld [vmem:[%s2578_s28 + $0xa0] sm:$0xff]   ;;  %v2409_v12 = vld [vmem:[%s2578_s28 + $0xa8] sm:$0xff]  }
  0x1a   : > { %2279 = vmatprep.mubr.msk.bf16.mxu1 %vm432_vm0, %v2403_v6  ;;  %v2410_v13 = vld [vmem:[%s2578_s28 + $0x30] sm:$0xff]   ;;  %v2412_v15 = vld [vmem:[%s2578_s28 + $0x38] sm:$0xff]   ;;  %v2414_v17 = vld [vmem:[%s2578_s28 + $0x40] sm:$0xff]  }
  0x1b   : > { %v2411_v14 = vld [vmem:[%s2578_s28 + $0xb0] sm:$0xff]   ;;  %v2413_v16 = vld [vmem:[%s2578_s28 + $0xb8] sm:$0xff]   ;;  %v2415_v18 = vld [vmem:[%s2578_s28 + $0xc0] sm:$0xff]  }
  0x1c   : > { %v2416_v19 = vld [vmem:[%s2578_s28 + $0x48] sm:$0xff]   ;;  %v2418_v21 = vld [vmem:[%s2578_s28 + $0x50] sm:$0xff]   ;;  %v2420_v23 = vld [vmem:[%s2578_s28 + $0x58] sm:$0xff]  }
  0x1d   : > { %v2417_v20 = vld [vmem:[%s2578_s28 + $0xc8] sm:$0xff]   ;;  %v2419_v22 = vld [vmem:[%s2578_s28 + $0xd0] sm:$0xff]   ;;  %v2421_v24 = vld [vmem:[%s2578_s28 + $0xd8] sm:$0xff]  }
  0x1e   : > { %v2422_v25 = vld [vmem:[%s2578_s28 + $0x60] sm:$0xff]   ;;  %v2424_v27 = vld [vmem:[%s2578_s28 + $0x68] sm:$0xff]   ;;  %v2426_v29 = vld [vmem:[%s2578_s28 + $0x70] sm:$0xff]  }
  0x1f   : > { %v2423_v26 = vld [vmem:[%s2578_s28 + $0xe0] sm:$0xff]   ;;  %v2425_v28 = vld [vmem:[%s2578_s28 + $0xe8] sm:$0xff]   ;;  %v2427_v30 = vld [vmem:[%s2578_s28 + $0xf0] sm:$0xff]  }
  0x20   : > { %2248 = vmatmul.mubr.msk.bf16.gmra.mrb[4].mxu0 %vm432_vm0, %v2404_v7  ;;  %v2428_v31 = vld [vmem:[%s2578_s28 + $0x78] sm:$0xff]  }
  0x21   : > { %2280 = vmatmul.mubr.msk.bf16.gmra.mrb[4].mxu1 %vm432_vm0, %v2405_v8  ;;  %2251 = vmatprep.mubr.msk.bf16.mxu0 %vm432_vm0, %v2406_v9  ;;  %v2429_v32 = vld [vmem:[%s2578_s28 + $0xf8] sm:$0xff]  }
  0x22   : > { %2283 = vmatprep.mubr.msk.bf16.mxu1 %vm432_vm0, %v2407_v10 }
  0x28   : > { %2252 = vmatmul.mubr.msk.bf16.gmra.mrb[8].mxu0 %vm432_vm0, %v2408_v11 }
  0x29   : > { %2284 = vmatmul.mubr.msk.bf16.gmra.mrb[8].mxu1 %vm432_vm0, %v2409_v12  ;;  %2255 = vmatprep.mubr.msk.bf16.mxu0 %vm432_vm0, %v2410_v13 }
  0x2a   : > { %2287 = vmatprep.mubr.msk.bf16.mxu1 %vm432_vm0, %v2411_v14 }
  0x30   : > { %2256 = vmatmul.mubr.msk.bf16.gmra.mrb[12].mxu0 %vm432_vm0, %v2412_v15 }
  0x31   : > { %2288 = vmatmul.mubr.msk.bf16.gmra.mrb[12].mxu1 %vm432_vm0, %v2413_v16  ;;  %2259 = vmatprep.mubr.msk.bf16.mxu0 %vm432_vm0, %v2414_v17 }
  0x32   : > { %2291 = vmatprep.mubr.msk.bf16.mxu1 %vm432_vm0, %v2415_v18 }
  0x38   : > { %2260 = vmatmul.mubr.msk.bf16.gmra.mrb[16].mxu0 %vm432_vm0, %v2416_v19 }
  0x39   : > { %2292 = vmatmul.mubr.msk.bf16.gmra.mrb[16].mxu1 %vm432_vm0, %v2417_v20  ;;  %2263 = vmatprep.mubr.msk.bf16.mxu0 %vm432_vm0, %v2418_v21 }
  0x3a   : > { %2295 = vmatprep.mubr.msk.bf16.mxu1 %vm432_vm0, %v2419_v22 }
  0x40   : > { %2264 = vmatmul.mubr.msk.bf16.gmra.mrb[20].mxu0 %vm432_vm0, %v2420_v23 }
  0x41   : > { %2296 = vmatmul.mubr.msk.bf16.gmra.mrb[20].mxu1 %vm432_vm0, %v2421_v24  ;;  %2267 = vmatprep.mubr.msk.bf16.mxu0 %vm432_vm0, %v2422_v25 }
  0x42   : > { %2299 = vmatprep.mubr.msk.bf16.mxu1 %vm432_vm0, %v2423_v26 }
  0x48   : > { %2268 = vmatmul.mubr.msk.bf16.gmra.mrb[24].mxu0 %vm432_vm0, %v2424_v27 }
  0x49   : > { %2300 = vmatmul.mubr.msk.bf16.gmra.mrb[24].mxu1 %vm432_vm0, %v2425_v28  ;;  %2271 = vmatprep.mubr.msk.bf16.mxu0 %vm432_vm0, %v2426_v29 }
  0x4a   : > { %2303 = vmatprep.mubr.msk.bf16.mxu1 %vm432_vm0, %v2427_v30 }
  0x50   : > { %2272 = vmatmul.mubr.msk.bf16.gmra.mrb[28].mxu0 %vm432_vm0, %v2428_v31 }
  0x51   : > { %2304 = vmatmul.mubr.msk.bf16.gmra.mrb[28].mxu1 %vm432_vm0, %v2429_v32 }
  0xeb   : > { %v2245_v34 = vpop.f32.mrb[0].mxu0 }
  0xec   : > { %v572_v35 = vadd.f32 %v2245_v34, %v2647_v33  ;;  %v2277_v36 = vpop.f32.mrb[0].mxu1  ;;  %v563_v37 = vpop.f32.mrb[1].mxu0 }
  0xed   : > { %v700_v38 = vadd.f32 %v2277_v36, %v2647_v33  ;;  %v564_v39 = vadd.f32 %v2647_v33, %v563_v37  ;;  %v691_v40 = vpop.f32.mrb[1].mxu1  ;;  %v2246_v41 = vpop.f32.mrb[2].mxu0 }
  0xee   : > { %vm820_vm1 = vcmp.ge.f32.partialorder %v572_v35, 0.0  ;;  %v884_v42 = vmul.f32 0.1, %v572_v35  ;;  %v692_v43 = vadd.f32 %v2647_v33, %v691_v40  ;;  %v575_v44 = vadd.f32 %v2246_v41, %v2647_v33  ;;  %v2278_v45 = vpop.f32.mrb[2].mxu1  ;;  %v566_v46 = vpop.f32.mrb[3].mxu0 }
  0xef   : > { %vm852_vm2 = vcmp.ge.f32.partialorder %v700_v38, 0.0  ;;  %v916_v47 = vmul.f32 0.1, %v700_v38  ;;  %vm818_vm3 = vcmp.ge.f32.partialorder %v564_v39, 0.0  ;;  %v882_v48 = vmul.f32 0.1, %v564_v39 }
  0xf0   : > { %vm850_vm4 = vcmp.ge.f32.partialorder %v692_v43, 0.0  ;;  %v914_v49 = vmul.f32 0.1, %v692_v43  ;;  %vm821_vm5 = vcmp.ge.f32.partialorder %v575_v44, 0.0  ;;  %v694_v50 = vpop.f32.mrb[3].mxu1  ;;  %v948_v51 = vsel %vm820_vm1, %v572_v35, %v884_v42 }
  0xf1   : > { %v885_v52 = vmul.f32 0.1, %v575_v44  ;;  %v703_v53 = vadd.f32 %v2278_v45, %v2647_v33  ;;  %v980_v54 = vsel %vm852_vm2, %v700_v38, %v916_v47  ;;  %v946_v55 = vsel %vm818_vm3, %v564_v39, %v882_v48 }
  0xf2   : > { %v567_v56 = vadd.f32 %v2647_v33, %v566_v46  ;;  %v695_v57 = vadd.f32 %v2647_v33, %v694_v50  ;;  %v978_v58 = vsel %vm850_vm4, %v692_v43, %v914_v49 }
  0xf3   : > { %v949_v59 = vsel %vm821_vm5, %v575_v44, %v885_v52  ;;  %vm853_vm6 = vcmp.ge.f32.partialorder %v703_v53, 0.0  ;;  %v917_v60 = vmul.f32 0.1, %v703_v53  ;;  %v2249_v61 = vpop.f32.mrb[4].mxu0 }
  0xf4   : > { %v2025_v62 = vpack.c.bf16 %v949_v59, %v948_v51  ;;  %vm819_vm7 = vcmp.ge.f32.partialorder %v567_v56, 0.0  ;;  %v883_v63 = vmul.f32 0.1, %v567_v56  ;;  %vm851_vm8 = vcmp.ge.f32.partialorder %v695_v57, 0.0  ;;  %v2281_v0 = vpop.f32.mrb[4].mxu1  ;;  %v579_v1 = vpop.f32.mrb[5].mxu0 }
  0xf5   : > { %v981_v2 = vsel %vm853_vm6, %v703_v53, %v917_v60  ;;  %v915_v3 = vmul.f32 0.1, %v695_v57  ;;  %v588_v4 = vadd.f32 %v2249_v61, %v2647_v33  ;;  %v716_v5 = vadd.f32 %v2281_v0, %v2647_v33  ;;  %v707_v6 = vpop.f32.mrb[5].mxu1  ;;  %v2250_v7 = vpop.f32.mrb[6].mxu0 }
  0xf6   : > { %2177 = vst [vmem:[%s2660_s6 + $0x8] sm:$0xff] %v2025_v62   ;;  %v2105_v8 = vpack.c.bf16 %v981_v2, %v980_v54  ;;  %v947_v9 = vsel %vm819_vm7, %v567_v56, %v883_v63  ;;  %v580_v10 = vadd.f32 %v2647_v33, %v579_v1  ;;  %v708_v11 = vadd.f32 %v2647_v33, %v707_v6  ;;  %v2282_v12 = vpop.f32.mrb[6].mxu1  ;;  %v582_v13 = vpop.f32.mrb[7].mxu0 }
  0xf7   : > { %v2020_v14 = vpack.c.bf16 %v947_v9, %v946_v55  ;;  %v979_v15 = vsel %vm851_vm8, %v695_v57, %v915_v3  ;;  %vm824_vm9 = vcmp.ge.f32.partialorder %v588_v4, 0.0  ;;  %v888_v16 = vmul.f32 0.1, %v588_v4  ;;  %v710_v17 = vpop.f32.mrb[7].mxu1 }
  0xf8   : > { %2193 = vst [vmem:[%s2660_s6 + $0x88] sm:$0xff] %v2105_v8   ;;  %v2100_v18 = vpack.c.bf16 %v979_v15, %v978_v58  ;;  %vm856_vm10 = vcmp.ge.f32.partialorder %v716_v5, 0.0  ;;  %v920_v19 = vmul.f32 0.1, %v716_v5  ;;  %vm822_vm11 = vcmp.ge.f32.partialorder %v580_v10, 0.0 }
  0xf9   : > { %2021 = vst [vmem:[%s2660_s6] sm:$0xff] %v2020_v14   ;;  %v952_v20 = vsel %vm824_vm9, %v588_v4, %v888_v16  ;;  %v886_v21 = vmul.f32 0.1, %v580_v10  ;;  %v918_v22 = vmul.f32 0.1, %v708_v11  ;;  %v591_v23 = vadd.f32 %v2250_v7, %v2647_v33 }
  0xfa   : > { %2192 = vst [vmem:[%s2660_s6 + $0x80] sm:$0xff] %v2100_v18   ;;  %v719_v24 = vadd.f32 %v2282_v12, %v2647_v33  ;;  %v583_v25 = vadd.f32 %v2647_v33, %v582_v13  ;;  %v984_v26 = vsel %vm856_vm10, %v716_v5, %v920_v19  ;;  %vm854_vm12 = vcmp.ge.f32.partialorder %v708_v11, 0.0 }
  0xfb   : > { %v950_v27 = vsel %vm822_vm11, %v580_v10, %v886_v21  ;;  %v711_v28 = vadd.f32 %v2647_v33, %v710_v17  ;;  %v2253_v29 = vpop.f32.mrb[8].mxu0  ;;  %vm825_vm13 = vcmp.ge.f32.partialorder %v591_v23, 0.0  ;;  %v889_v30 = vmul.f32 0.1, %v591_v23 }
  0xfc   : > { %vm857_vm14 = vcmp.ge.f32.partialorder %v719_v24, 0.0  ;;  %v921_v31 = vmul.f32 0.1, %v719_v24  ;;  %vm823_vm15 = vcmp.ge.f32.partialorder %v583_v25, 0.0  ;;  %v887_v32 = vmul.f32 0.1, %v583_v25 }
  0xfd   : > { %vm855_vm0 = vcmp.ge.f32.partialorder %v711_v28, 0.0  ;;  %v919_v34 = vmul.f32 0.1, %v711_v28  ;;  %v982_v35 = vsel %vm854_vm12, %v708_v11, %v918_v22  ;;  %v953_v36 = vsel %vm825_vm13, %v591_v23, %v889_v30  ;;  %v2285_v39 = vpop.f32.mrb[8].mxu1  ;;  %v595_v40 = vpop.f32.mrb[9].mxu0 }
  0xfe   : > { %v985_v37 = vsel %vm857_vm14, %v719_v24, %v921_v31  ;;  %v604_v38 = vadd.f32 %v2253_v29, %v2647_v33  ;;  %v2035_v41 = vpack.c.bf16 %v953_v36, %v952_v20  ;;  %v951_v43 = vsel %vm823_vm15, %v583_v25, %v887_v32  ;;  %v723_v45 = vpop.f32.mrb[9].mxu1  ;;  %v2254_v46 = vpop.f32.mrb[10].mxu0 }
  0xff   : > { %v2115_v42 = vpack.c.bf16 %v985_v37, %v984_v26  ;;  %v983_v44 = vsel %vm855_vm0, %v711_v28, %v919_v34  ;;  %v2030_v47 = vpack.c.bf16 %v951_v43, %v950_v27  ;;  %v2286_v50 = vpop.f32.mrb[10].mxu1  ;;  %v598_v51 = vpop.f32.mrb[11].mxu0  ;;  %v732_v52 = vadd.f32 %v2285_v39, %v2647_v33 }
 0x100   : > { %v2110_v48 = vpack.c.bf16 %v983_v44, %v982_v35  ;;  %vm828_vm1 = vcmp.ge.f32.partialorder %v604_v38, 0.0  ;;  %v892_v49 = vmul.f32 0.1, %v604_v38  ;;  %2179 = vst [vmem:[%s2660_s6 + $0x18] sm:$0xff] %v2035_v41   ;;  %v596_v53 = vadd.f32 %v2647_v33, %v595_v40  ;;  %v726_v56 = vpop.f32.mrb[11].mxu1 }
 0x101   : > { %2195 = vst [vmem:[%s2660_s6 + $0x98] sm:$0xff] %v2115_v42   ;;  %v724_v54 = vadd.f32 %v2647_v33, %v723_v45  ;;  %v607_v55 = vadd.f32 %v2254_v46, %v2647_v33  ;;  %2178 = vst [vmem:[%s2660_s6 + $0x10] sm:$0xff] %v2030_v47   ;;  %v735_v58 = vadd.f32 %v2286_v50, %v2647_v33  ;;  %vm860_vm2 = vcmp.ge.f32.partialorder %v732_v52, 0.0 }
 0x102   : > { %2194 = vst [vmem:[%s2660_s6 + $0x90] sm:$0xff] %v2110_v48   ;;  %v956_v57 = vsel %vm828_vm1, %v604_v38, %v892_v49  ;;  %v599_v59 = vadd.f32 %v2647_v33, %v598_v51  ;;  %v727_v60 = vadd.f32 %v2647_v33, %v726_v56  ;;  %v924_v61 = vmul.f32 0.1, %v732_v52 }
 0x103   : > { %vm826_vm3 = vcmp.ge.f32.partialorder %v596_v53, 0.0  ;;  %v890_v62 = vmul.f32 0.1, %v596_v53  ;;  %vm858_vm4 = vcmp.ge.f32.partialorder %v724_v54, 0.0  ;;  %v922_v63 = vmul.f32 0.1, %v724_v54 }
 0x104   : > { %vm829_vm5 = vcmp.ge.f32.partialorder %v607_v55, 0.0  ;;  %v893_v0 = vmul.f32 0.1, %v607_v55  ;;  %v988_v1 = vsel %vm860_vm2, %v732_v52, %v924_v61  ;;  %vm861_vm6 = vcmp.ge.f32.partialorder %v735_v58, 0.0  ;;  %v2257_v4 = vpop.f32.mrb[12].mxu0  ;;  %v2289_v5 = vpop.f32.mrb[12].mxu1 }
 0x105   : > { %v954_v2 = vsel %vm826_vm3, %v596_v53, %v890_v62  ;;  %v925_v3 = vmul.f32 0.1, %v735_v58  ;;  %v986_v6 = vsel %vm858_vm4, %v724_v54, %v922_v63  ;;  %vm827_vm7 = vcmp.ge.f32.partialorder %v599_v59, 0.0  ;;  %v611_v9 = vpop.f32.mrb[13].mxu0  ;;  %v739_v10 = vpop.f32.mrb[13].mxu1 }
 0x106   : > { %v957_v7 = vsel %vm829_vm5, %v607_v55, %v893_v0  ;;  %v891_v8 = vmul.f32 0.1, %v599_v59  ;;  %vm859_vm8 = vcmp.ge.f32.partialorder %v727_v60, 0.0  ;;  %v923_v13 = vmul.f32 0.1, %v727_v60  ;;  %v2258_v14 = vpop.f32.mrb[14].mxu0 }
 0x107   : > { %v2045_v11 = vpack.c.bf16 %v957_v7, %v956_v57  ;;  %v989_v12 = vsel %vm861_vm6, %v735_v58, %v925_v3  ;;  %v2290_v15 = vpop.f32.mrb[14].mxu1  ;;  %v620_v18 = vadd.f32 %v2257_v4, %v2647_v33  ;;  %v748_v19 = vadd.f32 %v2289_v5, %v2647_v33  ;;  %v614_v20 = vpop.f32.mrb[15].mxu0 }
 0x108   : > { %v2125_v16 = vpack.c.bf16 %v989_v12, %v988_v1  ;;  %v955_v17 = vsel %vm827_vm7, %v599_v59, %v891_v8  ;;  %v742_v21 = vpop.f32.mrb[15].mxu1  ;;  %v987_v23 = vsel %vm859_vm8, %v727_v60, %v923_v13  ;;  %v612_v24 = vadd.f32 %v2647_v33, %v611_v9 }
 0x109   : > { %2181 = vst [vmem:[%s2660_s6 + $0x28] sm:$0xff] %v2045_v11   ;;  %v2040_v22 = vpack.c.bf16 %v955_v17, %v954_v2  ;;  %v740_v25 = vadd.f32 %v2647_v33, %v739_v10  ;;  %v2120_v26 = vpack.c.bf16 %v987_v23, %v986_v6  ;;  %vm832_vm9 = vcmp.ge.f32.partialorder %v620_v18, 0.0 }
 0x10a   : > { %2197 = vst [vmem:[%s2660_s6 + $0xa8] sm:$0xff] %v2125_v16   ;;  %v896_v27 = vmul.f32 0.1, %v620_v18  ;;  %vm864_vm10 = vcmp.ge.f32.partialorder %v748_v19, 0.0  ;;  %v928_v28 = vmul.f32 0.1, %v748_v19  ;;  %v623_v32 = vadd.f32 %v2258_v14, %v2647_v33 }
 0x10b   : > { %2180 = vst [vmem:[%s2660_s6 + $0x20] sm:$0xff] %v2040_v22   ;;  %vm830_vm11 = vcmp.ge.f32.partialorder %v612_v24, 0.0  ;;  %v894_v29 = vmul.f32 0.1, %v612_v24  ;;  %vm862_vm12 = vcmp.ge.f32.partialorder %v740_v25, 0.0  ;;  %2196 = vst [vmem:[%s2660_s6 + $0xa0] sm:$0xff] %v2120_v26   ;;  %v751_v34 = vadd.f32 %v2290_v15, %v2647_v33 }
 0x10c   : > { %v960_v30 = vsel %vm832_vm9, %v620_v18, %v896_v27  ;;  %v926_v31 = vmul.f32 0.1, %v740_v25  ;;  %v2261_v35 = vpop.f32.mrb[16].mxu0  ;;  %v2293_v36 = vpop.f32.mrb[16].mxu1  ;;  %v992_v37 = vsel %vm864_vm10, %v748_v19, %v928_v28  ;;  %v615_v39 = vadd.f32 %v2647_v33, %v614_v20 }
 0x10d   : > { %v958_v38 = vsel %vm830_vm11, %v612_v24, %v894_v29  ;;  %v743_v40 = vadd.f32 %v2647_v33, %v742_v21  ;;  %v627_v41 = vpop.f32.mrb[17].mxu0  ;;  %v755_v42 = vpop.f32.mrb[17].mxu1  ;;  %vm833_vm13 = vcmp.ge.f32.partialorder %v623_v32, 0.0  ;;  %v897_v44 = vmul.f32 0.1, %v623_v32 }
 0x10e   : > { %v990_v43 = vsel %vm862_vm12, %v740_v25, %v926_v31  ;;  %vm865_vm14 = vcmp.ge.f32.partialorder %v751_v34, 0.0  ;;  %v2262_v45 = vpop.f32.mrb[18].mxu0  ;;  %v2294_v46 = vpop.f32.mrb[18].mxu1  ;;  %v929_v47 = vmul.f32 0.1, %v751_v34  ;;  %vm831_vm15 = vcmp.ge.f32.partialorder %v615_v39, 0.0 }
 0x10f   : > { %v895_v48 = vmul.f32 0.1, %v615_v39  ;;  %vm863_vm0 = vcmp.ge.f32.partialorder %v743_v40, 0.0  ;;  %v961_v49 = vsel %vm833_vm13, %v623_v32, %v897_v44  ;;  %v927_v50 = vmul.f32 0.1, %v743_v40  ;;  %v630_v53 = vpop.f32.mrb[19].mxu0 }
 0x110   : > { %v636_v51 = vadd.f32 %v2261_v35, %v2647_v33  ;;  %v764_v52 = vadd.f32 %v2293_v36, %v2647_v33  ;;  %v758_v54 = vpop.f32.mrb[19].mxu1  ;;  %v2055_v55 = vpack.c.bf16 %v961_v49, %v960_v30  ;;  %v993_v56 = vsel %vm865_vm14, %v751_v34, %v929_v47 }
 0x111   : > { %v959_v57 = vsel %vm831_vm15, %v615_v39, %v895_v48  ;;  %v628_v58 = vadd.f32 %v2647_v33, %v627_v41  ;;  %v2135_v59 = vpack.c.bf16 %v993_v56, %v992_v37  ;;  %v991_v61 = vsel %vm863_vm0, %v743_v40, %v927_v50 }
 0x112   : > { %v2050_v60 = vpack.c.bf16 %v959_v57, %v958_v38  ;;  %vm836_vm1 = vcmp.ge.f32.partialorder %v636_v51, 0.0  ;;  %2183 = vst [vmem:[%s2660_s6 + $0x38] sm:$0xff] %v2055_v55   ;;  %v2130_v62 = vpack.c.bf16 %v991_v61, %v990_v43  ;;  %v900_v63 = vmul.f32 0.1, %v636_v51 }
 0x113   : > { %vm868_vm2 = vcmp.ge.f32.partialorder %v764_v52, 0.0  ;;  %v932_v0 = vmul.f32 0.1, %v764_v52  ;;  %v2265_v1 = vpop.f32.mrb[20].mxu0  ;;  %2199 = vst [vmem:[%s2660_s6 + $0xb8] sm:$0xff] %v2135_v59   ;;  %vm834_vm3 = vcmp.ge.f32.partialorder %v628_v58, 0.0  ;;  %v756_v3 = vadd.f32 %v2647_v33, %v755_v42 }
 0x114   : > { %2182 = vst [vmem:[%s2660_s6 + $0x30] sm:$0xff] %v2050_v60   ;;  %v898_v2 = vmul.f32 0.1, %v628_v58  ;;  %v639_v4 = vadd.f32 %v2262_v45, %v2647_v33  ;;  %v2297_v5 = vpop.f32.mrb[20].mxu1  ;;  %v643_v6 = vpop.f32.mrb[21].mxu0  ;;  %2198 = vst [vmem:[%s2660_s6 + $0xb0] sm:$0xff] %v2130_v62   ;;  %v964_v7 = vsel %vm836_vm1, %v636_v51, %v900_v63  ;;  %v767_v9 = vadd.f32 %v2294_v46, %v2647_v33 }
 0x115   : > { %v996_v8 = vsel %vm868_vm2, %v764_v52, %v932_v0  ;;  %v631_v10 = vadd.f32 %v2647_v33, %v630_v53  ;;  %v771_v11 = vpop.f32.mrb[21].mxu1  ;;  %v2266_v12 = vpop.f32.mrb[22].mxu0  ;;  %vm866_vm4 = vcmp.ge.f32.partialorder %v756_v3, 0.0  ;;  %v930_v14 = vmul.f32 0.1, %v756_v3 }
 0x116   : > { %v962_v13 = vsel %vm834_vm3, %v628_v58, %v898_v2  ;;  %vm837_vm5 = vcmp.ge.f32.partialorder %v639_v4, 0.0  ;;  %v2298_v15 = vpop.f32.mrb[22].mxu1  ;;  %v646_v16 = vpop.f32.mrb[23].mxu0  ;;  %v901_v17 = vmul.f32 0.1, %v639_v4  ;;  %vm869_vm6 = vcmp.ge.f32.partialorder %v767_v9, 0.0 }
 0x117   : > { %v933_v18 = vmul.f32 0.1, %v767_v9  ;;  %vm835_vm7 = vcmp.ge.f32.partialorder %v631_v10, 0.0  ;;  %v994_v19 = vsel %vm866_vm4, %v756_v3, %v930_v14  ;;  %v899_v20 = vmul.f32 0.1, %v631_v10  ;;  %v774_v23 = vpop.f32.mrb[23].mxu1 }
 0x118   : > { %v759_v21 = vadd.f32 %v2647_v33, %v758_v54  ;;  %v652_v22 = vadd.f32 %v2265_v1, %v2647_v33  ;;  %v965_v24 = vsel %vm837_vm5, %v639_v4, %v901_v17  ;;  %v780_v26 = vadd.f32 %v2297_v5, %v2647_v33 }
 0x119   : > { %v997_v25 = vsel %vm869_vm6, %v767_v9, %v933_v18  ;;  %v644_v27 = vadd.f32 %v2647_v33, %v643_v6  ;;  %v2065_v28 = vpack.c.bf16 %v965_v24, %v964_v7  ;;  %v963_v30 = vsel %vm835_vm7, %v631_v10, %v899_v20 }
 0x11a   : > { %v2145_v29 = vpack.c.bf16 %v997_v25, %v996_v8  ;;  %vm867_vm8 = vcmp.ge.f32.partialorder %v759_v21, 0.0  ;;  %v2060_v31 = vpack.c.bf16 %v963_v30, %v962_v13  ;;  %v931_v32 = vmul.f32 0.1, %v759_v21 }
 0x11b   : > { %vm840_vm9 = vcmp.ge.f32.partialorder %v652_v22, 0.0  ;;  %v904_v34 = vmul.f32 0.1, %v652_v22  ;;  %v2269_v35 = vpop.f32.mrb[24].mxu0  ;;  %2185 = vst [vmem:[%s2660_s6 + $0x48] sm:$0xff] %v2065_v28   ;;  %vm872_vm10 = vcmp.ge.f32.partialorder %v780_v26, 0.0  ;;  %v772_v40 = vadd.f32 %v2647_v33, %v771_v11 }
 0x11c   : > { %2201 = vst [vmem:[%s2660_s6 + $0xc8] sm:$0xff] %v2145_v29   ;;  %v936_v36 = vmul.f32 0.1, %v780_v26  ;;  %vm838_vm11 = vcmp.ge.f32.partialorder %v644_v27, 0.0  ;;  %v902_v37 = vmul.f32 0.1, %v644_v27  ;;  %v995_v38 = vsel %vm867_vm8, %v759_v21, %v931_v32 }
 0x11d   : > { %2184 = vst [vmem:[%s2660_s6 + $0x40] sm:$0xff] %v2060_v31   ;;  %v968_v39 = vsel %vm840_vm9, %v652_v22, %v904_v34  ;;  %v655_v41 = vadd.f32 %v2266_v12, %v2647_v33  ;;  %v2301_v42 = vpop.f32.mrb[24].mxu1  ;;  %v659_v43 = vpop.f32.mrb[25].mxu0  ;;  %v2140_v44 = vpack.c.bf16 %v995_v38, %v994_v19  ;;  %v783_v47 = vadd.f32 %v2298_v15, %v2647_v33 }
 0x11e   : > { %v1000_v45 = vsel %vm872_vm10, %v780_v26, %v936_v36  ;;  %v966_v46 = vsel %vm838_vm11, %v644_v27, %v902_v37  ;;  %v787_v48 = vpop.f32.mrb[25].mxu1  ;;  %v2270_v49 = vpop.f32.mrb[26].mxu0  ;;  %vm870_vm12 = vcmp.ge.f32.partialorder %v772_v40, 0.0  ;;  %v934_v50 = vmul.f32 0.1, %v772_v40 }
 0x11f   : > { %vm841_vm13 = vcmp.ge.f32.partialorder %v655_v41, 0.0  ;;  %v905_v51 = vmul.f32 0.1, %v655_v41  ;;  %2200 = vst [vmem:[%s2660_s6 + $0xc0] sm:$0xff] %v2140_v44   ;;  %vm873_vm14 = vcmp.ge.f32.partialorder %v783_v47, 0.0  ;;  %v647_v53 = vadd.f32 %v2647_v33, %v646_v16  ;;  %v2302_v55 = vpop.f32.mrb[26].mxu1 }
 0x120   : > { %v937_v52 = vmul.f32 0.1, %v783_v47  ;;  %v775_v54 = vadd.f32 %v2647_v33, %v774_v23  ;;  %v662_v56 = vpop.f32.mrb[27].mxu0  ;;  %v998_v57 = vsel %vm870_vm12, %v772_v40, %v934_v50  ;;  %v668_v59 = vadd.f32 %v2269_v35, %v2647_v33  ;;  %v790_v61 = vpop.f32.mrb[27].mxu1 }
 0x121   : > { %v969_v58 = vsel %vm841_vm13, %v655_v41, %v905_v51  ;;  %v796_v60 = vadd.f32 %v2301_v42, %v2647_v33  ;;  %vm839_vm15 = vcmp.ge.f32.partialorder %v647_v53, 0.0  ;;  %v903_v0 = vmul.f32 0.1, %v647_v53 }
 0x122   : > { %v2075_v62 = vpack.c.bf16 %v969_v58, %v968_v39  ;;  %v1001_v63 = vsel %vm873_vm14, %v783_v47, %v937_v52  ;;  %vm871_vm0 = vcmp.ge.f32.partialorder %v775_v54, 0.0  ;;  %v935_v2 = vmul.f32 0.1, %v775_v54 }
 0x123   : > { %v2155_v1 = vpack.c.bf16 %v1001_v63, %v1000_v45  ;;  %vm844_vm1 = vcmp.ge.f32.partialorder %v668_v59, 0.0  ;;  %v2273_v3 = vpop.f32.mrb[28].mxu0  ;;  %v967_v4 = vsel %vm839_vm15, %v647_v53, %v903_v0  ;;  %v908_v5 = vmul.f32 0.1, %v668_v59 }
 0x124   : > { %2187 = vst [vmem:[%s2660_s6 + $0x58] sm:$0xff] %v2075_v62   ;;  %vm876_vm2 = vcmp.ge.f32.partialorder %v796_v60, 0.0  ;;  %v940_v6 = vmul.f32 0.1, %v796_v60  ;;  %v2305_v7 = vpop.f32.mrb[28].mxu1  ;;  %v2070_v8 = vpack.c.bf16 %v967_v4, %v966_v46  ;;  %v999_v9 = vsel %vm871_vm0, %v775_v54, %v935_v2  ;;  %v675_v12 = vpop.f32.mrb[29].mxu0 }
 0x125   : > { %2203 = vst [vmem:[%s2660_s6 + $0xd8] sm:$0xff] %v2155_v1   ;;  %v660_v10 = vadd.f32 %v2647_v33, %v659_v43  ;;  %v788_v11 = vadd.f32 %v2647_v33, %v787_v48  ;;  %v803_v13 = vpop.f32.mrb[29].mxu1  ;;  %v2150_v14 = vpack.c.bf16 %v999_v9, %v998_v57  ;;  %v972_v15 = vsel %vm844_vm1, %v668_v59, %v908_v5  ;;  %v2274_v18 = vpop.f32.mrb[30].mxu0 }
 0x126   : > { %v1004_v16 = vsel %vm876_vm2, %v796_v60, %v940_v6  ;;  %v671_v17 = vadd.f32 %v2270_v49, %v2647_v33  ;;  %v2306_v19 = vpop.f32.mrb[30].mxu1  ;;  %2186 = vst [vmem:[%s2660_s6 + $0x50] sm:$0xff] %v2070_v8   ;;  %v799_v23 = vadd.f32 %v2302_v55, %v2647_v33  ;;  %v663_v24 = vadd.f32 %v2647_v33, %v662_v56  ;;  %v678_v25 = vpop.f32.mrb[31].mxu0 }
 0x127   : > { %vm842_vm3 = vcmp.ge.f32.partialorder %v660_v10, 0.0  ;;  %v906_v20 = vmul.f32 0.1, %v660_v10  ;;  %vm874_vm4 = vcmp.ge.f32.partialorder %v788_v11, 0.0  ;;  %v938_v21 = vmul.f32 0.1, %v788_v11 }
 0x128   : > { %2202 = vst [vmem:[%s2660_s6 + $0xd0] sm:$0xff] %v2150_v14   ;;  %vm845_vm5 = vcmp.ge.f32.partialorder %v671_v17, 0.0  ;;  %v909_v22 = vmul.f32 0.1, %v671_v17  ;;  %v806_v26 = vpop.f32.mrb[31].mxu1  ;;  %v791_v29 = vadd.f32 %v2647_v33, %v790_v61  ;;  %v684_v30 = vadd.f32 %v2273_v3, %v2647_v33 }
 0x129   : > { %v970_v27 = vsel %vm842_vm3, %v660_v10, %v906_v20  ;;  %v1002_v28 = vsel %vm874_vm4, %v788_v11, %v938_v21  ;;  %vm877_vm6 = vcmp.ge.f32.partialorder %v799_v23, 0.0  ;;  %v941_v32 = vmul.f32 0.1, %v799_v23 }
 0x12a   : > { %v973_v31 = vsel %vm845_vm5, %v671_v17, %v909_v22  ;;  %vm843_vm7 = vcmp.ge.f32.partialorder %v663_v24, 0.0  ;;  %v907_v35 = vmul.f32 0.1, %v663_v24  ;;  %vm875_vm8 = vcmp.ge.f32.partialorder %v791_v29, 0.0 }
 0x12b   : > { %v2085_v34 = vpack.c.bf16 %v973_v31, %v972_v15  ;;  %v939_v36 = vmul.f32 0.1, %v791_v29  ;;  %v1005_v37 = vsel %vm877_vm6, %v799_v23, %v941_v32  ;;  %vm848_vm9 = vcmp.ge.f32.partialorder %v684_v30, 0.0 }
 0x12c   : > { %v912_v38 = vmul.f32 0.1, %v684_v30  ;;  %v812_v39 = vadd.f32 %v2305_v7, %v2647_v33  ;;  %v2165_v40 = vpack.c.bf16 %v1005_v37, %v1004_v16  ;;  %v971_v41 = vsel %vm843_vm7, %v663_v24, %v907_v35 }
 0x12d   : > { %2189 = vst [vmem:[%s2660_s6 + $0x68] sm:$0xff] %v2085_v34   ;;  %v1003_v42 = vsel %vm875_vm8, %v791_v29, %v939_v36  ;;  %v676_v43 = vadd.f32 %v2647_v33, %v675_v12  ;;  %v2080_v44 = vpack.c.bf16 %v971_v41, %v970_v27  ;;  %v804_v48 = vadd.f32 %v2647_v33, %v803_v13 }
 0x12e   : > { %v2160_v45 = vpack.c.bf16 %v1003_v42, %v1002_v28  ;;  %2205 = vst [vmem:[%s2660_s6 + $0xe8] sm:$0xff] %v2165_v40   ;;  %v976_v46 = vsel %vm848_vm9, %v684_v30, %v912_v38  ;;  %v944_v47 = vmul.f32 0.1, %v812_v39  ;;  %v687_v49 = vadd.f32 %v2274_v18, %v2647_v33 }
 0x12f   : > { %2188 = vst [vmem:[%s2660_s6 + $0x60] sm:$0xff] %v2080_v44   ;;  %v815_v50 = vadd.f32 %v2306_v19, %v2647_v33  ;;  %v679_v51 = vadd.f32 %v2647_v33, %v678_v25  ;;  %v807_v52 = vadd.f32 %v2647_v33, %v806_v26  ;;  %vm880_vm10 = vcmp.ge.f32.partialorder %v812_v39, 0.0 }
 0x130   : > { %2204 = vst [vmem:[%s2660_s6 + $0xe0] sm:$0xff] %v2160_v45   ;;  %vm846_vm11 = vcmp.ge.f32.partialorder %v676_v43, 0.0  ;;  %v910_v53 = vmul.f32 0.1, %v676_v43  ;;  %v942_v54 = vmul.f32 0.1, %v804_v48  ;;  %v1008_v58 = vsel %vm880_vm10, %v812_v39, %v944_v47 }
 0x131   : > { %vm849_vm12 = vcmp.ge.f32.partialorder %v687_v49, 0.0  ;;  %v913_v55 = vmul.f32 0.1, %v687_v49  ;;  %vm881_vm13 = vcmp.ge.f32.partialorder %v815_v50, 0.0  ;;  %v945_v56 = vmul.f32 0.1, %v815_v50 }
 0x132   : > { %vm878_vm14 = vcmp.ge.f32.partialorder %v804_v48, 0.0  ;;  %vm847_vm15 = vcmp.ge.f32.partialorder %v679_v51, 0.0  ;;  %v911_v57 = vmul.f32 0.1, %v679_v51  ;;  %vm879_vm0 = vcmp.ge.f32.partialorder %v807_v52, 0.0  ;;  %1336 = sbr.rel (!%p2563_p4) target bundleno = 404 (0x194), region = 36 }
 0x133   : > { %v977_v59 = vsel %vm849_vm12, %v687_v49, %v913_v55  ;;  %v1009_v60 = vsel %vm881_vm13, %v815_v50, %v945_v56  ;;  %v943_v33 = vmul.f32 0.1, %v807_v52  ;;  %v974_v61 = vsel %vm846_vm11, %v676_v43, %v910_v53 }
 0x134   : > { %v2095_v62 = vpack.c.bf16 %v977_v59, %v976_v46  ;;  %v2175_v63 = vpack.c.bf16 %v1009_v60, %v1008_v58  ;;  %v975_v0 = vsel %vm847_vm15, %v679_v51, %v911_v57  ;;  %v1006_v1 = vsel %vm878_vm14, %v804_v48, %v942_v54 }
 0x135   : > { %v2090_v2 = vpack.c.bf16 %v975_v0, %v974_v61  ;;  %v1007_v3 = vsel %vm879_vm0, %v807_v52, %v943_v33 }
 0x136   : > { %2191 = vst [vmem:[%s2660_s6 + $0x78] sm:$0xff] %v2095_v62   ;;  %2207 = vst [vmem:[%s2660_s6 + $0xf8] sm:$0xff] %v2175_v63   ;;  %v2170_v4 = vpack.c.bf16 %v1007_v3, %v1006_v1 }
 0x137   : > { %2190 = vst [vmem:[%s2660_s6 + $0x70] sm:$0xff] %v2090_v2  }
 0x138   : > { %2206 = vst [vmem:[%s2660_s6 + $0xf0] sm:$0xff] %v2170_v4  }
 0x139   : > { %s2962_s7 = smov (!%p1339_p8, %s1338_s7), 64 }
 0x13a   : > { %s1935_s12 = sshll.u32 %s2962_s7, 6 }
 0x13b   : > { %p1938_p9 = scmp.eq.s32.totalorder %s1935_s12, 0 }
 0x13c   : > { %s2764_s14 = sshrl.u32 (!%p1938_p9), %s2962_s7, 6 }
 0x13d   : > { %1347 = sbr.rel (%p1938_p9) target bundleno = 404 (0x194), region = 40  ;;  %p1939_p10 = scmp.le.s32.totalorder (!%p1938_p9), %s2764_s14, 0 }
 0x144   : > { %1752 = sbr.rel (%p1939_p10) target bundleno = 383 (0x17f), region = 112  ;;  %s2955_s15 = smov (!%p1939_p10), %s2758_s11 }
 0x145   : > { %s2956_s17 = smov (!%p1939_p10), %s2660_s6  ;;  %s2773_s18 = smov (!%p1939_p10), 0  }
 0x146   : > { %s2775_s20 = smov (!%p1939_p10), 0  }
 0x14b LB: >> { %v1363_v5 = vld [vmem:[%s2492_s17] sm:$0xf]  ;;  %v1365_v6 = vld [vmem:[%s2492_s17 + $0x4] sm:$0xf]  ;;  %v1367_v7 = vld [vmem:[%s2492_s17 + $0x8] sm:$0xf]  ;;  %s2500_s20 = sphi %s2775_s20, %s1357_s20   ;;  %s2496_s18 = sphi %s2773_s18, %s2957_s18   ;;  %s2492_s17 = sphi %s2956_s17, %s1496_s17   ;;  %s2488_s15 = sphi %s2955_s15, %s1497_s15  }
 0x14c   : >> { %1364 = vst [vmem:[%s2488_s15] sm:$0xf] %v1363_v5  ;;  %1366 = vst [vmem:[%s2488_s15 + $0x4] sm:$0xf] %v1365_v6  ;;  %v1369_v8 = vld [vmem:[%s2492_s17 + $0xc] sm:$0xf]  ;;  %s1491_s21 = sadd.s32 1, %s2496_s18 }
 0x14d   : >> { %1368 = vst [vmem:[%s2488_s15 + $0x8] sm:$0xf] %v1367_v7  ;;  %v1371_v9 = vld [vmem:[%s2492_s17 + $0x10] sm:$0xf]  ;;  %v1373_v10 = vld [vmem:[%s2492_s17 + $0x14] sm:$0xf]  ;;  %p1492_p11 = scmp.ge.s32.totalorder %s1491_s21, %s2764_s14 }
 0x14e   : >> { %1370 = vst [vmem:[%s2488_s15 + $0xc] sm:$0xf] %v1369_v8  ;;  %1372 = vst [vmem:[%s2488_s15 + $0x10] sm:$0xf] %v1371_v9  ;;  %v1375_v11 = vld [vmem:[%s2492_s17 + $0x18] sm:$0xf] }
 0x14f   : >> { %1374 = vst [vmem:[%s2488_s15 + $0x14] sm:$0xf] %v1373_v10  ;;  %v1377_v12 = vld [vmem:[%s2492_s17 + $0x1c] sm:$0xf]  ;;  %v1379_v13 = vld [vmem:[%s2492_s17 + $0x20] sm:$0xf] }
 0x150   : >> { %1376 = vst [vmem:[%s2488_s15 + $0x18] sm:$0xf] %v1375_v11  ;;  %1378 = vst [vmem:[%s2488_s15 + $0x1c] sm:$0xf] %v1377_v12  ;;  %v1381_v14 = vld [vmem:[%s2492_s17 + $0x24] sm:$0xf] }
 0x151   : >> { %1380 = vst [vmem:[%s2488_s15 + $0x20] sm:$0xf] %v1379_v13  ;;  %v1383_v15 = vld [vmem:[%s2492_s17 + $0x28] sm:$0xf]  ;;  %v1385_v16 = vld [vmem:[%s2492_s17 + $0x2c] sm:$0xf] }
 0x152   : >> { %1382 = vst [vmem:[%s2488_s15 + $0x24] sm:$0xf] %v1381_v14  ;;  %1384 = vst [vmem:[%s2488_s15 + $0x28] sm:$0xf] %v1383_v15  ;;  %v1387_v17 = vld [vmem:[%s2492_s17 + $0x30] sm:$0xf] }
 0x153   : >> { %1386 = vst [vmem:[%s2488_s15 + $0x2c] sm:$0xf] %v1385_v16  ;;  %v1389_v18 = vld [vmem:[%s2492_s17 + $0x34] sm:$0xf]  ;;  %v1391_v19 = vld [vmem:[%s2492_s17 + $0x38] sm:$0xf] }
 0x154   : >> { %1388 = vst [vmem:[%s2488_s15 + $0x30] sm:$0xf] %v1387_v17  ;;  %1390 = vst [vmem:[%s2488_s15 + $0x34] sm:$0xf] %v1389_v18  ;;  %v1393_v20 = vld [vmem:[%s2492_s17 + $0x3c] sm:$0xf] }
 0x155   : >> { %1392 = vst [vmem:[%s2488_s15 + $0x38] sm:$0xf] %v1391_v19  ;;  %v1395_v21 = vld [vmem:[%s2492_s17 + $0x40] sm:$0xf]  ;;  %v1397_v22 = vld [vmem:[%s2492_s17 + $0x44] sm:$0xf] }
 0x156   : >> { %1394 = vst [vmem:[%s2488_s15 + $0x3c] sm:$0xf] %v1393_v20  ;;  %1396 = vst [vmem:[%s2488_s15 + $0x40] sm:$0xf] %v1395_v21  ;;  %v1399_v23 = vld [vmem:[%s2492_s17 + $0x48] sm:$0xf] }
 0x157   : >> { %1398 = vst [vmem:[%s2488_s15 + $0x44] sm:$0xf] %v1397_v22  ;;  %v1401_v24 = vld [vmem:[%s2492_s17 + $0x4c] sm:$0xf]  ;;  %v1403_v25 = vld [vmem:[%s2492_s17 + $0x50] sm:$0xf] }
 0x158   : >> { %1400 = vst [vmem:[%s2488_s15 + $0x48] sm:$0xf] %v1399_v23  ;;  %1402 = vst [vmem:[%s2488_s15 + $0x4c] sm:$0xf] %v1401_v24  ;;  %v1405_v26 = vld [vmem:[%s2492_s17 + $0x54] sm:$0xf] }
 0x159   : >> { %1404 = vst [vmem:[%s2488_s15 + $0x50] sm:$0xf] %v1403_v25  ;;  %v1407_v27 = vld [vmem:[%s2492_s17 + $0x58] sm:$0xf]  ;;  %v1409_v28 = vld [vmem:[%s2492_s17 + $0x5c] sm:$0xf] }
 0x15a   : >> { %1406 = vst [vmem:[%s2488_s15 + $0x54] sm:$0xf] %v1405_v26  ;;  %1408 = vst [vmem:[%s2488_s15 + $0x58] sm:$0xf] %v1407_v27  ;;  %v1411_v29 = vld [vmem:[%s2492_s17 + $0x60] sm:$0xf] }
 0x15b   : >> { %1410 = vst [vmem:[%s2488_s15 + $0x5c] sm:$0xf] %v1409_v28  ;;  %v1413_v30 = vld [vmem:[%s2492_s17 + $0x64] sm:$0xf]  ;;  %v1415_v31 = vld [vmem:[%s2492_s17 + $0x68] sm:$0xf] }
 0x15c   : >> { %1412 = vst [vmem:[%s2488_s15 + $0x60] sm:$0xf] %v1411_v29  ;;  %1414 = vst [vmem:[%s2488_s15 + $0x64] sm:$0xf] %v1413_v30  ;;  %v1417_v32 = vld [vmem:[%s2492_s17 + $0x6c] sm:$0xf] }
 0x15d   : >> { %1416 = vst [vmem:[%s2488_s15 + $0x68] sm:$0xf] %v1415_v31  ;;  %v1419_v34 = vld [vmem:[%s2492_s17 + $0x70] sm:$0xf]  ;;  %v1421_v35 = vld [vmem:[%s2492_s17 + $0x74] sm:$0xf] }
 0x15e   : >> { %1418 = vst [vmem:[%s2488_s15 + $0x6c] sm:$0xf] %v1417_v32  ;;  %1420 = vst [vmem:[%s2488_s15 + $0x70] sm:$0xf] %v1419_v34  ;;  %v1423_v36 = vld [vmem:[%s2492_s17 + $0x78] sm:$0xf] }
 0x15f   : >> { %1422 = vst [vmem:[%s2488_s15 + $0x74] sm:$0xf] %v1421_v35  ;;  %v1425_v37 = vld [vmem:[%s2492_s17 + $0x7c] sm:$0xf]  ;;  %v1427_v38 = vld [vmem:[%s2492_s17 + $0x80] sm:$0xf] }
 0x160   : >> { %1424 = vst [vmem:[%s2488_s15 + $0x78] sm:$0xf] %v1423_v36  ;;  %1426 = vst [vmem:[%s2488_s15 + $0x7c] sm:$0xf] %v1425_v37  ;;  %v1429_v39 = vld [vmem:[%s2492_s17 + $0x84] sm:$0xf] }
 0x161   : >> { %1428 = vst [vmem:[%s2488_s15 + $0x80] sm:$0xf] %v1427_v38  ;;  %v1431_v40 = vld [vmem:[%s2492_s17 + $0x88] sm:$0xf]  ;;  %v1433_v41 = vld [vmem:[%s2492_s17 + $0x8c] sm:$0xf] }
 0x162   : >> { %1430 = vst [vmem:[%s2488_s15 + $0x84] sm:$0xf] %v1429_v39  ;;  %1432 = vst [vmem:[%s2488_s15 + $0x88] sm:$0xf] %v1431_v40  ;;  %v1435_v42 = vld [vmem:[%s2492_s17 + $0x90] sm:$0xf] }
 0x163   : >> { %1434 = vst [vmem:[%s2488_s15 + $0x8c] sm:$0xf] %v1433_v41  ;;  %v1437_v43 = vld [vmem:[%s2492_s17 + $0x94] sm:$0xf]  ;;  %v1439_v44 = vld [vmem:[%s2492_s17 + $0x98] sm:$0xf] }
 0x164   : >> { %1436 = vst [vmem:[%s2488_s15 + $0x90] sm:$0xf] %v1435_v42  ;;  %1438 = vst [vmem:[%s2488_s15 + $0x94] sm:$0xf] %v1437_v43  ;;  %v1441_v45 = vld [vmem:[%s2492_s17 + $0x9c] sm:$0xf] }
 0x165   : >> { %1440 = vst [vmem:[%s2488_s15 + $0x98] sm:$0xf] %v1439_v44  ;;  %v1443_v46 = vld [vmem:[%s2492_s17 + $0xa0] sm:$0xf]  ;;  %v1445_v47 = vld [vmem:[%s2492_s17 + $0xa4] sm:$0xf] }
 0x166   : >> { %1442 = vst [vmem:[%s2488_s15 + $0x9c] sm:$0xf] %v1441_v45  ;;  %1444 = vst [vmem:[%s2488_s15 + $0xa0] sm:$0xf] %v1443_v46  ;;  %v1447_v48 = vld [vmem:[%s2492_s17 + $0xa8] sm:$0xf] }
 0x167   : >> { %1446 = vst [vmem:[%s2488_s15 + $0xa4] sm:$0xf] %v1445_v47  ;;  %v1449_v49 = vld [vmem:[%s2492_s17 + $0xac] sm:$0xf]  ;;  %v1451_v50 = vld [vmem:[%s2492_s17 + $0xb0] sm:$0xf] }
 0x168   : >> { %1448 = vst [vmem:[%s2488_s15 + $0xa8] sm:$0xf] %v1447_v48  ;;  %1450 = vst [vmem:[%s2488_s15 + $0xac] sm:$0xf] %v1449_v49  ;;  %v1453_v51 = vld [vmem:[%s2492_s17 + $0xb4] sm:$0xf] }
 0x169   : >> { %1452 = vst [vmem:[%s2488_s15 + $0xb0] sm:$0xf] %v1451_v50  ;;  %v1455_v52 = vld [vmem:[%s2492_s17 + $0xb8] sm:$0xf]  ;;  %v1457_v53 = vld [vmem:[%s2492_s17 + $0xbc] sm:$0xf] }
 0x16a   : >> { %1454 = vst [vmem:[%s2488_s15 + $0xb4] sm:$0xf] %v1453_v51  ;;  %1456 = vst [vmem:[%s2488_s15 + $0xb8] sm:$0xf] %v1455_v52  ;;  %v1459_v54 = vld [vmem:[%s2492_s17 + $0xc0] sm:$0xf] }
 0x16b   : >> { %1458 = vst [vmem:[%s2488_s15 + $0xbc] sm:$0xf] %v1457_v53  ;;  %v1461_v55 = vld [vmem:[%s2492_s17 + $0xc4] sm:$0xf]  ;;  %v1463_v56 = vld [vmem:[%s2492_s17 + $0xc8] sm:$0xf] }
 0x16c   : >> { %1460 = vst [vmem:[%s2488_s15 + $0xc0] sm:$0xf] %v1459_v54  ;;  %1462 = vst [vmem:[%s2488_s15 + $0xc4] sm:$0xf] %v1461_v55  ;;  %v1465_v57 = vld [vmem:[%s2492_s17 + $0xcc] sm:$0xf] }
 0x16d   : >> { %1464 = vst [vmem:[%s2488_s15 + $0xc8] sm:$0xf] %v1463_v56  ;;  %v1467_v58 = vld [vmem:[%s2492_s17 + $0xd0] sm:$0xf]  ;;  %v1469_v59 = vld [vmem:[%s2492_s17 + $0xd4] sm:$0xf] }
 0x16e   : >> { %1466 = vst [vmem:[%s2488_s15 + $0xcc] sm:$0xf] %v1465_v57  ;;  %1468 = vst [vmem:[%s2488_s15 + $0xd0] sm:$0xf] %v1467_v58  ;;  %v1471_v60 = vld [vmem:[%s2492_s17 + $0xd8] sm:$0xf] }
 0x16f   : >> { %1470 = vst [vmem:[%s2488_s15 + $0xd4] sm:$0xf] %v1469_v59  ;;  %v1473_v33 = vld [vmem:[%s2492_s17 + $0xdc] sm:$0xf]  ;;  %v1475_v61 = vld [vmem:[%s2492_s17 + $0xe0] sm:$0xf] }
 0x170   : >> { %1472 = vst [vmem:[%s2488_s15 + $0xd8] sm:$0xf] %v1471_v60  ;;  %1474 = vst [vmem:[%s2488_s15 + $0xdc] sm:$0xf] %v1473_v33  ;;  %v1477_v62 = vld [vmem:[%s2492_s17 + $0xe4] sm:$0xf] }
 0x171   : >> { %1476 = vst [vmem:[%s2488_s15 + $0xe0] sm:$0xf] %v1475_v61  ;;  %v1479_v63 = vld [vmem:[%s2492_s17 + $0xe8] sm:$0xf]  ;;  %v1481_v0 = vld [vmem:[%s2492_s17 + $0xec] sm:$0xf] }
 0x172   : >> { %1478 = vst [vmem:[%s2488_s15 + $0xe4] sm:$0xf] %v1477_v62  ;;  %1480 = vst [vmem:[%s2488_s15 + $0xe8] sm:$0xf] %v1479_v63  ;;  %v1483_v1 = vld [vmem:[%s2492_s17 + $0xf0] sm:$0xf] }
 0x173   : >> { %1482 = vst [vmem:[%s2488_s15 + $0xec] sm:$0xf] %v1481_v0  ;;  %v1485_v2 = vld [vmem:[%s2492_s17 + $0xf4] sm:$0xf]  ;;  %v1487_v3 = vld [vmem:[%s2492_s17 + $0xf8] sm:$0xf] }
 0x174   : >> { %1484 = vst [vmem:[%s2488_s15 + $0xf0] sm:$0xf] %v1483_v1  ;;  %1486 = vst [vmem:[%s2488_s15 + $0xf4] sm:$0xf] %v1485_v2  ;;  %v1489_v4 = vld [vmem:[%s2492_s17 + $0xfc] sm:$0xf] }
 0x175   : >> { %1488 = vst [vmem:[%s2488_s15 + $0xf8] sm:$0xf] %v1487_v3  ;;  %1490 = vst [vmem:[%s2488_s15 + $0xfc] sm:$0xf] %v1489_v4  ;;  %s2964_s21 = smov (%p1492_p11, %s1491_s21), 0  ;;  %s1357_s20 = sadd.s32 1, %s2500_s20  }
 0x176   : >> { %s1940_s22 = sshll.u32 %s2964_s21, 8  ;;  %p1356_p12 = scmp.ge.s32.totalorder %s1357_s20, %s2764_s14 }
 0x177   : >> { %s1496_s17 = scalar_lea.vmem %s2660_s6, %s1940_s22 [#allocation2]   ;;  %s1497_s15 = scalar_lea.vmem %s2758_s11, %s1940_s22  }
 0x178   : >> { %s2957_s18 = smov %s2964_s21  ;;  %1359 = sbr.rel (!%p1356_p12) target bundleno = 331 (0x14b), region = 118 }
 0x17f PF: > { %s2932_s23 = sand.u32 63, %s2962_s7   ;;  %s2015_s24 = sshll.u32 %s2764_s14, 8 }
 0x180   : > { %s1502_s25 = scalar_lea.vmem %s2660_s6, %s2015_s24 [#allocation2]   ;;  %s1504_s26 = scalar_lea.vmem %s2758_s11, %s2015_s24  }
 0x181   : > { %p1945_p13 = scmp.le.s32.totalorder %s2932_s23, 0 }
 0x182   : > { %s2502_s27 = smov (!%p1945_p13), %s1504_s26   ;;  %s2506_s28 = smov (!%p1945_p13), %s1502_s25  }
 0x183   : > { %1766 = sbr.rel (%p1945_p13) target bundleno = 404 (0x194), region = 123  ;;  %s2510_s29 = smov (!%p1945_p13), 0  }
 0x184   : > { %s2514_s30 = smov (!%p1945_p13), 0  }
 0x18a LB: >> { %v1514_v5 = vld [vmem:[%s2508_s28] sm:$0xf]  ;;  %s1516_s4 = sadd.s32 1, %s2512_s29  ;;  %s1508_s30 = sadd.s32 1, %s2516_s30   ;;  %s2516_s30 = sphi %s2514_s30, %s1508_s30   ;;  %s2512_s29 = sphi %s2510_s29, %s2511_s29   ;;  %s2508_s28 = sphi %s2506_s28, %s1521_s28   ;;  %s2504_s27 = sphi %s2502_s27, %s1522_s27  }
 0x18b   : >> { %1515 = vst [vmem:[%s2504_s27] sm:$0xf] %v1514_v5  ;;  %p1517_p0 = scmp.ge.s32.totalorder %s1516_s4, %s2932_s23  ;;  %p1507_p1 = scmp.ge.s32.totalorder %s1508_s30, %s2932_s23 }
 0x18d   : >> { %s2966_s4 = smov (%p1517_p0, %s1516_s4), 0  ;;  %1510 = sbr.rel (!%p1507_p1) target bundleno = 394 (0x18a), region = 129 }
 0x18e   : >> { %s1946_s5 = sshll.u32 %s2966_s4, 2  ;;  %s2511_s29 = smov %s2966_s4  }
 0x18f   : >> { %s1521_s28 = scalar_lea.vmem %s1502_s25, %s1946_s5 [#allocation2]   ;;  %s1522_s27 = scalar_lea.vmem %s1504_s26, %s1946_s5  }
 0x194 PF: > { %p10_p2 = scmp.ge.s32.totalorder %s2553_s16, 6   ;;  %s2958_s12 = smov %s2480_s13 }
 0x195   : > { %s2959_s13 = smov %s2561_s19  ;;  %s2960_s14 = smov %s2553_s16 }
 0x196   :  { %12 = sbr.rel (!%p10_p2) target bundleno = 2 (0x2), region = 140 }

// kernel: optimized_cnn_forward.5
= control target key start
LH: loop header
LB: loop body
LE: loop exit
PB: predicated region body
PF: predicated region fallthrough
CT: control target
= control target key end

     0   :  { %s2068_s12 = smov 0   ;;  %s2070_s13 = smov 0   ;;  %s2402_s0 = inlined_call_operand.vmem [shape: bf16[392,288], index: 0, kind: input, shape index: {}]   ;;  %s2403_s1 = inlined_call_operand.vmem [shape: bf16[288,128], index: 1, kind: input, shape index: {}]   ;;  %s2404_s2 = inlined_call_operand.vmem [shape: f32[1,128], index: 2, kind: input, shape index: {}]   ;;  %s2405_s3 = inlined_call_operand.vmem [shape: bf16[392,128], index: 3, kind: output, shape index: {}]  }
   0x1   :  { %s2072_s14 = smov 0  }
   0x2 LB: > { %s2081_s15 = sadd.s32 4294967295, %s2012_s14   ;;  %s2083_s16 = sadd.s32 1, %s2012_s14   ;;  %s2012_s14 = sphi %s2072_s14, %s2412_s14   ;;  %s2008_s13 = sphi %s2070_s13, %s2411_s13   ;;  %s2004_s12 = sphi %s2068_s12, %s2410_s12  }
   0x3   : > { %s85_s17 = ssub.s32 %s2012_s14, %s2083_s16  ;;  %s88_s18 = sadd.s32 1, %s2008_s13 }
   0x4   : > { %p86_p0 = scmp.eq.s32.totalorder %s85_s17, 0  ;;  %p98_p1 = scmp.ne.s32.totalorder %s2008_s13, %s2004_s12 }
   0x5   : > { %p99_p2 = scmp.eq.s32.totalorder %s2081_s15, 1  ;;  %p1420_p3 = scmp.ge.s32.totalorder %s2012_s14, 1 }
   0x6   : > { %s2091_s19 = scalar_select %p86_p0, %s2008_s13, %s88_s18  }
   0x7   : > { %p2093_p4 = por %p99_p2, %p98_p1  ;;  %p149_p5 = scmp.lt.s32.totalorder %s2012_s14, 3 }
   0x9   : > { %p150_p6 = pnand %p1420_p3, %p149_p5 }
   0xa   : > { %v1885_v0 = vld [vmem:[%s2403_s1 + $0x40] sm:$0xff] (!%p150_p6)   ;;  %v2046_v2 = vmov (!%p150_p6), 0.0   ;;  %s2105_s25 = smul.u32 (!%p150_p6), 25, %s2081_s15  ;;  %v1887_v3 = vld [vmem:[%s2403_s1 + $0x48] sm:$0xff] (!%p150_p6)   ;;  %vm2047_vm0 = vmmov (!%p150_p6), 0   ;;  %v1889_v5 = vld [vmem:[%s2403_s1 + $0x50] sm:$0xff] (!%p150_p6)  }
   0xb   : > { %153 = sbr.rel (%p150_p6) target bundleno = 442 (0x1ba), region = 32  ;;  %v1886_v1 = vld [vmem:[%s2403_s1] sm:$0xff] (!%p150_p6)   ;;  %1736 = vmatprep.subr.bf16.mxu1 (!%p150_p6), %v2046_v2  ;;  %1627 = vmatprep.subr.bf16.mxu0 (!%p150_p6), %v1885_v0  ;;  %v1888_v4 = vld [vmem:[%s2403_s1 + $0x8] sm:$0xff] (!%p150_p6)   ;;  %v1890_v6 = vld [vmem:[%s2403_s1 + $0x10] sm:$0xff] (!%p150_p6)   ;;  %vm592_vm1 = vcmask (!%p150_p6), 261120   ;;  %s175_s24 = sand.u32 (!%p150_p6), 1, %s2004_s12  }
   0xc   : > { %1628 = vmatpush3.bf16.msra.mxu0 (!%p150_p6), %v1886_v1  ;;  %p184_p7 = scmp.lt.s32.totalorder (!%p150_p6), %s2105_s25, 48  ;;  %1740 = vmatprep.mubr.msk.bf16.mxu1 (!%p150_p6), %vm2047_vm0, %v2046_v2  ;;  %v1891_v7 = vld [vmem:[%s2403_s1 + $0x58] sm:$0xff] (!%p150_p6)   ;;  %v1893_v9 = vld [vmem:[%s2403_s1 + $0x60] sm:$0xff] (!%p150_p6)   ;;  %v1895_v12 = vld [vmem:[%s2403_s1 + $0x68] sm:$0xff] (!%p150_p6)   ;;  %s1792_s26 = smul.u32 (!%p150_p6), 100, %s175_s24 }
   0xd   : > { %1629 = vmatprep.subr.bf16.mxu0 (!%p150_p6), %v1887_v3  ;;  %v1892_v8 = vld [vmem:[%s2403_s1 + $0x18] sm:$0xff] (!%p150_p6)   ;;  %v1899_v10 = vld [vmem:[%s2403_s1 + $0x80] sm:$0xff] (!%p150_p6)   ;;  %v1896_v13 = vld [vmem:[%s2403_s1 + $0x28] sm:$0xff] (!%p150_p6)  }
   0xe   : > { %v1894_v11 = vld [vmem:[%s2403_s1 + $0x20] sm:$0xff] (!%p150_p6)   ;;  %1737 = vmatpush3.bf16.msra.mxu1 (!%p150_p6), %v1899_v10  ;;  %v1897_v14 = vld [vmem:[%s2403_s1 + $0x70] sm:$0xff] (!%p150_p6)   ;;  %v1905_v16 = vld [vmem:[%s2403_s1 + $0x88] sm:$0xff] (!%p150_p6)   ;;  %s2250_s12 = scalar_lea.vmem (!%p150_p6), [#allocation2], %s1792_s26  }
   0xf   : > { %1738 = vmatprep.subr.bf16.mxu1 (!%p150_p6), %v2046_v2  ;;  %v1898_v18 = vld [vmem:[%s2403_s1 + $0x30] sm:$0xff] (!%p150_p6)   ;;  %v1900_v19 = vld [vmem:[%s2403_s1 + $0x78] sm:$0xff] (!%p150_p6)  }
  0x10   : > { %1630 = vmatpush3.bf16.msra.mxu0 (!%p150_p6), %v1888_v4  ;;  %v1901_v20 = vld [vmem:[%s2403_s1 + $0x38] sm:$0xff] (!%p150_p6)   ;;  %v2243_v4 = vld [vmem:[%s2404_s2] ss:$0 sm:$0xff] (!%p150_p6) }
  0x11   : > { %1631 = vmatprep.subr.bf16.mxu0 (!%p150_p6), %v1889_v5 }
  0x12   : > { %s185_s7 = scalar_select %p184_p7, %s2105_s25, 48  ;;  %1739 = vmatpush3.bf16.msra.mxu1 %v1905_v16 }
  0x13   : > { %s1113_s27 = ssub.s32 (%p2093_p4), 49, %s2105_s25 }
  0x14   : > { %1632 = vmatpush3.bf16.msra.mxu0 %v1890_v6  ;;  %s1793_s14 = smul.u32 12, %s185_s7  ;;  %p1114_p8 = scmp.lt.s32.totalorder (%p2093_p4), %s1113_s27, 25 }
  0x15   : > { %1633 = vmatprep.subr.bf16.mxu0 %v1891_v7 }
  0x16   : > { %s2141_s28 = scalar_lea.vmem %s2402_s0, %s1793_s14 }
  0x17   : > { %v1904_v15 = vld [vmem:[%s2141_s28 + $0x4] ss:$12 sps:$4 sm:$0xff]   ;;  %v1906_v17 = vld [vmem:[%s2141_s28 + $0x8] ss:$12 sps:$4 sm:$0xff]   ;;  %v1910_v21 = vld [vmem:[%s2141_s28 + $0x20] ss:$12 sps:$4 sm:$0xff]  }
  0x18   : > { %1634 = vmatpush3.bf16.msra.mxu0 %v1892_v8  ;;  %664 = vmatprep.mubr.bf16.mxu0 %v1904_v15  ;;  %v1902_v22 = vld [vmem:[%s2141_s28] ss:$12 sps:$4 sm:$0xff]   ;;  %v1907_v23 = vld [vmem:[%s2141_s28 + $0x1c] ss:$12 sps:$4 sm:$0xff]   ;;  %v1914_v24 = vld [vmem:[%s2141_s28 + $0x38] ss:$12 sps:$4 sm:$0xff]  }
  0x19   : > { %1635 = vmatprep.subr.bf16.mxu0 %v1893_v9  ;;  %1741 = vmatmul.mubr.msk.bf16.vlgmr.msra.gmra.mrb[0].mxu1 %vm592_vm1, %v1906_v17  ;;  %v1909_v25 = vld [vmem:[%s2141_s28 + $0x18] ss:$12 sps:$4 sm:$0xff]   ;;  %v1911_v26 = vld [vmem:[%s2141_s28 + $0x34] ss:$12 sps:$4 sm:$0xff]   ;;  %v1918_v27 = vld [vmem:[%s2141_s28 + $0x50] ss:$12 sps:$4 sm:$0xff]  }
  0x1a   : > { %1744 = vmatprep.mubr.msk.bf16.mxu1 %vm2047_vm0, %v2046_v2  ;;  %v1913_v28 = vld [vmem:[%s2141_s28 + $0x30] ss:$12 sps:$4 sm:$0xff]   ;;  %v1915_v29 = vld [vmem:[%s2141_s28 + $0x4c] ss:$12 sps:$4 sm:$0xff]   ;;  %v1922_v30 = vld [vmem:[%s2141_s28 + $0x68] ss:$12 sps:$4 sm:$0xff]  }
  0x1b   : > { %v1917_v31 = vld [vmem:[%s2141_s28 + $0x48] ss:$12 sps:$4 sm:$0xff]   ;;  %v1919_v32 = vld [vmem:[%s2141_s28 + $0x64] ss:$12 sps:$4 sm:$0xff]   ;;  %v1926_v33 = vld [vmem:[%s2141_s28 + $0x80] ss:$12 sps:$4 sm:$0xff]  }
  0x1c   : > { %1636 = vmatpush3.bf16.msra.mxu0 %v1894_v11  ;;  %v1921_v34 = vld [vmem:[%s2141_s28 + $0x60] ss:$12 sps:$4 sm:$0xff]   ;;  %v1923_v35 = vld [vmem:[%s2141_s28 + $0x7c] ss:$12 sps:$4 sm:$0xff]   ;;  %v1930_v36 = vld [vmem:[%s2141_s28 + $0x98] ss:$12 sps:$4 sm:$0xff]  }
  0x1d   : > { %1637 = vmatprep.subr.bf16.mxu0 %v1895_v12  ;;  %v1925_v37 = vld [vmem:[%s2141_s28 + $0x78] ss:$12 sps:$4 sm:$0xff]   ;;  %v1927_v38 = vld [vmem:[%s2141_s28 + $0x94] ss:$12 sps:$4 sm:$0xff]   ;;  %v1934_v39 = vld [vmem:[%s2141_s28 + $0xb0] ss:$12 sps:$4 sm:$0xff]  }
  0x1e   : > { %v1929_v40 = vld [vmem:[%s2141_s28 + $0x90] ss:$12 sps:$4 sm:$0xff]   ;;  %v1931_v41 = vld [vmem:[%s2141_s28 + $0xac] ss:$12 sps:$4 sm:$0xff]   ;;  %v1938_v42 = vld [vmem:[%s2141_s28 + $0xc8] ss:$12 sps:$4 sm:$0xff]  }
  0x1f   : > { %v1933_v43 = vld [vmem:[%s2141_s28 + $0xa8] ss:$12 sps:$4 sm:$0xff]   ;;  %v1935_v44 = vld [vmem:[%s2141_s28 + $0xc4] ss:$12 sps:$4 sm:$0xff]   ;;  %v1942_v45 = vld [vmem:[%s2141_s28 + $0xe0] ss:$12 sps:$4 sm:$0xff]  }
  0x20   : > { %1638 = vmatpush3.bf16.msra.mxu0 %v1896_v13  ;;  %v1937_v46 = vld [vmem:[%s2141_s28 + $0xc0] ss:$12 sps:$4 sm:$0xff]   ;;  %v1939_v47 = vld [vmem:[%s2141_s28 + $0xdc] ss:$12 sps:$4 sm:$0xff]   ;;  %v1946_v48 = vld [vmem:[%s2141_s28 + $0xf8] ss:$12 sps:$4 sm:$0xff]  }
  0x21   : > { %1639 = vmatprep.subr.bf16.mxu0 %v1897_v14  ;;  %1745 = vmatmul.mubr.msk.bf16.gmra.mrb[4].mxu1 %vm592_vm1, %v1910_v21  ;;  %v1941_v49 = vld [vmem:[%s2141_s28 + $0xd8] ss:$12 sps:$4 sm:$0xff]   ;;  %v1943_v50 = vld [vmem:[%s2141_s28 + $0xf4] ss:$12 sps:$4 sm:$0xff]   ;;  %v1950_v51 = vld [vmem:[%s2141_s28 + $0x110] ss:$12 sps:$4 sm:$0xff]  }
  0x22   : > { %1748 = vmatprep.mubr.msk.bf16.mxu1 %vm2047_vm0, %v2046_v2  ;;  %v1945_v52 = vld [vmem:[%s2141_s28 + $0xf0] ss:$12 sps:$4 sm:$0xff]   ;;  %v1947_v53 = vld [vmem:[%s2141_s28 + $0x10c] ss:$12 sps:$4 sm:$0xff]   ;;  %v249_v54 = vld [vmem:[%s2141_s28 + $0x120] sm:$0xff] }
  0x23   : > { %v1953_v55 = vld [vmem:[%s2141_s28 + $0x128] ss:$0 sps:$4 sm:$0xff]   ;;  %v1460_v57 = vcombine.high %v249_v54, %v249_v54  ;;  %v1459_v58 = vcombine.low %v249_v54, %v249_v54 }
  0x24   : > { %1640 = vmatpush3.bf16.msra.mxu0 %v1898_v18  ;;  %v1949_v56 = vld [vmem:[%s2141_s28 + $0x108] ss:$12 sps:$4 sm:$0xff]   ;;  %s1555_s28 = smul.u32 (%p2093_p4), 100, %s2081_s15 }
  0x25   : > { %1641 = vmatprep.subr.bf16.mxu0 %v1900_v19 }
  0x26   : > { %s2293_s4 = scalar_lea.vmem (%p2093_p4), %s2405_s3, %s1555_s28  }
  0x28   : > { %1642 = vmatpush3.bf16.msra.mxu0 %v1901_v20 }
  0x29   : > { %1749 = vmatmul.mubr.msk.bf16.gmra.mrb[8].mxu1 %vm592_vm1, %v1914_v24 }
  0x2a   : > { %1752 = vmatprep.mubr.msk.bf16.mxu1 %vm2047_vm0, %v2046_v2 }
  0x2b   : > { %665 = vmatmul.mubr.bf16.vlgmr.msra.gmra.mrb[0].mxu0 %v1902_v22 }
  0x2c   : > { %672 = vmatprep.mubr.bf16.mxu0 %v1907_v23 }
  0x31   : > { %1753 = vmatmul.mubr.msk.bf16.gmra.mrb[12].mxu1 %vm592_vm1, %v1918_v27 }
  0x32   : > { %1756 = vmatprep.mubr.msk.bf16.mxu1 %vm2047_vm0, %v2046_v2 }
  0x33   : > { %673 = vmatmul.mubr.bf16.gmra.mrb[4].mxu0 %v1909_v25 }
  0x34   : > { %680 = vmatprep.mubr.bf16.mxu0 %v1911_v26 }
  0x39   : > { %1757 = vmatmul.mubr.msk.bf16.gmra.mrb[16].mxu1 %vm592_vm1, %v1922_v30 }
  0x3a   : > { %1760 = vmatprep.mubr.msk.bf16.mxu1 %vm2047_vm0, %v2046_v2 }
  0x3b   : > { %681 = vmatmul.mubr.bf16.gmra.mrb[8].mxu0 %v1913_v28 }
  0x3c   : > { %688 = vmatprep.mubr.bf16.mxu0 %v1915_v29 }
  0x41   : > { %1761 = vmatmul.mubr.msk.bf16.gmra.mrb[20].mxu1 %vm592_vm1, %v1926_v33 }
  0x42   : > { %1764 = vmatprep.mubr.msk.bf16.mxu1 %vm2047_vm0, %v2046_v2 }
  0x43   : > { %689 = vmatmul.mubr.bf16.gmra.mrb[12].mxu0 %v1917_v31 }
  0x44   : > { %696 = vmatprep.mubr.bf16.mxu0 %v1919_v32 }
  0x49   : > { %1765 = vmatmul.mubr.msk.bf16.gmra.mrb[24].mxu1 %vm592_vm1, %v1930_v36 }
  0x4a   : > { %1768 = vmatprep.mubr.msk.bf16.mxu1 %vm2047_vm0, %v2046_v2 }
  0x4b   : > { %697 = vmatmul.mubr.bf16.gmra.mrb[16].mxu0 %v1921_v34 }
  0x4c   : > { %704 = vmatprep.mubr.bf16.mxu0 %v1923_v35 }
  0x51   : > { %1769 = vmatmul.mubr.msk.bf16.gmra.mrb[28].mxu1 %vm592_vm1, %v1934_v39 }
  0x52   : > { %1772 = vmatprep.mubr.msk.bf16.mxu1 %vm2047_vm0, %v2046_v2 }
  0x53   : > { %705 = vmatmul.mubr.bf16.gmra.mrb[20].mxu0 %v1925_v37 }
  0x54   : > { %712 = vmatprep.mubr.bf16.mxu0 %v1927_v38 }
  0x59   : > { %1773 = vmatmul.mubr.msk.bf16.gmra.mrb[32].mxu1 %vm592_vm1, %v1938_v42 }
  0x5a   : > { %1776 = vmatprep.mubr.msk.bf16.mxu1 %vm2047_vm0, %v2046_v2 }
  0x5b   : > { %713 = vmatmul.mubr.bf16.gmra.mrb[24].mxu0 %v1929_v40 }
  0x5c   : > { %720 = vmatprep.mubr.bf16.mxu0 %v1931_v41 }
  0x61   : > { %1777 = vmatmul.mubr.msk.bf16.gmra.mrb[36].mxu1 %vm592_vm1, %v1942_v45 }
  0x62   : > { %1780 = vmatprep.mubr.msk.bf16.mxu1 %vm2047_vm0, %v2046_v2 }
  0x63   : > { %721 = vmatmul.mubr.bf16.gmra.mrb[28].mxu0 %v1933_v43 }
  0x64   : > { %728 = vmatprep.mubr.bf16.mxu0 %v1935_v44 }
  0x69   : > { %1781 = vmatmul.mubr.msk.bf16.gmra.mrb[40].mxu1 %vm592_vm1, %v1946_v48 }
  0x6a   : > { %1784 = vmatprep.mubr.msk.bf16.mxu1 %vm2047_vm0, %v2046_v2 }
  0x6b   : > { %729 = vmatmul.mubr.bf16.gmra.mrb[32].mxu0 %v1937_v46 }
  0x6c   : > { %736 = vmatprep.mubr.bf16.mxu0 %v1939_v47 }
  0x71   : > { %1785 = vmatmul.mubr.msk.bf16.gmra.mrb[44].mxu1 %vm592_vm1, %v1950_v51 }
  0x72   : > { %1788 = vmatprep.mubr.msk.bf16.mxu1 %vm2047_vm0, %v2046_v2 }
  0x73   : > { %737 = vmatmul.mubr.bf16.gmra.mrb[36].mxu0 %v1941_v49 }
  0x74   : > { %744 = vmatprep.mubr.bf16.mxu0 %v1943_v50 }
  0x79   : > { %1789 = vmatmul.mubr.msk.bf16.gmra.mrb[48].mxu1 %vm592_vm1, %v1953_v55 }
  0x7b   : > { %745 = vmatmul.mubr.bf16.gmra.mrb[40].mxu0 %v1945_v52 }
  0x7c   : > { %752 = vmatprep.mubr.bf16.mxu0 %v1947_v53 }
  0x83   : > { %753 = vmatmul.mubr.bf16.gmra.mrb[44].mxu0 %v1949_v56 }
  0x84   : > { %760 = vmatprep.mubr.bf16.mxu0 %v1460_v57 }
  0x8b   : > { %761 = vmatmul.mubr.bf16.gmra.mrb[48].mxu0 %v1459_v58 }
  0xec   : > { %v802_v59 = vpop.f32.mrb[0].mxu1 }
  0xed   : > { %v1742_v60 = vpop.f32.mrb[1].mxu1 }
  0xee   : > { %v805_v61 = vpop.f32.mrb[2].mxu1 }
  0xef   : > { %v1743_v62 = vpop.f32.mrb[3].mxu1 }
  0xf4   : > { %v810_v63 = vpop.f32.mrb[4].mxu1 }
  0xf5   : > { %v1746_v0 = vpop.f32.mrb[5].mxu1 }
  0xf6   : > { %v813_v2 = vpop.f32.mrb[6].mxu1 }
  0xf7   : > { %v1747_v5 = vpop.f32.mrb[7].mxu1 }
  0xfc   : > { %v818_v13 = vpop.f32.mrb[8].mxu1 }
  0xfd   : > { %v1750_v14 = vpop.f32.mrb[9].mxu1 }
  0xfe   : > { %v1643_v1 = vpop.f32.mrb[0].mxu0  ;;  %v821_v18 = vpop.f32.mrb[10].mxu1 }
  0xff   : > { %v1644_v3 = vpop.f32.mrb[1].mxu0  ;;  %v1751_v20 = vpop.f32.mrb[11].mxu1 }
 0x100   : > { %v1645_v6 = vadd.f32 %v1644_v3, %v1643_v1  ;;  %v1646_v7 = vpop.f32.mrb[2].mxu0 }
 0x101   : > { %v1647_v8 = vpop.f32.mrb[3].mxu0 }
 0x102   : > { %v667_v9 = vadd.f32 %v1645_v6, %v2243_v4  ;;  %v1648_v10 = vadd.f32 %v1647_v8, %v1646_v7 }
 0x104   : > { %v803_v11 = vadd.f32 %v802_v59, %v667_v9  ;;  %v670_v12 = vadd.f32 %v1648_v10, %v2243_v4  ;;  %v826_v32 = vpop.f32.mrb[12].mxu1 }
 0x105   : > { %v1754_v33 = vpop.f32.mrb[13].mxu1 }
 0x106   : > { %v929_v15 = vmul.f32 0.1, %v803_v11  ;;  %v806_v16 = vadd.f32 %v805_v61, %v670_v12  ;;  %v1649_v17 = vpop.f32.mrb[4].mxu0  ;;  %vm904_vm2 = vcmp.ge.f32.partialorder %v803_v11, 0.0  ;;  %v829_v37 = vpop.f32.mrb[14].mxu1 }
 0x107   : > { %v1650_v19 = vpop.f32.mrb[5].mxu0  ;;  %v1755_v39 = vpop.f32.mrb[15].mxu1 }
 0x108   : > { %vm905_vm3 = vcmp.ge.f32.partialorder %v806_v16, 0.0  ;;  %v930_v21 = vmul.f32 0.1, %v806_v16  ;;  %v1651_v22 = vadd.f32 %v1650_v19, %v1649_v17  ;;  %v1652_v23 = vpop.f32.mrb[6].mxu0  ;;  %v954_v25 = vsel %vm904_vm2, %v803_v11, %v929_v15 }
 0x109   : > { %v1653_v24 = vpop.f32.mrb[7].mxu0 }
 0x10a   : > { %v955_v26 = vsel %vm905_vm3, %v806_v16, %v930_v21  ;;  %v675_v27 = vadd.f32 %v1651_v22, %v2243_v4  ;;  %v1654_v28 = vadd.f32 %v1653_v24, %v1652_v23 }
 0x10b   : > { %v1559_v29 = vpack.c.bf16 %v955_v26, %v954_v25 }
 0x10c   : > { %v811_v30 = vadd.f32 %v810_v63, %v675_v27  ;;  %v678_v31 = vadd.f32 %v1654_v28, %v2243_v4  ;;  %v834_v51 = vpop.f32.mrb[16].mxu1 }
 0x10d   : > { %1560 = vst [vmem:[%s2250_s12] sm:$0xff] %v1559_v29   ;;  %v1758_v52 = vpop.f32.mrb[17].mxu1 }
 0x10e   : > { %v931_v34 = vmul.f32 0.1, %v811_v30  ;;  %v814_v35 = vadd.f32 %v813_v2, %v678_v31  ;;  %v1655_v36 = vpop.f32.mrb[8].mxu0  ;;  %vm906_vm4 = vcmp.ge.f32.partialorder %v811_v30, 0.0  ;;  %v837_v56 = vpop.f32.mrb[18].mxu1 }
 0x10f   : > { %v1656_v38 = vpop.f32.mrb[9].mxu0  ;;  %v1759_v58 = vpop.f32.mrb[19].mxu1 }
 0x110   : > { %vm907_vm5 = vcmp.ge.f32.partialorder %v814_v35, 0.0  ;;  %v932_v40 = vmul.f32 0.1, %v814_v35  ;;  %v1657_v41 = vadd.f32 %v1656_v38, %v1655_v36  ;;  %v1658_v42 = vpop.f32.mrb[10].mxu0  ;;  %v956_v44 = vsel %vm906_vm4, %v811_v30, %v931_v34 }
 0x111   : > { %v1659_v43 = vpop.f32.mrb[11].mxu0 }
 0x112   : > { %v957_v45 = vsel %vm907_vm5, %v814_v35, %v932_v40  ;;  %v683_v46 = vadd.f32 %v1657_v41, %v2243_v4  ;;  %v1660_v47 = vadd.f32 %v1659_v43, %v1658_v42 }
 0x113   : > { %v1564_v48 = vpack.c.bf16 %v957_v45, %v956_v44 }
 0x114   : > { %v819_v49 = vadd.f32 %v818_v13, %v683_v46  ;;  %v686_v50 = vadd.f32 %v1660_v47, %v2243_v4  ;;  %v842_v7 = vpop.f32.mrb[20].mxu1 }
 0x115   : > { %1616 = vst [vmem:[%s2250_s12 + $0x8] sm:$0xff] %v1564_v48   ;;  %v1762_v8 = vpop.f32.mrb[21].mxu1 }
 0x116   : > { %v933_v53 = vmul.f32 0.1, %v819_v49  ;;  %v822_v54 = vadd.f32 %v821_v18, %v686_v50  ;;  %v1661_v55 = vpop.f32.mrb[12].mxu0  ;;  %vm908_vm6 = vcmp.ge.f32.partialorder %v819_v49, 0.0  ;;  %v845_v12 = vpop.f32.mrb[22].mxu1 }
 0x117   : > { %v1662_v57 = vpop.f32.mrb[13].mxu0  ;;  %v1763_v14 = vpop.f32.mrb[23].mxu1 }
 0x118   : > { %vm909_vm7 = vcmp.ge.f32.partialorder %v822_v54, 0.0  ;;  %v934_v59 = vmul.f32 0.1, %v822_v54  ;;  %v1663_v60 = vadd.f32 %v1662_v57, %v1661_v55  ;;  %v1664_v61 = vpop.f32.mrb[14].mxu0  ;;  %v958_v63 = vsel %vm908_vm6, %v819_v49, %v933_v53 }
 0x119   : > { %v1665_v62 = vpop.f32.mrb[15].mxu0 }
 0x11a   : > { %v959_v0 = vsel %vm909_vm7, %v822_v54, %v934_v59  ;;  %v691_v1 = vadd.f32 %v1663_v60, %v2243_v4  ;;  %v1666_v2 = vadd.f32 %v1665_v62, %v1664_v61 }
 0x11b   : > { %v1569_v3 = vpack.c.bf16 %v959_v0, %v958_v63 }
 0x11c   : > { %v827_v5 = vadd.f32 %v826_v32, %v691_v1  ;;  %v694_v6 = vadd.f32 %v1666_v2, %v2243_v4  ;;  %v850_v26 = vpop.f32.mrb[24].mxu1 }
 0x11d   : > { %1617 = vst [vmem:[%s2250_s12 + $0x10] sm:$0xff] %v1569_v3   ;;  %v1766_v27 = vpop.f32.mrb[25].mxu1 }
 0x11e   : > { %v935_v9 = vmul.f32 0.1, %v827_v5  ;;  %v830_v10 = vadd.f32 %v829_v37, %v694_v6  ;;  %v1667_v11 = vpop.f32.mrb[16].mxu0  ;;  %vm910_vm8 = vcmp.ge.f32.partialorder %v827_v5, 0.0  ;;  %v853_v31 = vpop.f32.mrb[26].mxu1 }
 0x11f   : > { %v1668_v13 = vpop.f32.mrb[17].mxu0  ;;  %v1767_v33 = vpop.f32.mrb[27].mxu1 }
 0x120   : > { %vm911_vm9 = vcmp.ge.f32.partialorder %v830_v10, 0.0  ;;  %v936_v15 = vmul.f32 0.1, %v830_v10  ;;  %v1669_v16 = vadd.f32 %v1668_v13, %v1667_v11  ;;  %v1670_v17 = vpop.f32.mrb[18].mxu0  ;;  %v960_v19 = vsel %vm910_vm8, %v827_v5, %v935_v9 }
 0x121   : > { %v1671_v18 = vpop.f32.mrb[19].mxu0 }
 0x122   : > { %v961_v20 = vsel %vm911_vm9, %v830_v10, %v936_v15  ;;  %v699_v21 = vadd.f32 %v1669_v16, %v2243_v4  ;;  %v1672_v22 = vadd.f32 %v1671_v18, %v1670_v17 }
 0x123   : > { %v1574_v23 = vpack.c.bf16 %v961_v20, %v960_v19 }
 0x124   : > { %v835_v24 = vadd.f32 %v834_v51, %v699_v21  ;;  %v702_v25 = vadd.f32 %v1672_v22, %v2243_v4  ;;  %v858_v45 = vpop.f32.mrb[28].mxu1 }
 0x125   : > { %1618 = vst [vmem:[%s2250_s12 + $0x18] sm:$0xff] %v1574_v23   ;;  %v1770_v46 = vpop.f32.mrb[29].mxu1 }
 0x126   : > { %v937_v28 = vmul.f32 0.1, %v835_v24  ;;  %v838_v29 = vadd.f32 %v837_v56, %v702_v25  ;;  %v1673_v30 = vpop.f32.mrb[20].mxu0  ;;  %vm912_vm10 = vcmp.ge.f32.partialorder %v835_v24, 0.0  ;;  %v861_v50 = vpop.f32.mrb[30].mxu1 }
 0x127   : > { %v1674_v32 = vpop.f32.mrb[21].mxu0  ;;  %v1771_v52 = vpop.f32.mrb[31].mxu1 }
 0x128   : > { %vm913_vm11 = vcmp.ge.f32.partialorder %v838_v29, 0.0  ;;  %v938_v34 = vmul.f32 0.1, %v838_v29  ;;  %v1675_v35 = vadd.f32 %v1674_v32, %v1673_v30  ;;  %v1676_v36 = vpop.f32.mrb[22].mxu0  ;;  %v962_v38 = vsel %vm912_vm10, %v835_v24, %v937_v28 }
 0x129   : > { %v1677_v37 = vpop.f32.mrb[23].mxu0 }
 0x12a   : > { %v963_v39 = vsel %vm913_vm11, %v838_v29, %v938_v34  ;;  %v707_v40 = vadd.f32 %v1675_v35, %v2243_v4  ;;  %v1678_v41 = vadd.f32 %v1677_v37, %v1676_v36 }
 0x12b   : > { %v1579_v42 = vpack.c.bf16 %v963_v39, %v962_v38 }
 0x12c   : > { %v843_v43 = vadd.f32 %v842_v7, %v707_v40  ;;  %v710_v44 = vadd.f32 %v1678_v41, %v2243_v4  ;;  %v866_v0 = vpop.f32.mrb[32].mxu1 }
 0x12d   : > { %1619 = vst [vmem:[%s2250_s12 + $0x20] sm:$0xff] %v1579_v42   ;;  %v1774_v1 = vpop.f32.mrb[33].mxu1 }
 0x12e   : > { %v939_v47 = vmul.f32 0.1, %v843_v43  ;;  %v846_v48 = vadd.f32 %v845_v12, %v710_v44  ;;  %v1679_v49 = vpop.f32.mrb[24].mxu0  ;;  %vm914_vm12 = vcmp.ge.f32.partialorder %v843_v43, 0.0  ;;  %v869_v6 = vpop.f32.mrb[34].mxu1 }
 0x12f   : > { %v1680_v51 = vpop.f32.mrb[25].mxu0  ;;  %v1775_v8 = vpop.f32.mrb[35].mxu1 }
 0x130   : > { %vm915_vm13 = vcmp.ge.f32.partialorder %v846_v48, 0.0  ;;  %v940_v53 = vmul.f32 0.1, %v846_v48  ;;  %v1681_v54 = vadd.f32 %v1680_v51, %v1679_v49  ;;  %v1682_v55 = vpop.f32.mrb[26].mxu0  ;;  %v964_v57 = vsel %vm914_vm12, %v843_v43, %v939_v47 }
 0x131   : > { %v1683_v56 = vpop.f32.mrb[27].mxu0 }
 0x132   : > { %v965_v58 = vsel %vm915_vm13, %v846_v48, %v940_v53  ;;  %v715_v59 = vadd.f32 %v1681_v54, %v2243_v4  ;;  %v1684_v60 = vadd.f32 %v1683_v56, %v1682_v55 }
 0x133   : > { %v1584_v61 = vpack.c.bf16 %v965_v58, %v964_v57 }
 0x134   : > { %v851_v62 = vadd.f32 %v850_v26, %v715_v59  ;;  %v718_v63 = vadd.f32 %v1684_v60, %v2243_v4  ;;  %v874_v20 = vpop.f32.mrb[36].mxu1 }
 0x135   : > { %1620 = vst [vmem:[%s2250_s12 + $0x28] sm:$0xff] %v1584_v61   ;;  %v1778_v21 = vpop.f32.mrb[37].mxu1 }
 0x136   : > { %v941_v2 = vmul.f32 0.1, %v851_v62  ;;  %v854_v3 = vadd.f32 %v853_v31, %v718_v63  ;;  %v1685_v5 = vpop.f32.mrb[28].mxu0  ;;  %vm916_vm14 = vcmp.ge.f32.partialorder %v851_v62, 0.0  ;;  %v877_v25 = vpop.f32.mrb[38].mxu1 }
 0x137   : > { %v1686_v7 = vpop.f32.mrb[29].mxu0  ;;  %v1779_v27 = vpop.f32.mrb[39].mxu1 }
 0x138   : > { %vm917_vm15 = vcmp.ge.f32.partialorder %v854_v3, 0.0  ;;  %v942_v9 = vmul.f32 0.1, %v854_v3  ;;  %v1687_v10 = vadd.f32 %v1686_v7, %v1685_v5  ;;  %v1688_v11 = vpop.f32.mrb[30].mxu0  ;;  %v966_v13 = vsel %vm916_vm14, %v851_v62, %v941_v2 }
 0x139   : > { %v1689_v12 = vpop.f32.mrb[31].mxu0 }
 0x13a   : > { %v967_v14 = vsel %vm917_vm15, %v854_v3, %v942_v9  ;;  %v723_v15 = vadd.f32 %v1687_v10, %v2243_v4  ;;  %v1690_v16 = vadd.f32 %v1689_v12, %v1688_v11 }
 0x13b   : > { %v1589_v17 = vpack.c.bf16 %v967_v14, %v966_v13 }
 0x13c   : > { %v859_v18 = vadd.f32 %v858_v45, %v723_v15  ;;  %v726_v19 = vadd.f32 %v1690_v16, %v2243_v4  ;;  %v882_v39 = vpop.f32.mrb[40].mxu1 }
 0x13d   : > { %1621 = vst [vmem:[%s2250_s12 + $0x30] sm:$0xff] %v1589_v17   ;;  %v1782_v40 = vpop.f32.mrb[41].mxu1 }
 0x13e   : > { %v943_v22 = vmul.f32 0.1, %v859_v18  ;;  %v862_v23 = vadd.f32 %v861_v50, %v726_v19  ;;  %v1691_v24 = vpop.f32.mrb[32].mxu0  ;;  %vm918_vm0 = vcmp.ge.f32.partialorder %v859_v18, 0.0  ;;  %v885_v44 = vpop.f32.mrb[42].mxu1 }
 0x13f   : > { %v1692_v26 = vpop.f32.mrb[33].mxu0  ;;  %v1783_v46 = vpop.f32.mrb[43].mxu1 }
 0x140   : > { %vm919_vm1 = vcmp.ge.f32.partialorder %v862_v23, 0.0  ;;  %v944_v28 = vmul.f32 0.1, %v862_v23  ;;  %v1693_v29 = vadd.f32 %v1692_v26, %v1691_v24  ;;  %v1694_v30 = vpop.f32.mrb[34].mxu0  ;;  %v968_v32 = vsel %vm918_vm0, %v859_v18, %v943_v22 }
 0x141   : > { %v1695_v31 = vpop.f32.mrb[35].mxu0 }
 0x142   : > { %v969_v33 = vsel %vm919_vm1, %v862_v23, %v944_v28  ;;  %v731_v34 = vadd.f32 %v1693_v29, %v2243_v4  ;;  %v1696_v35 = vadd.f32 %v1695_v31, %v1694_v30 }
 0x143   : > { %v1594_v36 = vpack.c.bf16 %v969_v33, %v968_v32 }
 0x144   : > { %v867_v37 = vadd.f32 %v866_v0, %v731_v34  ;;  %v734_v38 = vadd.f32 %v1696_v35, %v2243_v4  ;;  %v890_v58 = vpop.f32.mrb[44].mxu1 }
 0x145   : > { %1622 = vst [vmem:[%s2250_s12 + $0x38] sm:$0xff] %v1594_v36   ;;  %v1786_v59 = vpop.f32.mrb[45].mxu1 }
 0x146   : > { %v945_v41 = vmul.f32 0.1, %v867_v37  ;;  %v870_v42 = vadd.f32 %v869_v6, %v734_v38  ;;  %v1697_v43 = vpop.f32.mrb[36].mxu0  ;;  %vm920_vm2 = vcmp.ge.f32.partialorder %v867_v37, 0.0  ;;  %v893_v63 = vpop.f32.mrb[46].mxu1 }
 0x147   : > { %v1698_v45 = vpop.f32.mrb[37].mxu0  ;;  %v1787_v1 = vpop.f32.mrb[47].mxu1 }
 0x148   : > { %vm921_vm3 = vcmp.ge.f32.partialorder %v870_v42, 0.0  ;;  %v946_v47 = vmul.f32 0.1, %v870_v42  ;;  %v1699_v48 = vadd.f32 %v1698_v45, %v1697_v43  ;;  %v1700_v49 = vpop.f32.mrb[38].mxu0  ;;  %v970_v51 = vsel %vm920_vm2, %v867_v37, %v945_v41 }
 0x149   : > { %v1701_v50 = vpop.f32.mrb[39].mxu0 }
 0x14a   : > { %v971_v52 = vsel %vm921_vm3, %v870_v42, %v946_v47  ;;  %v739_v53 = vadd.f32 %v1699_v48, %v2243_v4  ;;  %v1702_v54 = vadd.f32 %v1701_v50, %v1700_v49 }
 0x14b   : > { %v1599_v55 = vpack.c.bf16 %v971_v52, %v970_v51 }
 0x14c   : > { %v875_v56 = vadd.f32 %v874_v20, %v739_v53  ;;  %v742_v57 = vadd.f32 %v1702_v54, %v2243_v4  ;;  %v898_v14 = vpop.f32.mrb[48].mxu1 }
 0x14d   : > { %1623 = vst [vmem:[%s2250_s12 + $0x40] sm:$0xff] %v1599_v55   ;;  %v1790_v15 = vpop.f32.mrb[49].mxu1 }
 0x14e   : > { %v947_v60 = vmul.f32 0.1, %v875_v56  ;;  %v878_v61 = vadd.f32 %v877_v25, %v742_v57  ;;  %v1703_v62 = vpop.f32.mrb[40].mxu0  ;;  %vm922_vm4 = vcmp.ge.f32.partialorder %v875_v56, 0.0  ;;  %v901_v19 = vpop.f32.mrb[50].mxu1 }
 0x14f   : > { %v1704_v0 = vpop.f32.mrb[41].mxu0  ;;  %v1791_v21 = vpop.f32.mrb[51].mxu1 }
 0x150   : > { %vm923_vm5 = vcmp.ge.f32.partialorder %v878_v61, 0.0  ;;  %v948_v2 = vmul.f32 0.1, %v878_v61  ;;  %v1705_v3 = vadd.f32 %v1704_v0, %v1703_v62  ;;  %v1706_v5 = vpop.f32.mrb[42].mxu0  ;;  %v972_v7 = vsel %vm922_vm4, %v875_v56, %v947_v60 }
 0x151   : > { %v1707_v6 = vpop.f32.mrb[43].mxu0 }
 0x152   : > { %v973_v8 = vsel %vm923_vm5, %v878_v61, %v948_v2  ;;  %v747_v9 = vadd.f32 %v1705_v3, %v2243_v4  ;;  %v1708_v10 = vadd.f32 %v1707_v6, %v1706_v5 }
 0x153   : > { %v1604_v11 = vpack.c.bf16 %v973_v8, %v972_v7 }
 0x154   : > { %v883_v12 = vadd.f32 %v882_v39, %v747_v9  ;;  %v750_v13 = vadd.f32 %v1708_v10, %v2243_v4 }
 0x155   : > { %1624 = vst [vmem:[%s2250_s12 + $0x48] sm:$0xff] %v1604_v11  }
 0x156   : > { %v949_v16 = vmul.f32 0.1, %v883_v12  ;;  %v886_v17 = vadd.f32 %v885_v44, %v750_v13  ;;  %v1709_v18 = vpop.f32.mrb[44].mxu0  ;;  %vm924_vm6 = vcmp.ge.f32.partialorder %v883_v12, 0.0 }
 0x157   : > { %v1710_v20 = vpop.f32.mrb[45].mxu0 }
 0x158   : > { %vm925_vm7 = vcmp.ge.f32.partialorder %v886_v17, 0.0  ;;  %v950_v22 = vmul.f32 0.1, %v886_v17  ;;  %v1711_v23 = vadd.f32 %v1710_v20, %v1709_v18  ;;  %v1712_v24 = vpop.f32.mrb[46].mxu0  ;;  %v974_v26 = vsel %vm924_vm6, %v883_v12, %v949_v16 }
 0x159   : > { %v1713_v25 = vpop.f32.mrb[47].mxu0 }
 0x15a   : > { %v975_v27 = vsel %vm925_vm7, %v886_v17, %v950_v22  ;;  %v755_v28 = vadd.f32 %v1711_v23, %v2243_v4  ;;  %v1714_v29 = vadd.f32 %v1713_v25, %v1712_v24 }
 0x15b   : > { %v1609_v30 = vpack.c.bf16 %v975_v27, %v974_v26 }
 0x15c   : > { %v891_v31 = vadd.f32 %v890_v58, %v755_v28  ;;  %v758_v32 = vadd.f32 %v1714_v29, %v2243_v4 }
 0x15d   : > { %1625 = vst [vmem:[%s2250_s12 + $0x50] sm:$0xff] %v1609_v30  }
 0x15e   : > { %v951_v33 = vmul.f32 0.1, %v891_v31  ;;  %v894_v34 = vadd.f32 %v893_v63, %v758_v32  ;;  %v1715_v35 = vpop.f32.mrb[48].mxu0  ;;  %vm926_vm8 = vcmp.ge.f32.partialorder %v891_v31, 0.0 }
 0x15f   : > { %v1716_v36 = vpop.f32.mrb[49].mxu0 }
 0x160   : > { %vm927_vm9 = vcmp.ge.f32.partialorder %v894_v34, 0.0  ;;  %v952_v37 = vmul.f32 0.1, %v894_v34  ;;  %v1717_v38 = vadd.f32 %v1716_v36, %v1715_v35  ;;  %v1718_v39 = vpop.f32.mrb[50].mxu0  ;;  %v976_v41 = vsel %vm926_vm8, %v891_v31, %v951_v33 }
 0x161   : > { %v1719_v40 = vpop.f32.mrb[51].mxu0 }
 0x162   : > { %v977_v42 = vsel %vm927_vm9, %v894_v34, %v952_v37  ;;  %v763_v43 = vadd.f32 %v1717_v38, %v2243_v4 }
 0x163   : > { %v1614_v44 = vpack.c.bf16 %v977_v42, %v976_v41 }
 0x164   : > { %v899_v45 = vadd.f32 %v898_v14, %v763_v43 }
 0x165   : > { %1626 = vst [vmem:[%s2250_s12 + $0x58] sm:$0xff] %v1614_v44   ;;  %1111 = sbr.rel (!%p2093_p4) target bundleno = 442 (0x1ba), region = 36 }
 0x166   : > { %vm928_vm10 = vcmp.ge.f32.partialorder %v899_v45, 0.0  ;;  %v953_v46 = vmul.f32 0.1, %v899_v45 }
 0x168   : > { %v978_v47 = vsel %vm928_vm10, %v899_v45, %v953_v46 }
 0x169   : > { %v1554_v48 = vpack.c.bf16 %v978_v47, %v978_v47 }
 0x16b   : > { %1104 = vst [vmem:[%s2250_s12 + $0x60] sm:$0xf] %v1554_v48 }
 0x16c   : > { %s2414_s27 = smov (!%p1114_p8, %s1113_s27), 25 }
 0x16d   : > { %s1518_s5 = sshll.u32 %s2414_s27, 6 }
 0x16e   : > { %p1521_p9 = scmp.eq.s32.totalorder %s1518_s5, 0 }
 0x16f   : > { %1954 = sdivrem.u32 (!%p1521_p9), %s2414_s27, 25 }
 0x170   : > { %1122 = sbr.rel (%p1521_p9) target bundleno = 442 (0x1ba), region = 40 }
 0x178   : > { %s2299_s20 = spop.drf %1954 }
 0x179   : > { %p1522_p10 = scmp.le.s32.totalorder %s2299_s20, 0 }
 0x17a   : > { %s2407_s15 = smov (!%p1522_p10), %s2293_s4  ;;  %s2408_s25 = smov (!%p1522_p10), %s2250_s12 }
 0x17b   : > { %1373 = sbr.rel (%p1522_p10) target bundleno = 413 (0x19d), region = 112  ;;  %s2308_s6 = smov (!%p1522_p10), 0  }
 0x17c   : > { %s2310_s7 = smov (!%p1522_p10), 0  }
 0x182 LB: >> { %v1139_v4 = vld [vmem:[%s2020_s25] sm:$0xf]  ;;  %v1141_v49 = vld [vmem:[%s2020_s25 + $0x4] sm:$0xf]  ;;  %v1143_v50 = vld [vmem:[%s2020_s25 + $0x8] sm:$0xf]  ;;  %s2028_s7 = sphi %s2310_s7, %s1133_s7   ;;  %s2024_s6 = sphi %s2308_s6, %s2409_s6   ;;  %s2020_s25 = sphi %s2408_s25, %s1194_s25   ;;  %s2016_s15 = sphi %s2407_s15, %s1195_s15  }
 0x183   : >> { %1140 = vst [vmem:[%s2016_s15] sm:$0xf] %v1139_v4  ;;  %1142 = vst [vmem:[%s2016_s15 + $0x4] sm:$0xf] %v1141_v49  ;;  %v1145_v51 = vld [vmem:[%s2020_s25 + $0xc] sm:$0xf]  ;;  %s1189_s8 = sadd.s32 1, %s2024_s6 }
 0x184   : >> { %1144 = vst [vmem:[%s2016_s15 + $0x8] sm:$0xf] %v1143_v50  ;;  %v1147_v52 = vld [vmem:[%s2020_s25 + $0x10] sm:$0xf]  ;;  %v1149_v53 = vld [vmem:[%s2020_s25 + $0x14] sm:$0xf]  ;;  %p1190_p11 = scmp.ge.s32.totalorder %s1189_s8, %s2299_s20 }
 0x185   : >> { %1146 = vst [vmem:[%s2016_s15 + $0xc] sm:$0xf] %v1145_v51  ;;  %1148 = vst [vmem:[%s2016_s15 + $0x10] sm:$0xf] %v1147_v52  ;;  %v1151_v54 = vld [vmem:[%s2020_s25 + $0x18] sm:$0xf] }
 0x186   : >> { %1150 = vst [vmem:[%s2016_s15 + $0x14] sm:$0xf] %v1149_v53  ;;  %v1153_v55 = vld [vmem:[%s2020_s25 + $0x1c] sm:$0xf]  ;;  %v1155_v56 = vld [vmem:[%s2020_s25 + $0x20] sm:$0xf] }
 0x187   : >> { %1152 = vst [vmem:[%s2016_s15 + $0x18] sm:$0xf] %v1151_v54  ;;  %1154 = vst [vmem:[%s2016_s15 + $0x1c] sm:$0xf] %v1153_v55  ;;  %v1157_v57 = vld [vmem:[%s2020_s25 + $0x24] sm:$0xf] }
 0x188   : >> { %1156 = vst [vmem:[%s2016_s15 + $0x20] sm:$0xf] %v1155_v56  ;;  %v1159_v58 = vld [vmem:[%s2020_s25 + $0x28] sm:$0xf]  ;;  %v1161_v59 = vld [vmem:[%s2020_s25 + $0x2c] sm:$0xf] }
 0x189   : >> { %1158 = vst [vmem:[%s2016_s15 + $0x24] sm:$0xf] %v1157_v57  ;;  %1160 = vst [vmem:[%s2016_s15 + $0x28] sm:$0xf] %v1159_v58  ;;  %v1163_v60 = vld [vmem:[%s2020_s25 + $0x30] sm:$0xf] }
 0x18a   : >> { %1162 = vst [vmem:[%s2016_s15 + $0x2c] sm:$0xf] %v1161_v59  ;;  %v1165_v61 = vld [vmem:[%s2020_s25 + $0x34] sm:$0xf]  ;;  %v1167_v62 = vld [vmem:[%s2020_s25 + $0x38] sm:$0xf] }
 0x18b   : >> { %1164 = vst [vmem:[%s2016_s15 + $0x30] sm:$0xf] %v1163_v60  ;;  %1166 = vst [vmem:[%s2016_s15 + $0x34] sm:$0xf] %v1165_v61  ;;  %v1169_v63 = vld [vmem:[%s2020_s25 + $0x3c] sm:$0xf] }
 0x18c   : >> { %1168 = vst [vmem:[%s2016_s15 + $0x38] sm:$0xf] %v1167_v62  ;;  %v1171_v0 = vld [vmem:[%s2020_s25 + $0x40] sm:$0xf]  ;;  %v1173_v1 = vld [vmem:[%s2020_s25 + $0x44] sm:$0xf] }
 0x18d   : >> { %1170 = vst [vmem:[%s2016_s15 + $0x3c] sm:$0xf] %v1169_v63  ;;  %1172 = vst [vmem:[%s2016_s15 + $0x40] sm:$0xf] %v1171_v0  ;;  %v1175_v2 = vld [vmem:[%s2020_s25 + $0x48] sm:$0xf] }
 0x18e   : >> { %1174 = vst [vmem:[%s2016_s15 + $0x44] sm:$0xf] %v1173_v1  ;;  %v1177_v3 = vld [vmem:[%s2020_s25 + $0x4c] sm:$0xf]  ;;  %v1179_v5 = vld [vmem:[%s2020_s25 + $0x50] sm:$0xf] }
 0x18f   : >> { %1176 = vst [vmem:[%s2016_s15 + $0x48] sm:$0xf] %v1175_v2  ;;  %1178 = vst [vmem:[%s2016_s15 + $0x4c] sm:$0xf] %v1177_v3  ;;  %v1181_v6 = vld [vmem:[%s2020_s25 + $0x54] sm:$0xf] }
 0x190   : >> { %1180 = vst [vmem:[%s2016_s15 + $0x50] sm:$0xf] %v1179_v5  ;;  %v1183_v7 = vld [vmem:[%s2020_s25 + $0x58] sm:$0xf]  ;;  %v1185_v8 = vld [vmem:[%s2020_s25 + $0x5c] sm:$0xf] }
 0x191   : >> { %1182 = vst [vmem:[%s2016_s15 + $0x54] sm:$0xf] %v1181_v6  ;;  %1184 = vst [vmem:[%s2016_s15 + $0x58] sm:$0xf] %v1183_v7  ;;  %v1187_v9 = vld [vmem:[%s2020_s25 + $0x60] sm:$0xf] }
 0x192   : >> { %1186 = vst [vmem:[%s2016_s15 + $0x5c] sm:$0xf] %v1185_v8  ;;  %1188 = vst [vmem:[%s2016_s15 + $0x60] sm:$0xf] %v1187_v9  ;;  %s2416_s8 = smov (%p1190_p11, %s1189_s8), 0  ;;  %s1133_s7 = sadd.s32 1, %s2028_s7  }
 0x193   : >> { %s1192_s9 = smul.u32 100, %s2416_s8  ;;  %p1132_p12 = scmp.ge.s32.totalorder %s1133_s7, %s2299_s20 }
 0x194   : >> { %s2409_s6 = smov %s2416_s8 }
 0x195   : >> { %s1194_s25 = scalar_lea.vmem %s2250_s12, %s1192_s9 [#allocation2]   ;;  %s1195_s15 = scalar_lea.vmem %s2293_s4, %s1192_s9  }
 0x196   : > { %1135 = sbr.rel (!%p1132_p12) target bundleno = 386 (0x182), region = 118 }
 0x19d PF: > { %1956 = sdivrem.u32 %s2414_s27, 25 }
 0x19e   : > { %s1523_s10 = smul.u32 100, %s2299_s20 }
 0x1a0   : > { %s1200_s11 = scalar_lea.vmem %s2250_s12, %s1523_s10 [#allocation2]   ;;  %s1202_s14 = scalar_lea.vmem %s2293_s4, %s1523_s10  }
 0x1a6   : > { %s1957_s17 = spop.drf %1956 }
 0x1a7   : > { %p1525_p13 = scmp.le.s32.totalorder %s1957_s17, 0 }
 0x1a8   : > { %s2030_s18 = smov (!%p1525_p13), %s1202_s14   ;;  %s2034_s21 = smov (!%p1525_p13), %s1200_s11  }
 0x1a9   : > { %1387 = sbr.rel (%p1525_p13) target bundleno = 442 (0x1ba), region = 123  ;;  %s2038_s22 = smov (!%p1525_p13), 0  }
 0x1aa   : > { %s2042_s23 = smov (!%p1525_p13), 0  }
 0x1b0 LB: >> { %v1212_v10 = vld [vmem:[%s2036_s21] sm:$0xf]  ;;  %s1214_s24 = sadd.s32 1, %s2040_s22  ;;  %s1206_s23 = sadd.s32 1, %s2044_s23   ;;  %s2044_s23 = sphi %s2042_s23, %s1206_s23   ;;  %s2040_s22 = sphi %s2038_s22, %s2039_s22   ;;  %s2036_s21 = sphi %s2034_s21, %s1219_s21   ;;  %s2032_s18 = sphi %s2030_s18, %s1220_s18  }
 0x1b1   : >> { %1213 = vst [vmem:[%s2032_s18] sm:$0xf] %v1212_v10  ;;  %p1215_p0 = scmp.ge.s32.totalorder %s1214_s24, %s1957_s17  ;;  %p1205_p1 = scmp.ge.s32.totalorder %s1206_s23, %s1957_s17 }
 0x1b3   : >> { %s2418_s24 = smov (%p1215_p0, %s1214_s24), 0  ;;  %1208 = sbr.rel (!%p1205_p1) target bundleno = 432 (0x1b0), region = 129 }
 0x1b4   : >> { %s1526_s26 = sshll.u32 %s2418_s24, 2  ;;  %s2039_s22 = smov %s2418_s24  }
 0x1b5   : >> { %s1219_s21 = scalar_lea.vmem %s1200_s11, %s1526_s26 [#allocation2]   ;;  %s1220_s18 = scalar_lea.vmem %s1202_s14, %s1526_s26  }
 0x1ba PF: > { %p10_p2 = scmp.ge.s32.totalorder %s2083_s16, 4   ;;  %s2410_s12 = smov %s2008_s13 }
 0x1bb   : > { %s2411_s13 = smov %s2091_s19  ;;  %s2412_s14 = smov %s2083_s16 }
 0x1bc   :  { %12 = sbr.rel (!%p10_p2) target bundleno = 2 (0x2), region = 140 }

// kernel: optimized_cnn_forward.6
= control target key start
LH: loop header
LB: loop body
LE: loop exit
PB: predicated region body
PF: predicated region fallthrough
CT: control target
= control target key end

     0   :  { %s2475_s12 = smov 0   ;;  %s2953_s0 = inlined_call_operand.vmem [shape: bf16[32,2304], index: 0, kind: input, shape index: {}]   ;;  %s2954_s1 = inlined_call_operand.vmem [shape: bf16[2304,128], index: 1, kind: input, shape index: {}]   ;;  %s2955_s2 = inlined_call_operand.vmem [shape: f32[1,128], index: 2, kind: input, shape index: {}]   ;;  %s2956_s3 = inlined_call_operand.vmem [shape: bf16[32,128], index: 3, kind: output, shape index: {}]  }
   0x1 LB: > { %s1886_s13 = sadd.s32 4294967295, %s2453_s12   ;;  %p1890_p0 = scmp.ge.s32.totalorder %s2453_s12, 1  ;;  %s2453_s12 = sphi %s2475_s12, %s13_s12  }
   0x2   : > { %p139_p1 = scmp.lt.s32.totalorder %s2453_s12, 3 }
   0x4   : > { %p140_p2 = pnand %p1890_p0, %p139_p1 }
   0x5   : > { %v2276_v0 = vld [vmem:[%s2954_s1 + $0x40] sm:$0xff] (!%p140_p2)   ;;  %v2280_v4 = vld [vmem:[%s2954_s1 + $0x48] sm:$0xff] (!%p140_p2)   ;;  %v2284_v8 = vld [vmem:[%s2954_s1 + $0x50] sm:$0xff] (!%p140_p2)   ;;  %s1891_s17 = sshll.u32 (!%p140_p2), %s1886_s13, 1 }
   0x6   : > { %143 = sbr.rel (%p140_p2) target bundleno = 391 (0x187), region = 32  ;;  %v2277_v1 = vld [vmem:[%s2954_s1] sm:$0xff] (!%p140_p2)   ;;  %2069 = vmatprep.subr.bf16.mxu0 (!%p140_p2), %v2276_v0  ;;  %v2281_v5 = vld [vmem:[%s2954_s1 + $0x8] sm:$0xff] (!%p140_p2)   ;;  %v2285_v9 = vld [vmem:[%s2954_s1 + $0x10] sm:$0xff] (!%p140_p2)   ;;  %p165_p3 = scmp.lt.s32.totalorder (!%p140_p2), %s1891_s17, 3 }
   0x7   : > { %v2278_v2 = vld [vmem:[%s2954_s1 + $0xc0] sm:$0xff] (!%p140_p2)   ;;  %2070 = vmatpush3.bf16.msra.mxu0 (!%p140_p2), %v2277_v1  ;;  %v2282_v6 = vld [vmem:[%s2954_s1 + $0xc8] sm:$0xff] (!%p140_p2)   ;;  %v2286_v10 = vld [vmem:[%s2954_s1 + $0xd0] sm:$0xff] (!%p140_p2)  }
   0x8   : > { %v2279_v3 = vld [vmem:[%s2954_s1 + $0x80] sm:$0xff] (!%p140_p2)   ;;  %2091 = vmatprep.subr.bf16.mxu1 (!%p140_p2), %v2278_v2  ;;  %2071 = vmatprep.subr.bf16.mxu0 (!%p140_p2), %v2280_v4  ;;  %v2283_v7 = vld [vmem:[%s2954_s1 + $0x88] sm:$0xff] (!%p140_p2)   ;;  %v2287_v11 = vld [vmem:[%s2954_s1 + $0x90] sm:$0xff] (!%p140_p2)  }
   0x9   : > { %2092 = vmatpush3.bf16.msra.mxu1 (!%p140_p2), %v2279_v3  ;;  %v2288_v12 = vld [vmem:[%s2954_s1 + $0x58] sm:$0xff] (!%p140_p2)   ;;  %v2292_v16 = vld [vmem:[%s2954_s1 + $0x60] sm:$0xff] (!%p140_p2)   ;;  %v2296_v20 = vld [vmem:[%s2954_s1 + $0x68] sm:$0xff] (!%p140_p2)  }
   0xa   : > { %2093 = vmatprep.subr.bf16.mxu1 (!%p140_p2), %v2282_v6  ;;  %v2289_v13 = vld [vmem:[%s2954_s1 + $0x18] sm:$0xff] (!%p140_p2)   ;;  %v2293_v17 = vld [vmem:[%s2954_s1 + $0x20] sm:$0xff] (!%p140_p2)   ;;  %v2297_v21 = vld [vmem:[%s2954_s1 + $0x28] sm:$0xff] (!%p140_p2)  }
   0xb   : > { %2072 = vmatpush3.bf16.msra.mxu0 (!%p140_p2), %v2281_v5  ;;  %v2290_v14 = vld [vmem:[%s2954_s1 + $0xd8] sm:$0xff] (!%p140_p2)   ;;  %v2294_v18 = vld [vmem:[%s2954_s1 + $0xe0] sm:$0xff] (!%p140_p2)   ;;  %v2298_v22 = vld [vmem:[%s2954_s1 + $0xe8] sm:$0xff] (!%p140_p2)  }
   0xc   : > { %2073 = vmatprep.subr.bf16.mxu0 (!%p140_p2), %v2284_v8  ;;  %v2291_v15 = vld [vmem:[%s2954_s1 + $0x98] sm:$0xff] (!%p140_p2)   ;;  %v2295_v19 = vld [vmem:[%s2954_s1 + $0xa0] sm:$0xff] (!%p140_p2)   ;;  %v2299_v23 = vld [vmem:[%s2954_s1 + $0xa8] sm:$0xff] (!%p140_p2)  }
   0xd   : > { %2094 = vmatpush3.bf16.msra.mxu1 %v2283_v7  ;;  %s2958_s17 = smov (!%p165_p3, %s1891_s17), 3  ;;  %v2300_v24 = vld [vmem:[%s2954_s1 + $0x70] sm:$0xff]   ;;  %v2304_v28 = vld [vmem:[%s2954_s1 + $0x78] sm:$0xff]   ;;  %v2311_v34 = vld [vmem:[%s2954_s1 + $0x140] sm:$0xff]  }
   0xe   : > { %2095 = vmatprep.subr.bf16.mxu1 %v2286_v10  ;;  %s2267_s14 = smul.u32 72, %s2958_s17  ;;  %v2301_v25 = vld [vmem:[%s2954_s1 + $0x30] sm:$0xff]   ;;  %v2305_v29 = vld [vmem:[%s2954_s1 + $0x38] sm:$0xff]   ;;  %v2315_v37 = vld [vmem:[%s2954_s1 + $0x100] sm:$0xff]  }
   0xf   : > { %2074 = vmatpush3.bf16.msra.mxu0 %v2285_v9  ;;  %v2302_v26 = vld [vmem:[%s2954_s1 + $0xf0] sm:$0xff]   ;;  %v2306_v30 = vld [vmem:[%s2954_s1 + $0xf8] sm:$0xff]   ;;  %v2316_v38 = vld [vmem:[%s2954_s1 + $0x1c0] sm:$0xff]  }
  0x10   : > { %2075 = vmatprep.subr.bf16.mxu0 %v2288_v12  ;;  %v2303_v27 = vld [vmem:[%s2954_s1 + $0xb0] sm:$0xff]   ;;  %s2578_s13 = scalar_lea.vmem %s2953_s0, %s2267_s14  ;;  %v2310_v33 = vld [vmem:[%s2954_s1 + $0xb8] sm:$0xff]   ;;  %v2317_v39 = vld [vmem:[%s2954_s1 + $0x180] sm:$0xff]  }
  0x11   : > { %2096 = vmatpush3.bf16.msra.mxu1 %v2287_v11  ;;  %v2307_v31 = vld [vmem:[%s2578_s13] ss:$72 sps:$4 sm:$0xff]   ;;  %v2309_v32 = vld [vmem:[%s2578_s13 + $0x4] ss:$72 sps:$4 sm:$0xff]   ;;  %v2322_v44 = vld [vmem:[%s2954_s1 + $0x150] sm:$0xff]  }
  0x12   : > { %2097 = vmatprep.subr.bf16.mxu1 %v2290_v14  ;;  %1477 = vmatprep.mubr.bf16.mxu0 %v2309_v32  ;;  %v2312_v35 = vld [vmem:[%s2578_s13 + $0x8] ss:$72 sps:$4 sm:$0xff]   ;;  %v2314_v36 = vld [vmem:[%s2578_s13 + $0xc] ss:$72 sps:$4 sm:$0xff]   ;;  %v2326_v48 = vld [vmem:[%s2954_s1 + $0x158] sm:$0xff]  }
  0x13   : > { %2076 = vmatpush3.bf16.msra.mxu0 %v2289_v13  ;;  %1518 = vmatprep.mubr.bf16.mxu1 %v2314_v36  ;;  %v2318_v40 = vld [vmem:[%s2954_s1 + $0x148] sm:$0xff]   ;;  %v2323_v45 = vld [vmem:[%s2954_s1 + $0x110] sm:$0xff]   ;;  %v2327_v49 = vld [vmem:[%s2954_s1 + $0x118] sm:$0xff]  }
  0x14   : > { %2077 = vmatprep.subr.bf16.mxu0 %v2292_v16  ;;  %v2319_v41 = vld [vmem:[%s2954_s1 + $0x108] sm:$0xff]   ;;  %v2324_v46 = vld [vmem:[%s2954_s1 + $0x1d0] sm:$0xff]   ;;  %v2328_v50 = vld [vmem:[%s2954_s1 + $0x1d8] sm:$0xff]  }
  0x15   : > { %2098 = vmatpush3.bf16.msra.mxu1 %v2291_v15  ;;  %v2320_v42 = vld [vmem:[%s2954_s1 + $0x1c8] sm:$0xff]   ;;  %v2325_v47 = vld [vmem:[%s2954_s1 + $0x190] sm:$0xff]   ;;  %v2329_v51 = vld [vmem:[%s2954_s1 + $0x198] sm:$0xff]  }
  0x16   : > { %2099 = vmatprep.subr.bf16.mxu1 %v2294_v18  ;;  %v2321_v43 = vld [vmem:[%s2954_s1 + $0x188] sm:$0xff]   ;;  %v2330_v52 = vld [vmem:[%s2954_s1 + $0x160] sm:$0xff]   ;;  %v2338_v60 = vld [vmem:[%s2954_s1 + $0x170] sm:$0xff]  }
  0x17   : > { %2078 = vmatpush3.bf16.msra.mxu0 %v2293_v17  ;;  %v2331_v53 = vld [vmem:[%s2954_s1 + $0x120] sm:$0xff]   ;;  %v2334_v56 = vld [vmem:[%s2954_s1 + $0x168] sm:$0xff]   ;;  %v2339_v61 = vld [vmem:[%s2954_s1 + $0x130] sm:$0xff]  }
  0x18   : > { %2079 = vmatprep.subr.bf16.mxu0 %v2296_v20  ;;  %v2332_v54 = vld [vmem:[%s2954_s1 + $0x1e0] sm:$0xff]   ;;  %v2335_v57 = vld [vmem:[%s2954_s1 + $0x128] sm:$0xff]   ;;  %v2340_v62 = vld [vmem:[%s2954_s1 + $0x1f0] sm:$0xff]  }
  0x19   : > { %2100 = vmatpush3.bf16.msra.mxu1 %v2295_v19  ;;  %v2333_v55 = vld [vmem:[%s2954_s1 + $0x1a0] sm:$0xff]   ;;  %v2336_v58 = vld [vmem:[%s2954_s1 + $0x1e8] sm:$0xff]   ;;  %v2341_v63 = vld [vmem:[%s2954_s1 + $0x1b0] sm:$0xff]  }
  0x1a   : > { %2101 = vmatprep.subr.bf16.mxu1 %v2298_v22  ;;  %v2337_v59 = vld [vmem:[%s2954_s1 + $0x1a8] sm:$0xff]   ;;  %v2342_v0 = vld [vmem:[%s2954_s1 + $0x178] sm:$0xff]   ;;  %v2349_v6 = vld [vmem:[%s2954_s1 + $0x240] sm:$0xff]  }
  0x1b   : > { %2080 = vmatpush3.bf16.msra.mxu0 %v2297_v21  ;;  %v2343_v1 = vld [vmem:[%s2954_s1 + $0x138] sm:$0xff]   ;;  %v2353_v9 = vld [vmem:[%s2954_s1 + $0x200] sm:$0xff]   ;;  %v2356_v12 = vld [vmem:[%s2954_s1 + $0x248] sm:$0xff]  }
  0x1c   : > { %2081 = vmatprep.subr.bf16.mxu0 %v2300_v24  ;;  %v2344_v2 = vld [vmem:[%s2954_s1 + $0x1f8] sm:$0xff]   ;;  %v2354_v10 = vld [vmem:[%s2954_s1 + $0x2c0] sm:$0xff]   ;;  %v2357_v13 = vld [vmem:[%s2954_s1 + $0x208] sm:$0xff]  }
  0x1d   : > { %2102 = vmatpush3.bf16.msra.mxu1 %v2299_v23  ;;  %v2345_v3 = vld [vmem:[%s2578_s13 + $0x10] ss:$72 sps:$4 sm:$0xff]   ;;  %v2347_v4 = vld [vmem:[%s2578_s13 + $0x14] ss:$72 sps:$4 sm:$0xff]   ;;  %v2355_v11 = vld [vmem:[%s2954_s1 + $0x280] sm:$0xff]  }
  0x1e   : > { %2103 = vmatprep.subr.bf16.mxu1 %v2302_v26  ;;  %v2348_v5 = vld [vmem:[%s2954_s1 + $0x1b8] sm:$0xff]   ;;  %v2358_v14 = vld [vmem:[%s2954_s1 + $0x2c8] sm:$0xff]   ;;  %v2360_v16 = vld [vmem:[%s2954_s1 + $0x250] sm:$0xff]  }
  0x1f   : > { %2082 = vmatpush3.bf16.msra.mxu0 %v2301_v25  ;;  %v2350_v7 = vld [vmem:[%s2578_s13 + $0x18] ss:$72 sps:$4 sm:$0xff]   ;;  %v2352_v8 = vld [vmem:[%s2578_s13 + $0x1c] ss:$72 sps:$4 sm:$0xff]   ;;  %v2359_v15 = vld [vmem:[%s2954_s1 + $0x288] sm:$0xff]  }
  0x20   : > { %2083 = vmatprep.subr.bf16.mxu0 %v2304_v28  ;;  %v2361_v17 = vld [vmem:[%s2954_s1 + $0x210] sm:$0xff]   ;;  %v2364_v20 = vld [vmem:[%s2954_s1 + $0x258] sm:$0xff]   ;;  %v2368_v24 = vld [vmem:[%s2954_s1 + $0x260] sm:$0xff]  }
  0x21   : > { %2104 = vmatpush3.bf16.msra.mxu1 %v2303_v27  ;;  %v2362_v18 = vld [vmem:[%s2954_s1 + $0x2d0] sm:$0xff]   ;;  %v2365_v21 = vld [vmem:[%s2954_s1 + $0x218] sm:$0xff]   ;;  %v2369_v25 = vld [vmem:[%s2954_s1 + $0x220] sm:$0xff]  }
  0x22   : > { %2105 = vmatprep.subr.bf16.mxu1 %v2306_v30  ;;  %v2363_v19 = vld [vmem:[%s2954_s1 + $0x290] sm:$0xff]   ;;  %v2366_v22 = vld [vmem:[%s2954_s1 + $0x2d8] sm:$0xff]   ;;  %v2370_v26 = vld [vmem:[%s2954_s1 + $0x2e0] sm:$0xff]  }
  0x23   : > { %2084 = vmatpush3.bf16.msra.mxu0 %v2305_v29  ;;  %v2367_v23 = vld [vmem:[%s2954_s1 + $0x298] sm:$0xff]   ;;  %v2371_v27 = vld [vmem:[%s2954_s1 + $0x2a0] sm:$0xff]   ;;  %v2372_v28 = vld [vmem:[%s2954_s1 + $0x268] sm:$0xff]  }
  0x24   : > { %2113 = vmatprep.subr.bf16.mxu0 %v2311_v34  ;;  %v2373_v29 = vld [vmem:[%s2954_s1 + $0x228] sm:$0xff]   ;;  %v2376_v32 = vld [vmem:[%s2954_s1 + $0x270] sm:$0xff]   ;;  %v2380_v36 = vld [vmem:[%s2954_s1 + $0x278] sm:$0xff]  }
  0x25   : > { %2106 = vmatpush3.bf16.msra.mxu1 %v2310_v33  ;;  %v2374_v30 = vld [vmem:[%s2954_s1 + $0x2e8] sm:$0xff]   ;;  %v2377_v33 = vld [vmem:[%s2954_s1 + $0x230] sm:$0xff]  }
  0x26   : > { %1478 = vmatmul.mubr.bf16.vlgmr.msra.gmra.mrb[0].mxu0 %v2307_v31  ;;  %2135 = vmatprep.subr.bf16.mxu1 %v2316_v38  ;;  %v2375_v31 = vld [vmem:[%s2954_s1 + $0x2a8] sm:$0xff]   ;;  %v2378_v34 = vld [vmem:[%s2954_s1 + $0x2f0] sm:$0xff]   ;;  %v2382_v38 = vld [vmem:[%s2954_s1 + $0x2f8] sm:$0xff]  }
  0x27   : > { %2114 = vmatpush3.bf16.msra.mxu0 %v2315_v37  ;;  %1559 = vmatprep.mubr.bf16.mxu0 %v2347_v4  ;;  %v2381_v37 = vld [vmem:[%s2954_s1 + $0x238] sm:$0xff]   ;;  %v2414_v4 = vld [vmem:[%s2954_s1 + $0x370] sm:$0xff]  }
  0x28   : > { %1519 = vmatmul.mubr.bf16.vlgmr.msra.gmra.mrb[0].mxu1 %v2312_v35  ;;  %2115 = vmatprep.subr.bf16.mxu0 %v2318_v40  ;;  %v2379_v35 = vld [vmem:[%s2954_s1 + $0x2b0] sm:$0xff]   ;;  %v2385_v40 = vld [vmem:[%s2578_s13 + $0x24] ss:$72 sps:$4 sm:$0xff]  }
  0x29   : > { %2136 = vmatpush3.bf16.msra.mxu1 %v2317_v39  ;;  %1600 = vmatprep.mubr.bf16.mxu1 %v2352_v8  ;;  %v2383_v39 = vld [vmem:[%s2578_s13 + $0x20] ss:$72 sps:$4 sm:$0xff]   ;;  %v2418_v8 = vld [vmem:[%s2954_s1 + $0x378] sm:$0xff]  }
  0x2a   : > { %2137 = vmatprep.subr.bf16.mxu1 %v2320_v42  ;;  %v2387_v42 = vld [vmem:[%s2954_s1 + $0x340] sm:$0xff]  }
  0x2b   : > { %2116 = vmatpush3.bf16.msra.mxu0 %v2319_v41  ;;  %v2386_v41 = vld [vmem:[%s2954_s1 + $0x2b8] sm:$0xff]  }
  0x2c   : > { %2117 = vmatprep.subr.bf16.mxu0 %v2322_v44  ;;  %v2390_v44 = vld [vmem:[%s2578_s13 + $0x2c] ss:$72 sps:$4 sm:$0xff]  }
  0x2d   : > { %2138 = vmatpush3.bf16.msra.mxu1 %v2321_v43  ;;  %v2388_v43 = vld [vmem:[%s2578_s13 + $0x28] ss:$72 sps:$4 sm:$0xff]  }
  0x2e   : > { %2139 = vmatprep.subr.bf16.mxu1 %v2324_v46  ;;  %v2392_v46 = vld [vmem:[%s2954_s1 + $0x3c0] sm:$0xff]  }
  0x2f   : > { %2118 = vmatpush3.bf16.msra.mxu0 %v2323_v45  ;;  %v2391_v45 = vld [vmem:[%s2954_s1 + $0x300] sm:$0xff]  }
  0x30   : > { %2119 = vmatprep.subr.bf16.mxu0 %v2326_v48  ;;  %v2394_v48 = vld [vmem:[%s2954_s1 + $0x348] sm:$0xff]  }
  0x31   : > { %2140 = vmatpush3.bf16.msra.mxu1 %v2325_v47  ;;  %v2393_v47 = vld [vmem:[%s2954_s1 + $0x380] sm:$0xff]  }
  0x32   : > { %2141 = vmatprep.subr.bf16.mxu1 %v2328_v50  ;;  %v2396_v50 = vld [vmem:[%s2954_s1 + $0x3c8] sm:$0xff]  }
  0x33   : > { %2120 = vmatpush3.bf16.msra.mxu0 %v2327_v49  ;;  %v2395_v49 = vld [vmem:[%s2954_s1 + $0x308] sm:$0xff]  }
  0x34   : > { %2121 = vmatprep.subr.bf16.mxu0 %v2330_v52  ;;  %v2398_v52 = vld [vmem:[%s2954_s1 + $0x350] sm:$0xff]  }
  0x35   : > { %2142 = vmatpush3.bf16.msra.mxu1 %v2329_v51  ;;  %v2397_v51 = vld [vmem:[%s2954_s1 + $0x388] sm:$0xff]  }
  0x36   : > { %2143 = vmatprep.subr.bf16.mxu1 %v2332_v54  ;;  %v2400_v54 = vld [vmem:[%s2954_s1 + $0x3d0] sm:$0xff]  }
  0x37   : > { %2122 = vmatpush3.bf16.msra.mxu0 %v2331_v53  ;;  %v2399_v53 = vld [vmem:[%s2954_s1 + $0x310] sm:$0xff]  }
  0x38   : > { %2123 = vmatprep.subr.bf16.mxu0 %v2334_v56  ;;  %v2402_v56 = vld [vmem:[%s2954_s1 + $0x358] sm:$0xff]  }
  0x39   : > { %2144 = vmatpush3.bf16.msra.mxu1 %v2333_v55  ;;  %v2401_v55 = vld [vmem:[%s2954_s1 + $0x390] sm:$0xff]  }
  0x3a   : > { %2145 = vmatprep.subr.bf16.mxu1 %v2336_v58  ;;  %v2404_v58 = vld [vmem:[%s2954_s1 + $0x3d8] sm:$0xff]  }
  0x3b   : > { %2124 = vmatpush3.bf16.msra.mxu0 %v2335_v57  ;;  %v2403_v57 = vld [vmem:[%s2954_s1 + $0x318] sm:$0xff]  }
  0x3c   : > { %2125 = vmatprep.subr.bf16.mxu0 %v2338_v60  ;;  %v2406_v60 = vld [vmem:[%s2954_s1 + $0x360] sm:$0xff]  }
  0x3d   : > { %2146 = vmatpush3.bf16.msra.mxu1 %v2337_v59  ;;  %v2405_v59 = vld [vmem:[%s2954_s1 + $0x398] sm:$0xff]  }
  0x3e   : > { %2147 = vmatprep.subr.bf16.mxu1 %v2340_v62  ;;  %v2408_v62 = vld [vmem:[%s2954_s1 + $0x3e0] sm:$0xff]  }
  0x3f   : > { %2126 = vmatpush3.bf16.msra.mxu0 %v2339_v61  ;;  %v2407_v61 = vld [vmem:[%s2954_s1 + $0x320] sm:$0xff]  }
  0x40   : > { %2127 = vmatprep.subr.bf16.mxu0 %v2342_v0  ;;  %v2410_v0 = vld [vmem:[%s2954_s1 + $0x368] sm:$0xff]  }
  0x41   : > { %2148 = vmatpush3.bf16.msra.mxu1 %v2341_v63  ;;  %v2409_v63 = vld [vmem:[%s2954_s1 + $0x3a0] sm:$0xff]  }
  0x42   : > { %2149 = vmatprep.subr.bf16.mxu1 %v2344_v2  ;;  %v2412_v2 = vld [vmem:[%s2954_s1 + $0x3e8] sm:$0xff]  }
  0x43   : > { %2128 = vmatpush3.bf16.msra.mxu0 %v2343_v1  ;;  %v2411_v1 = vld [vmem:[%s2954_s1 + $0x328] sm:$0xff]  }
  0x44   : > { %2157 = vmatprep.subr.bf16.mxu0 %v2349_v6  ;;  %v2416_v6 = vld [vmem:[%s2954_s1 + $0x3f0] sm:$0xff]  }
  0x45   : > { %2150 = vmatpush3.bf16.msra.mxu1 %v2348_v5  ;;  %v2415_v5 = vld [vmem:[%s2954_s1 + $0x330] sm:$0xff]  }
  0x46   : > { %1560 = vmatmul.mubr.bf16.vlgmr.msra.gmra.mrb[4].mxu0 %v2345_v3  ;;  %2179 = vmatprep.subr.bf16.mxu1 %v2354_v10  ;;  %v2413_v3 = vld [vmem:[%s2954_s1 + $0x3a8] sm:$0xff]   ;;  %v2420_v10 = vld [vmem:[%s2954_s1 + $0x3f8] sm:$0xff]  }
  0x47   : > { %2158 = vmatpush3.bf16.msra.mxu0 %v2353_v9  ;;  %1641 = vmatprep.mubr.bf16.mxu0 %v2385_v40  ;;  %v2419_v9 = vld [vmem:[%s2954_s1 + $0x338] sm:$0xff]  }
  0x48   : > { %1601 = vmatmul.mubr.bf16.vlgmr.msra.gmra.mrb[4].mxu1 %v2350_v7  ;;  %2159 = vmatprep.subr.bf16.mxu0 %v2356_v12  ;;  %v2417_v7 = vld [vmem:[%s2954_s1 + $0x3b0] sm:$0xff]  }
  0x49   : > { %2180 = vmatpush3.bf16.msra.mxu1 %v2355_v11  ;;  %1682 = vmatprep.mubr.bf16.mxu1 %v2390_v44  ;;  %v2421_v11 = vld [vmem:[%s2578_s13 + $0x30] ss:$72 sps:$4 sm:$0xff]   ;;  %v2423_v12 = vld [vmem:[%s2578_s13 + $0x34] ss:$72 sps:$4 sm:$0xff]  }
  0x4a   : > { %2181 = vmatprep.subr.bf16.mxu1 %v2358_v14  ;;  %v2425_v14 = vld [vmem:[%s2954_s1 + $0x440] sm:$0xff]  }
  0x4b   : > { %2160 = vmatpush3.bf16.msra.mxu0 %v2357_v13  ;;  %v2424_v13 = vld [vmem:[%s2954_s1 + $0x3b8] sm:$0xff]  }
  0x4c   : > { %2161 = vmatprep.subr.bf16.mxu0 %v2360_v16  ;;  %v2428_v16 = vld [vmem:[%s2578_s13 + $0x3c] ss:$72 sps:$4 sm:$0xff]  }
  0x4d   : > { %2182 = vmatpush3.bf16.msra.mxu1 %v2359_v15  ;;  %v2426_v15 = vld [vmem:[%s2578_s13 + $0x38] ss:$72 sps:$4 sm:$0xff]  }
  0x4e   : > { %2183 = vmatprep.subr.bf16.mxu1 %v2362_v18  ;;  %v2430_v18 = vld [vmem:[%s2954_s1 + $0x448] sm:$0xff]  }
  0x4f   : > { %2162 = vmatpush3.bf16.msra.mxu0 %v2361_v17  ;;  %v2429_v17 = vld [vmem:[%s2954_s1 + $0x400] sm:$0xff]  }
  0x50   : > { %2163 = vmatprep.subr.bf16.mxu0 %v2364_v20  ;;  %v2432_v20 = vld [vmem:[%s2954_s1 + $0x450] sm:$0xff]  }
  0x51   : > { %2184 = vmatpush3.bf16.msra.mxu1 %v2363_v19  ;;  %v2431_v19 = vld [vmem:[%s2954_s1 + $0x408] sm:$0xff]  }
  0x52   : > { %2185 = vmatprep.subr.bf16.mxu1 %v2366_v22  ;;  %v2434_v22 = vld [vmem:[%s2954_s1 + $0x458] sm:$0xff]  }
  0x53   : > { %2164 = vmatpush3.bf16.msra.mxu0 %v2365_v21  ;;  %v2433_v21 = vld [vmem:[%s2954_s1 + $0x410] sm:$0xff]  }
  0x54   : > { %2165 = vmatprep.subr.bf16.mxu0 %v2368_v24  ;;  %v2436_v24 = vld [vmem:[%s2954_s1 + $0x460] sm:$0xff]  }
  0x55   : > { %2186 = vmatpush3.bf16.msra.mxu1 %v2367_v23  ;;  %v2435_v23 = vld [vmem:[%s2954_s1 + $0x418] sm:$0xff]  }
  0x56   : > { %2187 = vmatprep.subr.bf16.mxu1 %v2370_v26  ;;  %v2438_v26 = vld [vmem:[%s2954_s1 + $0x468] sm:$0xff]  }
  0x57   : > { %2166 = vmatpush3.bf16.msra.mxu0 %v2369_v25  ;;  %v2437_v25 = vld [vmem:[%s2954_s1 + $0x420] sm:$0xff]  }
  0x58   : > { %2167 = vmatprep.subr.bf16.mxu0 %v2372_v28  ;;  %v2439_v28 = vld [vmem:[%s2954_s1 + $0x428] sm:$0xff]  }
  0x59   : > { %2188 = vmatpush3.bf16.msra.mxu1 %v2371_v27  ;;  %v2446_v27 = vld [vmem:[%s2578_s13 + $0x44] ss:$72 sps:$4 sm:$0xff]  }
  0x5a   : > { %2189 = vmatprep.subr.bf16.mxu1 %v2374_v30  ;;  %v2441_v30 = vld [vmem:[%s2954_s1 + $0x430] sm:$0xff]  }
  0x5b   : > { %2168 = vmatpush3.bf16.msra.mxu0 %v2373_v29  ;;  %v2440_v29 = vld [vmem:[%s2954_s1 + $0x470] sm:$0xff]  }
  0x5c   : > { %2169 = vmatprep.subr.bf16.mxu0 %v2376_v32  ;;  %v2443_v32 = vld [vmem:[%s2954_s1 + $0x438] sm:$0xff]  }
  0x5d   : > { %2190 = vmatpush3.bf16.msra.mxu1 %v2375_v31  ;;  %v2442_v31 = vld [vmem:[%s2954_s1 + $0x478] sm:$0xff]  }
  0x5e   : > { %2191 = vmatprep.subr.bf16.mxu1 %v2378_v34 }
  0x5f   : > { %2170 = vmatpush3.bf16.msra.mxu0 %v2377_v33  ;;  %v2444_v33 = vld [vmem:[%s2578_s13 + $0x40] ss:$72 sps:$4 sm:$0xff]   ;;  %s1894_s13 = sshll.u32 %s2958_s17, 2 }
  0x60   : > { %2171 = vmatprep.subr.bf16.mxu0 %v2380_v36  ;;  %s175_s20 = scalar_lea.vmem %s2956_s3, %s1894_s13 }
  0x61   : > { %2192 = vmatpush3.bf16.msra.mxu1 %v2379_v35  ;;  %v1895_v35 = vld [vmem:[%s2955_s2] ss:$0 sm:$0xff] }
  0x62   : > { %2193 = vmatprep.subr.bf16.mxu1 %v2382_v38 }
  0x63   : > { %2172 = vmatpush3.bf16.msra.mxu0 %v2381_v37 }
  0x64   : > { %2201 = vmatprep.subr.bf16.mxu0 %v2387_v42 }
  0x65   : > { %2194 = vmatpush3.bf16.msra.mxu1 %v2386_v41 }
  0x66   : > { %1642 = vmatmul.mubr.bf16.vlgmr.msra.gmra.mrb[8].mxu0 %v2383_v39  ;;  %2223 = vmatprep.subr.bf16.mxu1 %v2392_v46 }
  0x67   : > { %2202 = vmatpush3.bf16.msra.mxu0 %v2391_v45  ;;  %1723 = vmatprep.mubr.bf16.mxu0 %v2423_v12 }
  0x68   : > { %1683 = vmatmul.mubr.bf16.vlgmr.msra.gmra.mrb[8].mxu1 %v2388_v43  ;;  %2203 = vmatprep.subr.bf16.mxu0 %v2394_v48 }
  0x69   : > { %2224 = vmatpush3.bf16.msra.mxu1 %v2393_v47  ;;  %1764 = vmatprep.mubr.bf16.mxu1 %v2428_v16 }
  0x6a   : > { %2225 = vmatprep.subr.bf16.mxu1 %v2396_v50 }
  0x6b   : > { %2204 = vmatpush3.bf16.msra.mxu0 %v2395_v49 }
  0x6c   : > { %2205 = vmatprep.subr.bf16.mxu0 %v2398_v52 }
  0x6d   : > { %2226 = vmatpush3.bf16.msra.mxu1 %v2397_v51 }
  0x6e   : > { %2227 = vmatprep.subr.bf16.mxu1 %v2400_v54 }
  0x6f   : > { %2206 = vmatpush3.bf16.msra.mxu0 %v2399_v53 }
  0x70   : > { %2207 = vmatprep.subr.bf16.mxu0 %v2402_v56 }
  0x71   : > { %2228 = vmatpush3.bf16.msra.mxu1 %v2401_v55 }
  0x72   : > { %2229 = vmatprep.subr.bf16.mxu1 %v2404_v58 }
  0x73   : > { %2208 = vmatpush3.bf16.msra.mxu0 %v2403_v57 }
  0x74   : > { %2209 = vmatprep.subr.bf16.mxu0 %v2406_v60 }
  0x75   : > { %2230 = vmatpush3.bf16.msra.mxu1 %v2405_v59 }
  0x76   : > { %2231 = vmatprep.subr.bf16.mxu1 %v2408_v62 }
  0x77   : > { %2210 = vmatpush3.bf16.msra.mxu0 %v2407_v61 }
  0x78   : > { %2211 = vmatprep.subr.bf16.mxu0 %v2410_v0 }
  0x79   : > { %2232 = vmatpush3.bf16.msra.mxu1 %v2409_v63 }
  0x7a   : > { %2233 = vmatprep.subr.bf16.mxu1 %v2412_v2 }
  0x7b   : > { %2212 = vmatpush3.bf16.msra.mxu0 %v2411_v1 }
  0x7c   : > { %2213 = vmatprep.subr.bf16.mxu0 %v2414_v4 }
  0x7d   : > { %2234 = vmatpush3.bf16.msra.mxu1 %v2413_v3 }
  0x7e   : > { %2235 = vmatprep.subr.bf16.mxu1 %v2416_v6 }
  0x7f   : > { %2214 = vmatpush3.bf16.msra.mxu0 %v2415_v5 }
  0x80   : > { %2215 = vmatprep.subr.bf16.mxu0 %v2418_v8 }
  0x81   : > { %2236 = vmatpush3.bf16.msra.mxu1 %v2417_v7 }
  0x82   : > { %2237 = vmatprep.subr.bf16.mxu1 %v2420_v10 }
  0x83   : > { %2216 = vmatpush3.bf16.msra.mxu0 %v2419_v9 }
  0x84   : > { %2245 = vmatprep.subr.bf16.mxu0 %v2425_v14 }
  0x85   : > { %2238 = vmatpush3.bf16.msra.mxu1 %v2424_v13 }
  0x86   : > { %1724 = vmatmul.mubr.bf16.vlgmr.msra.gmra.mrb[12].mxu0 %v2421_v11 }
  0x87   : > { %2246 = vmatpush3.bf16.msra.mxu0 %v2429_v17  ;;  %1805 = vmatprep.mubr.bf16.mxu0 %v2446_v27 }
  0x88   : > { %1765 = vmatmul.mubr.bf16.vlgmr.msra.gmra.mrb[12].mxu1 %v2426_v15  ;;  %2247 = vmatprep.subr.bf16.mxu0 %v2430_v18 }
  0x8b   : > { %2248 = vmatpush3.bf16.msra.mxu0 %v2431_v19 }
  0x8c   : > { %2249 = vmatprep.subr.bf16.mxu0 %v2432_v20 }
  0x8f   : > { %2250 = vmatpush3.bf16.msra.mxu0 %v2433_v21 }
  0x90   : > { %2251 = vmatprep.subr.bf16.mxu0 %v2434_v22 }
  0x93   : > { %2252 = vmatpush3.bf16.msra.mxu0 %v2435_v23 }
  0x94   : > { %2253 = vmatprep.subr.bf16.mxu0 %v2436_v24 }
  0x97   : > { %2254 = vmatpush3.bf16.msra.mxu0 %v2437_v25 }
  0x98   : > { %2255 = vmatprep.subr.bf16.mxu0 %v2438_v26 }
  0x9b   : > { %2256 = vmatpush3.bf16.msra.mxu0 %v2439_v28 }
  0x9c   : > { %2257 = vmatprep.subr.bf16.mxu0 %v2440_v29 }
  0x9f   : > { %2258 = vmatpush3.bf16.msra.mxu0 %v2441_v30 }
  0xa0   : > { %2259 = vmatprep.subr.bf16.mxu0 %v2442_v31 }
  0xa3   : > { %2260 = vmatpush3.bf16.msra.mxu0 %v2443_v32 }
  0xa6   : > { %1806 = vmatmul.mubr.bf16.vlgmr.msra.gmra.mrb[16].mxu0 %v2444_v33 }
  0xf9   : > { %v2085_v34 = vpop.f32.mrb[0].mxu0 }
  0xfa   : > { %v2086_v36 = vpop.f32.mrb[1].mxu0 }
  0xfb   : > { %v2087_v37 = vadd.f32 %v2086_v36, %v2085_v34  ;;  %v2088_v38 = vpop.f32.mrb[2].mxu0  ;;  %v2107_v39 = vpop.f32.mrb[0].mxu1 }
  0xfc   : > { %v2089_v40 = vpop.f32.mrb[3].mxu0  ;;  %v2108_v43 = vpop.f32.mrb[1].mxu1 }
  0xfd   : > { %v1480_v41 = vadd.f32 %v2087_v37, %v1895_v35  ;;  %v2090_v42 = vadd.f32 %v2089_v40, %v2088_v38  ;;  %v2109_v44 = vadd.f32 %v2108_v43, %v2107_v39  ;;  %v2110_v45 = vpop.f32.mrb[2].mxu1 }
  0xfe   : > { %v2111_v47 = vpop.f32.mrb[3].mxu1 }
  0xff   : > { %v1483_v46 = vadd.f32 %v2090_v42, %v1895_v35  ;;  %v1521_v48 = vadd.f32 %v2109_v44, %v1480_v41  ;;  %v2112_v49 = vadd.f32 %v2111_v47, %v2110_v45 }
 0x101   : > { %v1524_v50 = vadd.f32 %v2112_v49, %v1483_v46 }
 0x119   : > { %v2129_v51 = vpop.f32.mrb[4].mxu0 }
 0x11a   : > { %v2130_v52 = vpop.f32.mrb[5].mxu0 }
 0x11b   : > { %v2131_v53 = vadd.f32 %v2130_v52, %v2129_v51  ;;  %v2132_v54 = vpop.f32.mrb[6].mxu0  ;;  %v2151_v57 = vpop.f32.mrb[4].mxu1 }
 0x11c   : > { %v2133_v55 = vpop.f32.mrb[7].mxu0  ;;  %v2152_v59 = vpop.f32.mrb[5].mxu1 }
 0x11d   : > { %v1562_v56 = vadd.f32 %v2131_v53, %v1521_v48  ;;  %v2134_v58 = vadd.f32 %v2133_v55, %v2132_v54  ;;  %v2153_v61 = vadd.f32 %v2152_v59, %v2151_v57  ;;  %v2154_v62 = vpop.f32.mrb[6].mxu1 }
 0x11e   : > { %v2155_v63 = vpop.f32.mrb[7].mxu1 }
 0x11f   : > { %v1565_v60 = vadd.f32 %v2134_v58, %v1524_v50  ;;  %v1603_v0 = vadd.f32 %v2153_v61, %v1562_v56  ;;  %v2156_v1 = vadd.f32 %v2155_v63, %v2154_v62 }
 0x121   : > { %v1606_v2 = vadd.f32 %v2156_v1, %v1565_v60 }
 0x139   : > { %v2173_v3 = vpop.f32.mrb[8].mxu0 }
 0x13a   : > { %v2174_v4 = vpop.f32.mrb[9].mxu0 }
 0x13b   : > { %v2175_v5 = vadd.f32 %v2174_v4, %v2173_v3  ;;  %v2176_v6 = vpop.f32.mrb[10].mxu0  ;;  %v2195_v7 = vpop.f32.mrb[8].mxu1 }
 0x13c   : > { %v2177_v8 = vpop.f32.mrb[11].mxu0  ;;  %v2196_v11 = vpop.f32.mrb[9].mxu1 }
 0x13d   : > { %v1644_v9 = vadd.f32 %v2175_v5, %v1603_v0  ;;  %v2178_v10 = vadd.f32 %v2177_v8, %v2176_v6  ;;  %v2197_v12 = vadd.f32 %v2196_v11, %v2195_v7  ;;  %v2198_v13 = vpop.f32.mrb[10].mxu1 }
 0x13e   : > { %v2199_v15 = vpop.f32.mrb[11].mxu1 }
 0x13f   : > { %v1647_v14 = vadd.f32 %v2178_v10, %v1606_v2  ;;  %v1685_v16 = vadd.f32 %v2197_v12, %v1644_v9  ;;  %v2200_v17 = vadd.f32 %v2199_v15, %v2198_v13 }
 0x141   : > { %v1688_v18 = vadd.f32 %v2200_v17, %v1647_v14 }
 0x159   : > { %v2217_v19 = vpop.f32.mrb[12].mxu0 }
 0x15a   : > { %v2218_v20 = vpop.f32.mrb[13].mxu0 }
 0x15b   : > { %v2219_v21 = vadd.f32 %v2218_v20, %v2217_v19  ;;  %v2220_v22 = vpop.f32.mrb[14].mxu0  ;;  %v2239_v23 = vpop.f32.mrb[12].mxu1 }
 0x15c   : > { %v2221_v24 = vpop.f32.mrb[15].mxu0  ;;  %v2240_v27 = vpop.f32.mrb[13].mxu1 }
 0x15d   : > { %v1726_v25 = vadd.f32 %v2219_v21, %v1685_v16  ;;  %v2222_v26 = vadd.f32 %v2221_v24, %v2220_v22  ;;  %v2241_v28 = vadd.f32 %v2240_v27, %v2239_v23  ;;  %v2242_v29 = vpop.f32.mrb[14].mxu1 }
 0x15e   : > { %v2243_v31 = vpop.f32.mrb[15].mxu1 }
 0x15f   : > { %v1729_v30 = vadd.f32 %v2222_v26, %v1688_v18  ;;  %v1767_v32 = vadd.f32 %v2241_v28, %v1726_v25  ;;  %v2244_v33 = vadd.f32 %v2243_v31, %v2242_v29 }
 0x161   : > { %v1770_v34 = vadd.f32 %v2244_v33, %v1729_v30 }
 0x179   : > { %v2261_v35 = vpop.f32.mrb[16].mxu0 }
 0x17a   : > { %v2262_v36 = vpop.f32.mrb[17].mxu0 }
 0x17b   : > { %v2263_v37 = vadd.f32 %v2262_v36, %v2261_v35  ;;  %v2264_v38 = vpop.f32.mrb[18].mxu0 }
 0x17c   : > { %v2265_v39 = vpop.f32.mrb[19].mxu0 }
 0x17d   : > { %v1808_v40 = vadd.f32 %v2263_v37, %v1767_v32  ;;  %v2266_v41 = vadd.f32 %v2265_v39, %v2264_v38 }
 0x17f   : > { %v1816_v42 = vmul.f32 0.1, %v1808_v40  ;;  %v1811_v43 = vadd.f32 %v2266_v41, %v1770_v34  ;;  %vm1814_vm0 = vcmp.ge.f32.partialorder %v1808_v40, 0.0 }
 0x181   : > { %vm1815_vm1 = vcmp.ge.f32.partialorder %v1811_v43, 0.0  ;;  %v1817_v44 = vmul.f32 0.1, %v1811_v43  ;;  %v1818_v45 = vsel %vm1814_vm0, %v1808_v40, %v1816_v42 }
 0x183   : > { %v1819_v46 = vsel %vm1815_vm1, %v1811_v43, %v1817_v44 }
 0x184   : > { %v2067_v47 = vpack.c.bf16 %v1819_v46, %v1818_v45 }
 0x186   : > { %2068 = vst [vmem:[%s175_s20] sm:$0xff] %v2067_v47  }
 0x187 PF: > { %s13_s12 = sadd.s32 1, %s2453_s12  }
 0x188   : > { %p10_p4 = scmp.ge.s32.totalorder %s13_s12, 4  }
 0x18a   :  { %12 = sbr.rel (!%p10_p4) target bundleno = 1 (0x1), region = 62 }

// kernel: optimized_cnn_forward.7
= control target key start
LH: loop header
LB: loop body
LE: loop exit
PB: predicated region body
PF: predicated region fallthrough
CT: control target
= control target key end

     0   :  { %s2620_s0 = inlined_call_operand.vmem [shape: bf16[8,1152], index: 0, kind: input, shape index: {}]   ;;  %s2621_s1 = inlined_call_operand.vmem [shape: bf16[1152,256], index: 1, kind: input, shape index: {}]   ;;  %s2622_s2 = inlined_call_operand.vmem [shape: f32[1,256], index: 2, kind: input, shape index: {}]   ;;  %s2623_s3 = inlined_call_operand.vmem [shape: bf16[256,128], index: 3, kind: input, shape index: {}]   ;;  %s2624_s4 = inlined_call_operand.vmem [shape: f32[1,128], index: 4, kind: input, shape index: {}]   ;;  %s2625_s5 = inlined_call_operand.vmem [shape: bf16[128,128], index: 5, kind: input, shape index: {}]   ;;  %s2626_s6 = inlined_call_operand.vmem [shape: f32[1,128], index: 6, kind: input, shape index: {}]   ;;  %s2627_s7 = inlined_call_operand.hbm [shape: f32[2,128], index: 7, kind: output, shape index: {}]  }
   0x1   :  { %v1742_v0 = vld [vmem:[%s2621_s1 + $0x4] ss:$8 sps:$4 sm:$0xff]   ;;  %v1746_v2 = vld [vmem:[%s2621_s1] ss:$8 sps:$4 sm:$0xff]   ;;  %v1748_v4 = vld [vmem:[%s2621_s1 + $0x14] ss:$8 sps:$4 sm:$0xff]  }
   0x2   :  { %v1744_v1 = vld [vmem:[%s2621_s1 + $0x204] ss:$8 sps:$4 sm:$0xff]   ;;  %941 = vmatprep.subr.bf16.mxu1 %v1742_v0  ;;  %v1747_v3 = vld [vmem:[%s2621_s1 + $0x200] ss:$8 sps:$4 sm:$0xff]   ;;  %v1750_v5 = vld [vmem:[%s2621_s1 + $0x214] ss:$8 sps:$4 sm:$0xff]  }
   0x3   :  { %1023 = vmatprep.subr.bf16.mxu0 %v1744_v1  ;;  %942 = vmatpush1.bf16.msra.mxu1 %v1746_v2  ;;  %v1752_v6 = vld [vmem:[%s2621_s1 + $0x10] ss:$8 sps:$4 sm:$0xff]   ;;  %v1754_v8 = vld [vmem:[%s2621_s1 + $0x24] ss:$8 sps:$4 sm:$0xff]   ;;  %v1758_v10 = vld [vmem:[%s2621_s1 + $0x20] ss:$8 sps:$4 sm:$0xff]  }
   0x4   :  { %1024 = vmatpush1.bf16.msra.mxu0 %v1747_v3  ;;  %943 = vmatprep.subr.bf16.mxu1 %v1748_v4  ;;  %v1753_v7 = vld [vmem:[%s2621_s1 + $0x210] ss:$8 sps:$4 sm:$0xff]   ;;  %v1756_v9 = vld [vmem:[%s2621_s1 + $0x224] ss:$8 sps:$4 sm:$0xff]   ;;  %v1759_v11 = vld [vmem:[%s2621_s1 + $0x220] ss:$8 sps:$4 sm:$0xff]  }
   0x5   :  { %1025 = vmatprep.subr.bf16.mxu0 %v1750_v5  ;;  %v1760_v12 = vld [vmem:[%s2621_s1 + $0x34] ss:$8 sps:$4 sm:$0xff]   ;;  %v1764_v14 = vld [vmem:[%s2621_s1 + $0x30] ss:$8 sps:$4 sm:$0xff]   ;;  %v1766_v16 = vld [vmem:[%s2621_s1 + $0x44] ss:$8 sps:$4 sm:$0xff]  }
   0x6   :  { %v1762_v13 = vld [vmem:[%s2621_s1 + $0x234] ss:$8 sps:$4 sm:$0xff]   ;;  %v1765_v15 = vld [vmem:[%s2621_s1 + $0x230] ss:$8 sps:$4 sm:$0xff]   ;;  %v1768_v17 = vld [vmem:[%s2621_s1 + $0x244] ss:$8 sps:$4 sm:$0xff]  }
   0x7   :  { %944 = vmatpush1.bf16.msra.mxu1 %v1752_v6  ;;  %v1770_v18 = vld [vmem:[%s2621_s1 + $0x40] ss:$8 sps:$4 sm:$0xff]   ;;  %v1772_v20 = vld [vmem:[%s2621_s1 + $0x54] ss:$8 sps:$4 sm:$0xff]   ;;  %v1776_v22 = vld [vmem:[%s2621_s1 + $0x50] ss:$8 sps:$4 sm:$0xff]  }
   0x8   :  { %1026 = vmatpush1.bf16.msra.mxu0 %v1753_v7  ;;  %945 = vmatprep.subr.bf16.mxu1 %v1754_v8  ;;  %v1771_v19 = vld [vmem:[%s2621_s1 + $0x240] ss:$8 sps:$4 sm:$0xff]   ;;  %v1774_v21 = vld [vmem:[%s2621_s1 + $0x254] ss:$8 sps:$4 sm:$0xff]   ;;  %v1777_v23 = vld [vmem:[%s2621_s1 + $0x250] ss:$8 sps:$4 sm:$0xff]  }
   0x9   :  { %1027 = vmatprep.subr.bf16.mxu0 %v1756_v9  ;;  %v1778_v24 = vld [vmem:[%s2621_s1 + $0x64] ss:$8 sps:$4 sm:$0xff]   ;;  %v1782_v26 = vld [vmem:[%s2621_s1 + $0x60] ss:$8 sps:$4 sm:$0xff]   ;;  %v1784_v28 = vld [vmem:[%s2621_s1 + $0x74] ss:$8 sps:$4 sm:$0xff]  }
   0xa   :  { %v1780_v25 = vld [vmem:[%s2621_s1 + $0x264] ss:$8 sps:$4 sm:$0xff]   ;;  %v1783_v27 = vld [vmem:[%s2621_s1 + $0x260] ss:$8 sps:$4 sm:$0xff]   ;;  %v1786_v29 = vld [vmem:[%s2621_s1 + $0x274] ss:$8 sps:$4 sm:$0xff]  }
   0xb   :  { %946 = vmatpush1.bf16.msra.mxu1 %v1758_v10  ;;  %v1788_v30 = vld [vmem:[%s2621_s1 + $0x70] ss:$8 sps:$4 sm:$0xff]   ;;  %v1790_v32 = vld [vmem:[%s2621_s1 + $0x84] ss:$8 sps:$4 sm:$0xff]   ;;  %v1794_v34 = vld [vmem:[%s2621_s1 + $0x80] ss:$8 sps:$4 sm:$0xff]  }
   0xc   :  { %1028 = vmatpush1.bf16.msra.mxu0 %v1759_v11  ;;  %947 = vmatprep.subr.bf16.mxu1 %v1760_v12  ;;  %v1789_v31 = vld [vmem:[%s2621_s1 + $0x270] ss:$8 sps:$4 sm:$0xff]   ;;  %v1792_v33 = vld [vmem:[%s2621_s1 + $0x284] ss:$8 sps:$4 sm:$0xff]   ;;  %v1795_v35 = vld [vmem:[%s2621_s1 + $0x280] ss:$8 sps:$4 sm:$0xff]  }
   0xd   :  { %1029 = vmatprep.subr.bf16.mxu0 %v1762_v13  ;;  %v1796_v36 = vld [vmem:[%s2621_s1 + $0x94] ss:$8 sps:$4 sm:$0xff]   ;;  %v1800_v38 = vld [vmem:[%s2621_s1 + $0x90] ss:$8 sps:$4 sm:$0xff]   ;;  %v1802_v40 = vld [vmem:[%s2621_s1 + $0xa4] ss:$8 sps:$4 sm:$0xff]  }
   0xe   :  { %v1798_v37 = vld [vmem:[%s2621_s1 + $0x294] ss:$8 sps:$4 sm:$0xff]   ;;  %v1801_v39 = vld [vmem:[%s2621_s1 + $0x290] ss:$8 sps:$4 sm:$0xff]   ;;  %v1804_v41 = vld [vmem:[%s2621_s1 + $0x2a4] ss:$8 sps:$4 sm:$0xff]  }
   0xf   :  { %948 = vmatpush1.bf16.msra.mxu1 %v1764_v14  ;;  %v1806_v42 = vld [vmem:[%s2621_s1 + $0xa0] ss:$8 sps:$4 sm:$0xff]   ;;  %v1808_v44 = vld [vmem:[%s2621_s1 + $0xb4] ss:$8 sps:$4 sm:$0xff]   ;;  %v1812_v47 = vld [vmem:[%s2621_s1 + $0xb0] ss:$8 sps:$4 sm:$0xff]  }
  0x10   :  { %1030 = vmatpush1.bf16.msra.mxu0 %v1765_v15  ;;  %949 = vmatprep.subr.bf16.mxu1 %v1766_v16  ;;  %v1807_v43 = vld [vmem:[%s2621_s1 + $0x2a0] ss:$8 sps:$4 sm:$0xff]   ;;  %v1810_v45 = vld [vmem:[%s2621_s1 + $0x2b4] ss:$8 sps:$4 sm:$0xff]   ;;  %v1813_v49 = vld [vmem:[%s2621_s1 + $0x2b0] ss:$8 sps:$4 sm:$0xff]  }
  0x11   :  { %1031 = vmatprep.subr.bf16.mxu0 %v1768_v17  ;;  %v28_v46 = vld [vmem:[%s2620_s0] sm:$0xff]  ;;  %v30_v50 = vld [vmem:[%s2620_s0 + $0x10] sm:$0xff] }
  0x12   :  { %v1493_v48 = vcombine.high %v28_v46, %v28_v46  ;;  %v1814_v51 = vld [vmem:[%s2621_s1 + $0xc4] ss:$8 sps:$4 sm:$0xff]   ;;  %v1497_v53 = vcombine.high %v30_v50, %v30_v50  ;;  %v1818_v54 = vld [vmem:[%s2621_s1 + $0xc0] ss:$8 sps:$4 sm:$0xff]   ;;  %v1820_v56 = vld [vmem:[%s2621_s1 + $0xd4] ss:$8 sps:$4 sm:$0xff]   ;;  %v1492_v6 = vcombine.low %v28_v46, %v28_v46  ;;  %v1496_v7 = vcombine.low %v30_v50, %v30_v50 }
  0x13   :  { %950 = vmatpush1.bf16.msra.mxu1 %v1770_v18  ;;  %v1816_v52 = vld [vmem:[%s2621_s1 + $0x2c4] ss:$8 sps:$4 sm:$0xff]   ;;  %v1819_v55 = vld [vmem:[%s2621_s1 + $0x2c0] ss:$8 sps:$4 sm:$0xff]   ;;  %v1822_v57 = vld [vmem:[%s2621_s1 + $0x2d4] ss:$8 sps:$4 sm:$0xff]  }
  0x14   :  { %1032 = vmatpush1.bf16.msra.mxu0 %v1771_v19  ;;  %951 = vmatprep.subr.bf16.mxu1 %v1772_v20  ;;  %v1824_v58 = vld [vmem:[%s2621_s1 + $0xd0] ss:$8 sps:$4 sm:$0xff]   ;;  %v1826_v60 = vld [vmem:[%s2621_s1 + $0xe4] ss:$8 sps:$4 sm:$0xff]   ;;  %v1830_v62 = vld [vmem:[%s2621_s1 + $0xe0] ss:$8 sps:$4 sm:$0xff]  }
  0x15   :  { %1033 = vmatprep.subr.bf16.mxu0 %v1774_v21  ;;  %973 = vmatprep.mubr.bf16.mxu1 %v1493_v48  ;;  %v1825_v59 = vld [vmem:[%s2621_s1 + $0x2d0] ss:$8 sps:$4 sm:$0xff]   ;;  %v1828_v61 = vld [vmem:[%s2621_s1 + $0x2e4] ss:$8 sps:$4 sm:$0xff]   ;;  %v1831_v63 = vld [vmem:[%s2621_s1 + $0x2e0] ss:$8 sps:$4 sm:$0xff]  }
  0x16   :  { %1055 = vmatprep.mubr.bf16.mxu0 %v1497_v53  ;;  %v1832_v0 = vld [vmem:[%s2621_s1 + $0xf4] ss:$8 sps:$4 sm:$0xff]   ;;  %v1836_v2 = vld [vmem:[%s2621_s1 + $0xf0] ss:$8 sps:$4 sm:$0xff]   ;;  %v1842_v4 = vld [vmem:[%s2621_s1 + $0x104] ss:$8 sps:$4 sm:$0xff]  }
  0x17   :  { %952 = vmatpush1.bf16.msra.mxu1 %v1776_v22  ;;  %v1834_v1 = vld [vmem:[%s2621_s1 + $0x2f4] ss:$8 sps:$4 sm:$0xff]   ;;  %v1837_v3 = vld [vmem:[%s2621_s1 + $0x2f0] ss:$8 sps:$4 sm:$0xff]   ;;  %v1847_v5 = vld [vmem:[%s2621_s1 + $0x304] ss:$8 sps:$4 sm:$0xff]  }
  0x18   :  { %1034 = vmatpush1.bf16.msra.mxu0 %v1777_v23  ;;  %953 = vmatprep.subr.bf16.mxu1 %v1778_v24  ;;  %v1840_v8 = vld [vmem:[%s2621_s1 + $0x100] ss:$8 sps:$4 sm:$0xff]   ;;  %v1850_v10 = vld [vmem:[%s2621_s1 + $0x114] ss:$8 sps:$4 sm:$0xff]   ;;  %v1848_v12 = vld [vmem:[%s2621_s1 + $0x110] ss:$8 sps:$4 sm:$0xff]  }
  0x19   :  { %1035 = vmatprep.subr.bf16.mxu0 %v1780_v25  ;;  %v1845_v9 = vld [vmem:[%s2621_s1 + $0x300] ss:$8 sps:$4 sm:$0xff]   ;;  %v1853_v11 = vld [vmem:[%s2621_s1 + $0x314] ss:$8 sps:$4 sm:$0xff]   ;;  %v1851_v13 = vld [vmem:[%s2621_s1 + $0x310] ss:$8 sps:$4 sm:$0xff]  }
  0x1a   :  { %v1856_v14 = vld [vmem:[%s2621_s1 + $0x124] ss:$8 sps:$4 sm:$0xff]   ;;  %v1854_v16 = vld [vmem:[%s2621_s1 + $0x120] ss:$8 sps:$4 sm:$0xff]   ;;  %v1862_v18 = vld [vmem:[%s2621_s1 + $0x134] ss:$8 sps:$4 sm:$0xff]  }
  0x1b   :  { %954 = vmatpush1.bf16.msra.mxu1 %v1782_v26  ;;  %v1859_v15 = vld [vmem:[%s2621_s1 + $0x324] ss:$8 sps:$4 sm:$0xff]   ;;  %v1857_v17 = vld [vmem:[%s2621_s1 + $0x320] ss:$8 sps:$4 sm:$0xff]   ;;  %v1865_v19 = vld [vmem:[%s2621_s1 + $0x334] ss:$8 sps:$4 sm:$0xff]  }
  0x1c   :  { %1036 = vmatpush1.bf16.msra.mxu0 %v1783_v27  ;;  %955 = vmatprep.subr.bf16.mxu1 %v1784_v28  ;;  %v1860_v20 = vld [vmem:[%s2621_s1 + $0x130] ss:$8 sps:$4 sm:$0xff]   ;;  %v1868_v22 = vld [vmem:[%s2621_s1 + $0x144] ss:$8 sps:$4 sm:$0xff]   ;;  %v1866_v24 = vld [vmem:[%s2621_s1 + $0x140] ss:$8 sps:$4 sm:$0xff]  }
  0x1d   :  { %1037 = vmatprep.subr.bf16.mxu0 %v1786_v29  ;;  %v1863_v21 = vld [vmem:[%s2621_s1 + $0x330] ss:$8 sps:$4 sm:$0xff]   ;;  %v1871_v23 = vld [vmem:[%s2621_s1 + $0x344] ss:$8 sps:$4 sm:$0xff]   ;;  %v1869_v25 = vld [vmem:[%s2621_s1 + $0x340] ss:$8 sps:$4 sm:$0xff]  }
  0x1e   :  { %v1874_v26 = vld [vmem:[%s2621_s1 + $0x154] ss:$8 sps:$4 sm:$0xff]   ;;  %v1872_v28 = vld [vmem:[%s2621_s1 + $0x150] ss:$8 sps:$4 sm:$0xff]   ;;  %v1904_v50 = vld [vmem:[%s2621_s1 + $0x1a4] ss:$8 sps:$4 sm:$0xff]  }
  0x1f   :  { %956 = vmatpush1.bf16.msra.mxu1 %v1788_v30  ;;  %v1877_v27 = vld [vmem:[%s2621_s1 + $0x354] ss:$8 sps:$4 sm:$0xff]   ;;  %v1875_v29 = vld [vmem:[%s2621_s1 + $0x350] ss:$8 sps:$4 sm:$0xff]   ;;  %v1880_v30 = vld [vmem:[%s2621_s1 + $0x164] ss:$8 sps:$4 sm:$0xff]  }
  0x20   :  { %1038 = vmatpush1.bf16.msra.mxu0 %v1789_v31  ;;  %957 = vmatprep.subr.bf16.mxu1 %v1790_v32  ;;  %v1883_v31 = vld [vmem:[%s2621_s1 + $0x364] ss:$8 sps:$4 sm:$0xff]   ;;  %v1898_v46 = vld [vmem:[%s2621_s1 + $0x194] ss:$8 sps:$4 sm:$0xff]   ;;  %v1896_v48 = vld [vmem:[%s2621_s1 + $0x190] ss:$8 sps:$4 sm:$0xff]  }
  0x21   :  { %1039 = vmatprep.subr.bf16.mxu0 %v1792_v33  ;;  %v2338_v32 = vld [vmem:[%s2620_s0 + $0x8] sm:$0xff]  ;;  %v2343_v33 = vld [vmem:[%s2620_s0 + $0x18] sm:$0xff] }
  0x22   :  { %v1905_v53 = vld [vmem:[%s2621_s1 + $0x3a0] ss:$8 sps:$4 sm:$0xff]  }
  0x23   :  { %958 = vmatpush1.bf16.msra.mxu1 %v1794_v34  ;;  %v1878_v34 = vld [vmem:[%s2621_s1 + $0x160] ss:$8 sps:$4 sm:$0xff]  }
  0x24   :  { %1040 = vmatpush1.bf16.msra.mxu0 %v1795_v35  ;;  %959 = vmatprep.subr.bf16.mxu1 %v1796_v36  ;;  %v1881_v35 = vld [vmem:[%s2621_s1 + $0x360] ss:$8 sps:$4 sm:$0xff]   ;;  %v1495_v36 = vcombine.high %v2338_v32, %v2338_v32 }
  0x25   :  { %1041 = vmatprep.subr.bf16.mxu0 %v1798_v37  ;;  %v1499_v37 = vcombine.high %v2343_v33, %v2343_v33 }
  0x27   :  { %960 = vmatpush1.bf16.msra.mxu1 %v1800_v38  ;;  %v1886_v38 = vld [vmem:[%s2621_s1 + $0x174] ss:$8 sps:$4 sm:$0xff]  }
  0x28   :  { %1042 = vmatpush1.bf16.msra.mxu0 %v1801_v39  ;;  %961 = vmatprep.subr.bf16.mxu1 %v1802_v40  ;;  %v1889_v39 = vld [vmem:[%s2621_s1 + $0x374] ss:$8 sps:$4 sm:$0xff]   ;;  %v1884_v40 = vld [vmem:[%s2621_s1 + $0x170] ss:$8 sps:$4 sm:$0xff]  }
  0x29   :  { %1043 = vmatprep.subr.bf16.mxu0 %v1804_v41  ;;  %v1887_v41 = vld [vmem:[%s2621_s1 + $0x370] ss:$8 sps:$4 sm:$0xff]  }
  0x2b   :  { %962 = vmatpush1.bf16.msra.mxu1 %v1806_v42  ;;  %v1892_v42 = vld [vmem:[%s2621_s1 + $0x184] ss:$8 sps:$4 sm:$0xff]  }
  0x2c   :  { %1044 = vmatpush1.bf16.msra.mxu0 %v1807_v43  ;;  %963 = vmatprep.subr.bf16.mxu1 %v1808_v44  ;;  %v1895_v43 = vld [vmem:[%s2621_s1 + $0x384] ss:$8 sps:$4 sm:$0xff]   ;;  %v1890_v44 = vld [vmem:[%s2621_s1 + $0x180] ss:$8 sps:$4 sm:$0xff]  }
  0x2d   :  { %1045 = vmatprep.subr.bf16.mxu0 %v1810_v45  ;;  %v1893_v45 = vld [vmem:[%s2621_s1 + $0x380] ss:$8 sps:$4 sm:$0xff]  }
  0x2f   :  { %964 = vmatpush1.bf16.msra.mxu1 %v1812_v47  ;;  %v1901_v47 = vld [vmem:[%s2621_s1 + $0x394] ss:$8 sps:$4 sm:$0xff]  }
  0x30   :  { %1046 = vmatpush1.bf16.msra.mxu0 %v1813_v49  ;;  %965 = vmatprep.subr.bf16.mxu1 %v1814_v51  ;;  %v1899_v49 = vld [vmem:[%s2621_s1 + $0x390] ss:$8 sps:$4 sm:$0xff]   ;;  %v1907_v51 = vld [vmem:[%s2621_s1 + $0x3a4] ss:$8 sps:$4 sm:$0xff]  }
  0x31   :  { %1047 = vmatprep.subr.bf16.mxu0 %v1816_v52  ;;  %v1902_v52 = vld [vmem:[%s2621_s1 + $0x1a0] ss:$8 sps:$4 sm:$0xff]  }
  0x33   :  { %966 = vmatpush1.bf16.msra.mxu1 %v1818_v54  ;;  %v1910_v54 = vld [vmem:[%s2621_s1 + $0x1b4] ss:$8 sps:$4 sm:$0xff]  }
  0x34   :  { %1048 = vmatpush1.bf16.msra.mxu0 %v1819_v55  ;;  %967 = vmatprep.subr.bf16.mxu1 %v1820_v56  ;;  %v1913_v55 = vld [vmem:[%s2621_s1 + $0x3b4] ss:$8 sps:$4 sm:$0xff]   ;;  %v1908_v56 = vld [vmem:[%s2621_s1 + $0x1b0] ss:$8 sps:$4 sm:$0xff]  }
  0x35   :  { %1049 = vmatprep.subr.bf16.mxu0 %v1822_v57  ;;  %v1911_v57 = vld [vmem:[%s2621_s1 + $0x3b0] ss:$8 sps:$4 sm:$0xff]  }
  0x37   :  { %968 = vmatpush1.bf16.msra.mxu1 %v1824_v58  ;;  %v1916_v58 = vld [vmem:[%s2621_s1 + $0x1c4] ss:$8 sps:$4 sm:$0xff]  }
  0x38   :  { %1050 = vmatpush1.bf16.msra.mxu0 %v1825_v59  ;;  %969 = vmatprep.subr.bf16.mxu1 %v1826_v60  ;;  %v1919_v59 = vld [vmem:[%s2621_s1 + $0x3c4] ss:$8 sps:$4 sm:$0xff]   ;;  %v1914_v60 = vld [vmem:[%s2621_s1 + $0x1c0] ss:$8 sps:$4 sm:$0xff]  }
  0x39   :  { %1051 = vmatprep.subr.bf16.mxu0 %v1828_v61  ;;  %v1917_v61 = vld [vmem:[%s2621_s1 + $0x3c0] ss:$8 sps:$4 sm:$0xff]  }
  0x3b   :  { %970 = vmatpush1.bf16.msra.mxu1 %v1830_v62  ;;  %v1922_v62 = vld [vmem:[%s2621_s1 + $0x1d4] ss:$8 sps:$4 sm:$0xff]  }
  0x3c   :  { %1052 = vmatpush1.bf16.msra.mxu0 %v1831_v63  ;;  %971 = vmatprep.subr.bf16.mxu1 %v1832_v0  ;;  %v1925_v63 = vld [vmem:[%s2621_s1 + $0x3d4] ss:$8 sps:$4 sm:$0xff]  }
  0x3d   :  { %1053 = vmatprep.subr.bf16.mxu0 %v1834_v1 }
  0x3f   :  { %972 = vmatpush1.bf16.msra.mxu1 %v1836_v2 }
  0x40   :  { %1054 = vmatpush1.bf16.msra.mxu0 %v1837_v3  ;;  %982 = vmatprep.subr.bf16.mxu1 %v1842_v4 }
  0x41   :  { %1064 = vmatprep.subr.bf16.mxu0 %v1847_v5 }
  0x42   :  { %974 = vmatmul.mubr.bf16.vlgmr.msra.gmra.mrb[0].mxu1 %v1492_v6 }
  0x43   :  { %1056 = vmatmul.mubr.bf16.vlgmr.msra.gmra.mrb[0].mxu0 %v1496_v7  ;;  %983 = vmatpush1.bf16.msra.mxu1 %v1840_v8 }
  0x44   :  { %1065 = vmatpush1.bf16.msra.mxu0 %v1845_v9  ;;  %984 = vmatprep.subr.bf16.mxu1 %v1850_v10 }
  0x45   :  { %1066 = vmatprep.subr.bf16.mxu0 %v1853_v11  ;;  %1014 = vmatprep.mubr.bf16.mxu1 %v1495_v36 }
  0x46   :  { %1096 = vmatprep.mubr.bf16.mxu0 %v1499_v37 }
  0x47   :  { %985 = vmatpush1.bf16.msra.mxu1 %v1848_v12 }
  0x48   :  { %1067 = vmatpush1.bf16.msra.mxu0 %v1851_v13  ;;  %986 = vmatprep.subr.bf16.mxu1 %v1856_v14 }
  0x49   :  { %1068 = vmatprep.subr.bf16.mxu0 %v1859_v15 }
  0x4b   :  { %987 = vmatpush1.bf16.msra.mxu1 %v1854_v16 }
  0x4c   :  { %1069 = vmatpush1.bf16.msra.mxu0 %v1857_v17  ;;  %988 = vmatprep.subr.bf16.mxu1 %v1862_v18 }
  0x4d   :  { %1070 = vmatprep.subr.bf16.mxu0 %v1865_v19 }
  0x4f   :  { %989 = vmatpush1.bf16.msra.mxu1 %v1860_v20 }
  0x50   :  { %1071 = vmatpush1.bf16.msra.mxu0 %v1863_v21  ;;  %990 = vmatprep.subr.bf16.mxu1 %v1868_v22 }
  0x51   :  { %1072 = vmatprep.subr.bf16.mxu0 %v1871_v23 }
  0x53   :  { %991 = vmatpush1.bf16.msra.mxu1 %v1866_v24 }
  0x54   :  { %1073 = vmatpush1.bf16.msra.mxu0 %v1869_v25  ;;  %992 = vmatprep.subr.bf16.mxu1 %v1874_v26 }
  0x55   :  { %1074 = vmatprep.subr.bf16.mxu0 %v1877_v27 }
  0x57   :  { %993 = vmatpush1.bf16.msra.mxu1 %v1872_v28 }
  0x58   :  { %1075 = vmatpush1.bf16.msra.mxu0 %v1875_v29  ;;  %994 = vmatprep.subr.bf16.mxu1 %v1880_v30 }
  0x59   :  { %1076 = vmatprep.subr.bf16.mxu0 %v1883_v31 }
  0x5b   :  { %995 = vmatpush1.bf16.msra.mxu1 %v1878_v34 }
  0x5c   :  { %1077 = vmatpush1.bf16.msra.mxu0 %v1881_v35  ;;  %996 = vmatprep.subr.bf16.mxu1 %v1886_v38 }
  0x5d   :  { %1078 = vmatprep.subr.bf16.mxu0 %v1889_v39 }
  0x5f   :  { %997 = vmatpush1.bf16.msra.mxu1 %v1884_v40 }
  0x60   :  { %1079 = vmatpush1.bf16.msra.mxu0 %v1887_v41  ;;  %998 = vmatprep.subr.bf16.mxu1 %v1892_v42 }
  0x61   :  { %1080 = vmatprep.subr.bf16.mxu0 %v1895_v43 }
  0x63   :  { %999 = vmatpush1.bf16.msra.mxu1 %v1890_v44 }
  0x64   :  { %1081 = vmatpush1.bf16.msra.mxu0 %v1893_v45  ;;  %1000 = vmatprep.subr.bf16.mxu1 %v1898_v46 }
  0x65   :  { %1082 = vmatprep.subr.bf16.mxu0 %v1901_v47 }
  0x67   :  { %1001 = vmatpush1.bf16.msra.mxu1 %v1896_v48 }
  0x68   :  { %1083 = vmatpush1.bf16.msra.mxu0 %v1899_v49  ;;  %1002 = vmatprep.subr.bf16.mxu1 %v1904_v50 }
  0x69   :  { %1084 = vmatprep.subr.bf16.mxu0 %v1907_v51 }
  0x6b   :  { %1003 = vmatpush1.bf16.msra.mxu1 %v1902_v52 }
  0x6c   :  { %1085 = vmatpush1.bf16.msra.mxu0 %v1905_v53  ;;  %1004 = vmatprep.subr.bf16.mxu1 %v1910_v54 }
  0x6d   :  { %1086 = vmatprep.subr.bf16.mxu0 %v1913_v55 }
  0x6f   :  { %1005 = vmatpush1.bf16.msra.mxu1 %v1908_v56 }
  0x70   :  { %1087 = vmatpush1.bf16.msra.mxu0 %v1911_v57  ;;  %1006 = vmatprep.subr.bf16.mxu1 %v1916_v58 }
  0x71   :  { %1088 = vmatprep.subr.bf16.mxu0 %v1919_v59 }
  0x72   :  { %12 = vsyncpa [#allocation3], 0  ;;  %v1920_v0 = vld [vmem:[%s2621_s1 + $0x1d0] ss:$8 sps:$4 sm:$0xff]   ;;  %v1928_v2 = vld [vmem:[%s2621_s1 + $0x1e4] ss:$8 sps:$4 sm:$0xff]   ;;  %v1494_v11 = vcombine.low %v2338_v32, %v2338_v32  ;;  %v1498_v12 = vcombine.low %v2343_v33, %v2343_v33  ;;  %v179_v51 = vlaneseq }
  0x73   :  { %1007 = vmatpush1.bf16.msra.mxu1 %v1914_v60  ;;  %v1923_v1 = vld [vmem:[%s2621_s1 + $0x3d0] ss:$8 sps:$4 sm:$0xff]   ;;  %v1931_v3 = vld [vmem:[%s2621_s1 + $0x3e4] ss:$8 sps:$4 sm:$0xff]   ;;  %v1926_v4 = vld [vmem:[%s2621_s1 + $0x1e0] ss:$8 sps:$4 sm:$0xff]  }
  0x74   :  { %1089 = vmatpush1.bf16.msra.mxu0 %v1917_v61  ;;  %1008 = vmatprep.subr.bf16.mxu1 %v1922_v62  ;;  %v1929_v5 = vld [vmem:[%s2621_s1 + $0x3e0] ss:$8 sps:$4 sm:$0xff]   ;;  %v1934_v6 = vld [vmem:[%s2621_s1 + $0x1f4] ss:$8 sps:$4 sm:$0xff]   ;;  %v1932_v8 = vld [vmem:[%s2621_s1 + $0x1f0] ss:$8 sps:$4 sm:$0xff]  }
  0x75   :  { %1090 = vmatprep.subr.bf16.mxu0 %v1925_v63  ;;  %v1937_v7 = vld [vmem:[%s2621_s1 + $0x3f4] ss:$8 sps:$4 sm:$0xff]   ;;  %v1935_v9 = vld [vmem:[%s2621_s1 + $0x3f0] ss:$8 sps:$4 sm:$0xff]   ;;  %v1944_v10 = vld [vmem:[%s2621_s1 + $0x404] ss:$8 sps:$4 sm:$0xff]  }
  0x76   :  { %v1942_v13 = vld [vmem:[%s2621_s1 + $0x400] ss:$8 sps:$4 sm:$0xff]   ;;  %v1947_v14 = vld [vmem:[%s2621_s1 + $0x414] ss:$8 sps:$4 sm:$0xff]   ;;  %v1945_v15 = vld [vmem:[%s2621_s1 + $0x410] ss:$8 sps:$4 sm:$0xff]  }
  0x77   :  { %1009 = vmatpush1.bf16.msra.mxu1 %v1920_v0  ;;  %v2015_v16 = vmov 0   ;;  %v1950_v17 = vld [vmem:[%s2621_s1 + $0x424] ss:$8 sps:$4 sm:$0xff]   ;;  %v1948_v18 = vld [vmem:[%s2621_s1 + $0x420] ss:$8 sps:$4 sm:$0xff]   ;;  %v1971_v34 = vld [vmem:[%s2623_s3 + $0x50] sm:$0xff]  }
  0x78   :  { %1091 = vmatpush1.bf16.msra.mxu0 %v1923_v1  ;;  %1010 = vmatprep.subr.bf16.mxu1 %v1928_v2  ;;  %v1953_v19 = vld [vmem:[%s2621_s1 + $0x434] ss:$8 sps:$4 sm:$0xff]   ;;  %v1951_v20 = vld [vmem:[%s2621_s1 + $0x430] ss:$8 sps:$4 sm:$0xff]   ;;  %v1956_v21 = vld [vmem:[%s2621_s1 + $0x444] ss:$8 sps:$4 sm:$0xff]  }
  0x79   :  { %1092 = vmatprep.subr.bf16.mxu0 %v1931_v3  ;;  %v1954_v22 = vld [vmem:[%s2621_s1 + $0x440] ss:$8 sps:$4 sm:$0xff]   ;;  %v1959_v23 = vld [vmem:[%s2621_s1 + $0x454] ss:$8 sps:$4 sm:$0xff]   ;;  %v1957_v24 = vld [vmem:[%s2621_s1 + $0x450] ss:$8 sps:$4 sm:$0xff]  }
  0x7a   :  { %v1962_v25 = vld [vmem:[%s2621_s1 + $0x464] ss:$8 sps:$4 sm:$0xff]   ;;  %v1960_v26 = vld [vmem:[%s2621_s1 + $0x460] ss:$8 sps:$4 sm:$0xff]   ;;  %v1965_v27 = vld [vmem:[%s2621_s1 + $0x474] ss:$8 sps:$4 sm:$0xff]  }
  0x7b   :  { %1011 = vmatpush1.bf16.msra.mxu1 %v1926_v4  ;;  %v1963_v28 = vld [vmem:[%s2621_s1 + $0x470] ss:$8 sps:$4 sm:$0xff]   ;;  %v1966_v29 = vld [vmem:[%s2620_s0 + $0x20] ss:$0 sps:$4 sm:$0xff]   ;;  %v1969_v32 = vld [vmem:[%s2623_s3 + $0x48] sm:$0xff]   ;;  %v2016_v46 = vmov 0.0  }
  0x7c   :  { %1093 = vmatpush1.bf16.msra.mxu0 %v1929_v5  ;;  %1012 = vmatprep.subr.bf16.mxu1 %v1934_v6  ;;  %v1967_v30 = vld [vmem:[%s2623_s3 + $0x40] sm:$0xff]   ;;  %v1970_v33 = vld [vmem:[%s2623_s3 + $0x8] sm:$0xff]   ;;  %v1972_v35 = vld [vmem:[%s2623_s3 + $0x10] sm:$0xff]   ;;  %v180_v52 = vshrl.u32 %v179_v51, 7  ;;  %vm1152_vm1 = vcmask 1043456   ;;  %vm1167_vm2 = vcmask 1047556  }
  0x7d   :  { %1094 = vmatprep.subr.bf16.mxu0 %v1937_v7  ;;  %v1968_v31 = vld [vmem:[%s2623_s3] sm:$0xff]   ;;  %v1973_v36 = vld [vmem:[%s2623_s3 + $0x58] sm:$0xff]   ;;  %v1977_v40 = vld [vmem:[%s2623_s3 + $0x68] sm:$0xff]   ;;  %vm1182_vm4 = vcmask 1040384   ;;  %vm2017_vm5 = vmmov 0   ;;  %s2018_s24 = smov [#allocation2]  }
  0x7e   :  { %v1974_v37 = vld [vmem:[%s2623_s3 + $0x18] sm:$0xff]   ;;  %v1975_v38 = vld [vmem:[%s2623_s3 + $0x60] sm:$0xff]   ;;  %v1978_v41 = vld [vmem:[%s2623_s3 + $0x28] sm:$0xff]   ;;  %v181_v53 = vsub.s32 0, %v180_v52  ;;  %v185_v55 = vsub.s32 1, %v180_v52  ;;  %s1484_s25 = sshll.u32 %s2018_s24, 4  ;;  %s1485_s25 = int_to_ptr.vmem [resolvable:$true] %s1484_s25 }
  0x7f   :  { %1013 = vmatpush1.bf16.msra.mxu1 %v1932_v8  ;;  %v1976_v39 = vld [vmem:[%s2623_s3 + $0x20] sm:$0xff]   ;;  %v1979_v42 = vld [vmem:[%s2623_s3 + $0x70] sm:$0xff]   ;;  %v1981_v44 = vld [vmem:[%s2623_s3 + $0x78] sm:$0xff]   ;;  %p1996_p1 = scmp.lt.s32.totalorder %s1485_s25, %s1485_s25 }
  0x80   :  { %1095 = vmatpush1.bf16.msra.mxu0 %v1935_v9  ;;  %1671 = vmatprep.subr.bf16.mxu1 %v1967_v30  ;;  %v1980_v43 = vld [vmem:[%s2623_s3 + $0x30] sm:$0xff]   ;;  %v1982_v45 = vld [vmem:[%s2623_s3 + $0x38] sm:$0xff]   ;;  %v177_v54 = vld [vmem:[%s2622_s2] sm:$0x3] }
  0x81   :  { %1105 = vmatprep.subr.bf16.mxu0 %v1944_v10  ;;  %v182_v56 = vrot.slane %v177_v54, %v181_v53  ;;  %v186_v57 = vrot.slane %v177_v54, %v185_v55 }
  0x82   :  { %1015 = vmatmul.mubr.bf16.vlgmr.msra.gmra.mrb[0].mxu1 %v1494_v11 }
  0x83   :  { %1097 = vmatmul.mubr.bf16.vlgmr.msra.gmra.mrb[0].mxu0 %v1498_v12  ;;  %1672 = vmatpush3.bf16.msra.mxu1 %v1968_v31 }
  0x84   :  { %1106 = vmatpush1.bf16.msra.mxu0 %v1942_v13  ;;  %1137 = vmatprep.mubr.bf16.mxu0 %v2015_v16 }
  0x85   :  { %1107 = vmatprep.subr.bf16.mxu0 %v1947_v14  ;;  %1673 = vmatprep.subr.bf16.mxu1 %v1969_v32 }
  0x87   :  { %1674 = vmatpush3.bf16.msra.mxu1 %v1970_v33 }
  0x88   :  { %1108 = vmatpush1.bf16.msra.mxu0 %v1945_v15  ;;  %1675 = vmatprep.subr.bf16.mxu1 %v1971_v34 }
  0x89   :  { %1109 = vmatprep.subr.bf16.mxu0 %v1950_v17 }
  0x8b   :  { %1676 = vmatpush3.bf16.msra.mxu1 %v1972_v35 }
  0x8c   :  { %1110 = vmatpush1.bf16.msra.mxu0 %v1948_v18  ;;  %1677 = vmatprep.subr.bf16.mxu1 %v1973_v36 }
  0x8d   :  { %1111 = vmatprep.subr.bf16.mxu0 %v1953_v19 }
  0x8f   :  { %1678 = vmatpush3.bf16.msra.mxu1 %v1974_v37  ;;  %v1983_v37 = vld [vmem:[%s2625_s5] sm:$0xff]  }
  0x90   :  { %1112 = vmatpush1.bf16.msra.mxu0 %v1951_v20  ;;  %1679 = vmatprep.subr.bf16.mxu1 %v1975_v38 }
  0x91   :  { %1113 = vmatprep.subr.bf16.mxu0 %v1956_v21 }
  0x93   :  { %1680 = vmatpush3.bf16.msra.mxu1 %v1976_v39  ;;  %v1984_v39 = vld [vmem:[%s2625_s5 + $0x8] sm:$0xff]  }
  0x94   :  { %1114 = vmatpush1.bf16.msra.mxu0 %v1954_v22  ;;  %1681 = vmatprep.subr.bf16.mxu1 %v1977_v40  ;;  %v1985_v40 = vld [vmem:[%s2625_s5 + $0x10] sm:$0xff]  }
  0x95   :  { %1115 = vmatprep.subr.bf16.mxu0 %v1959_v23 }
  0x97   :  { %1682 = vmatpush3.bf16.msra.mxu1 %v1978_v41  ;;  %v1986_v41 = vld [vmem:[%s2625_s5 + $0x18] sm:$0xff]  }
  0x98   :  { %1116 = vmatpush1.bf16.msra.mxu0 %v1957_v24  ;;  %1683 = vmatprep.subr.bf16.mxu1 %v1979_v42  ;;  %v1987_v42 = vld [vmem:[%s2625_s5 + $0x20] sm:$0xff]  }
  0x99   :  { %1117 = vmatprep.subr.bf16.mxu0 %v1962_v25 }
  0x9b   :  { %1684 = vmatpush3.bf16.msra.mxu1 %v1980_v43  ;;  %v1988_v43 = vld [vmem:[%s2625_s5 + $0x28] sm:$0xff]  }
  0x9c   :  { %1118 = vmatpush1.bf16.msra.mxu0 %v1960_v26  ;;  %1685 = vmatprep.subr.bf16.mxu1 %v1981_v44  ;;  %v1989_v44 = vld [vmem:[%s2625_s5 + $0x30] sm:$0xff]  }
  0x9d   :  { %1119 = vmatprep.subr.bf16.mxu0 %v1965_v27 }
  0x9f   :  { %1686 = vmatpush3.bf16.msra.mxu1 %v1982_v45  ;;  %v1990_v45 = vld [vmem:[%s2625_s5 + $0x38] sm:$0xff]  }
  0xa0   :  { %1120 = vmatpush1.bf16.msra.mxu0 %v1963_v28  ;;  %1702 = vmatprep.subr.bf16.mxu1 %v2016_v46 }
  0xa3   :  { %1138 = vmatmul.mubr.bf16.vlgmr.msra.gmra.mrb[0].mxu0 %v1966_v29 }
 0x155   :  { %v1016_v47 = vpop.f32.mrb[0].mxu1 }
 0x156   :  { %v1018_v48 = vpop.f32.mrb[1].mxu1  ;;  %v1722_v58 = vadd.f32 %v1016_v47, %v182_v56 }
 0x157   :  { %v1020_v49 = vpop.f32.mrb[2].mxu1  ;;  %v1724_v59 = vadd.f32 %v1018_v48, %v186_v57  ;;  %v1645_v48 = vld [vmem:[%s2624_s4] ss:$0 sm:$0xff]  ;;  %s1991_s4 = scalar_lea.vmem %s1485_s25, 32 }
 0x158   :  { %v1021_v50 = vpop.f32.mrb[3].mxu1  ;;  %v1662_v57 = vld [vmem:[%s2626_s6] ss:$0 sm:$0xff]  ;;  %p1992_p0 = scmp.ne.s32.totalorder %s1485_s25, %s1991_s4  ;;  %p1997_p2 = scmp.lt.s32.totalorder %s1991_s4, %s1991_s4 }
 0x15a   :  { %p1998_p3 = por %p1997_p2, %p1996_p1 }
 0x15c   :  { %p1999_p4 = pnand %p1998_p3, %p1992_p0 }
 0x176   :  { %v1139_v60 = vpop.f32.mrb[0].mxu0 }
 0x177   :  { %v1723_v61 = vadd.f32 %v1722_v58, %v1139_v60  ;;  %v1141_v62 = vpop.f32.mrb[1].mxu0 }
 0x178   :  { %v1725_v63 = vadd.f32 %v1724_v59, %v1141_v62  ;;  %v1143_v0 = vpop.f32.mrb[2].mxu0 }
 0x179   :  { %vm1146_vm0 = vcmp.ge.f32.partialorder %v1723_v61, 0.0  ;;  %v1148_v1 = vmul.f32 0.1, %v1723_v61  ;;  %v1144_v2 = vpop.f32.mrb[3].mxu0 }
 0x17a   :  { %vm1147_vm3 = vcmp.ge.f32.partialorder %v1725_v63, 0.0  ;;  %v1149_v3 = vmul.f32 0.1, %v1725_v63 }
 0x17b   :  { %v1150_v4 = vsel %vm1146_vm0, %v1723_v61, %v1148_v1 }
 0x17c   :  { %v1153_v5 = vsel %vm1152_vm1, %v1150_v4, -inf  ;;  %v1168_v6 = vsel %vm1167_vm2, %v1150_v4, -inf  ;;  %v1151_v7 = vsel %vm1147_vm3, %v1725_v63, %v1149_v3 }
 0x17d   :  { %v1154_v8 = vrot.slane %v1153_v5, 4  ;;  %v1169_v9 = vrot.slane %v1168_v6, 4  ;;  %v1160_v10 = vsel %vm1152_vm1, %v1151_v7, -inf  ;;  %v1175_v11 = vsel %vm1167_vm2, %v1151_v7, -inf }
 0x17e   :  { %v1161_v12 = vrot.slane %v1160_v10, 4  ;;  %v1176_v13 = vrot.slane %v1175_v11, 4 }
 0x17f   :  { %v1155_v14 = vmax.f32 %v1153_v5, %v1154_v8  ;;  %v1170_v15 = vmax.f32 %v1168_v6, %v1169_v9 }
 0x180   :  { %v1162_v16 = vmax.f32 %v1160_v10, %v1161_v12  ;;  %v1177_v17 = vmax.f32 %v1175_v11, %v1176_v13 }
 0x181   :  { %v1156_v18 = vrot.slane %v1155_v14, 2  ;;  %v1171_v19 = vrot.slane %v1170_v15, 2 }
 0x182   :  { %v1163_v20 = vrot.slane %v1162_v16, 2  ;;  %v1178_v21 = vrot.slane %v1177_v17, 2 }
 0x183   :  { %v1157_v22 = vmax.f32 %v1155_v14, %v1156_v18  ;;  %v1172_v23 = vmax.f32 %v1170_v15, %v1171_v19 }
 0x184   :  { %v1164_v24 = vmax.f32 %v1162_v16, %v1163_v20  ;;  %v1179_v25 = vmax.f32 %v1177_v17, %v1178_v21 }
 0x185   :  { %v1158_v26 = vrot.slane %v1157_v22, 1  ;;  %v1173_v27 = vrot.slane %v1172_v23, 1 }
 0x186   :  { %v1165_v28 = vrot.slane %v1164_v24, 1  ;;  %v1180_v29 = vrot.slane %v1179_v25, 1 }
 0x187   :  { %v1159_v30 = vmax.f32 %v1157_v22, %v1158_v26  ;;  %v1174_v31 = vmax.f32 %v1172_v23, %v1173_v27 }
 0x188   :  { %v1166_v32 = vmax.f32 %v1164_v24, %v1165_v28  ;;  %v1181_v33 = vmax.f32 %v1179_v25, %v1180_v29 }
 0x189   :  { %v1183_v34 = vsel %vm1182_vm4, %v1159_v30, %v1174_v31 }
 0x18a   :  { %v1184_v35 = vsel %vm1182_vm4, %v1166_v32, %v1181_v33  ;;  %v1185_v38 = vpack.c.bf16 %v1183_v34, %v1183_v34 }
 0x18b   :  { %v1186_v36 = vpack.c.bf16 %v1184_v35, %v1184_v35 }
 0x18d   :  { %1354 = vmatprep.mubr.bf16.mxu1 %v1186_v36 }
 0x18e   :  { %1355 = vmatmul.mubr.bf16.vlgmr.msra.gmra.mrb[4].mxu1 %v1185_v38 }
 0x18f   :  { %1703 = vmatpush3.bf16.msra.mxu1 %v1983_v37  ;;  %1718 = vmatprep.mubr.msk.bf16.mxu1 %vm2017_vm5, %v2016_v46 }
 0x190   :  { %1704 = vmatprep.subr.bf16.mxu1 %v2016_v46 }
 0x193   :  { %1705 = vmatpush3.bf16.msra.mxu1 %v1984_v39 }
 0x194   :  { %1706 = vmatprep.subr.bf16.mxu1 %v2016_v46 }
 0x197   :  { %1707 = vmatpush3.bf16.msra.mxu1 %v1985_v40 }
 0x198   :  { %1708 = vmatprep.subr.bf16.mxu1 %v2016_v46 }
 0x19b   :  { %1709 = vmatpush3.bf16.msra.mxu1 %v1986_v41 }
 0x19c   :  { %1710 = vmatprep.subr.bf16.mxu1 %v2016_v46 }
 0x19f   :  { %1711 = vmatpush3.bf16.msra.mxu1 %v1987_v42 }
 0x1a0   :  { %1712 = vmatprep.subr.bf16.mxu1 %v2016_v46 }
 0x1a3   :  { %1713 = vmatpush3.bf16.msra.mxu1 %v1988_v43 }
 0x1a4   :  { %1714 = vmatprep.subr.bf16.mxu1 %v2016_v46 }
 0x1a7   :  { %1715 = vmatpush3.bf16.msra.mxu1 %v1989_v44 }
 0x1a8   :  { %1716 = vmatprep.subr.bf16.mxu1 %v2016_v46 }
 0x1ab   :  { %1717 = vmatpush3.bf16.msra.mxu1 %v1990_v45 }
 0x261   :  { %v1687_v47 = vpop.f32.mrb[4].mxu1 }
 0x262   :  { %v1688_v49 = vpop.f32.mrb[5].mxu1 }
 0x263   :  { %v1689_v50 = vadd.f32 %v1688_v49, %v1687_v47  ;;  %v1690_v51 = vpop.f32.mrb[6].mxu1 }
 0x264   :  { %v1691_v52 = vpop.f32.mrb[7].mxu1 }
 0x265   :  { %v1357_v53 = vadd.f32 %v1689_v50, %v1645_v48 }
 0x267   :  { %vm1362_vm6 = vcmp.ge.f32.partialorder %v1357_v53, 0.0  ;;  %v1363_v54 = vmul.f32 0.1, %v1357_v53 }
 0x269   :  { %v1364_v55 = vsel %vm1362_vm6, %v1357_v53, %v1363_v54 }
 0x26a   :  { %v1365_v56 = vpack.c.bf16 %v1364_v55, %v1364_v55 }
 0x26c   :  { %1719 = vmatmul.mubr.bf16.vlgmr.msra.gmra.mrb[8].mxu1 %v1365_v56 }
 0x33f   :  { %v1471_v46 = vpop.f32.mrb[8].mxu1 }
 0x340   :  { %v1472_v58 = vadd.f32 %v1662_v57, %v1471_v46  ;;  %v1720_v59 = vpop.f32.mrb[9].mxu1 }
 0x341   :  { %v1474_v60 = vpop.f32.mrb[10].mxu1 }
 0x342   :  { %1477 = vst [vmem:[#allocation2] sm:$0x3] %v1472_v58  ;;  %v1721_v61 = vpop.f32.mrb[11].mxu1 }
 0x343   :  { %2002 = shalt.err (!%p1999_p4)
}
 0x344   :  { %s2003_s6 = scalar_lea.hbm %s2627_s7, 32 }
 0x345   :  { %p2004_p5 = scmp.ne.s32.totalorder %s2627_s7, %s2003_s6  ;;  %p2007_p6 = scmp.lt.u32.totalorder %s2003_s6, %s2627_s7 }
 0x347   :  { %p2009_p7 = pnand %p2007_p6, %p2004_p5 }
 0x349   :  { %2012 = shalt.err (!%p2009_p7)
}
 0x34a   :  { %1487 = dma.vmem_to_hbm [thread:$0]  %s1485_s25, 32, %s2627_s7, [#allocation3]  }
 0x34b   :  { %2013 = dma.done.wait [#allocation3], 32  }
 0x34c   :  { %2014 = vsyncadd [#allocation3], 4294967264 }
 0x34d   :  { %1491 = vsyncpa [#allocation3], 1 }

</bundles_post_ra>
